<compile_context>
chip_gen: v7x
topology: tpu7x:2x2x1
jax: 0.10.0
libtpu: 0.0.40
codegen_flags: <defaults>
</compile_context>

<pallas_src>
import functools

import jax
import jax.numpy as jnp
from jax.experimental import pallas as pl
from jax.experimental.pallas import tpu as pltpu

FEAT = 2048     # resnet50 penultimate feature width
NODES = 68      # self.linear = nn.Linear(2048, 68) -> 68 "landmark" nodes


# ---------------------------------------------------------------------------
# Single fused kernel, grid over the 2048-wide feature axis (K streaming).
# Step k:   conv stripe + ReLU + pool  ->  partial enc logits (accumulated)
# Last step: tanh -> Fx, Fe, and the banded MPNN round.
# ---------------------------------------------------------------------------
def _fused_forward_kernel(
    pix_ref,      # (B*HW, C)              f32  channels-last pixels (resident)
    convw_ref,    # (C, TK)                f32  conv stripe for this step
    convb_ref,    # (1, TK)                f32
    encw_ref,     # (TK, NODES*d)          bf16 enc weight stripe (pipelined)
    encb_ref,     # (1, NODES*d)           f32
    tencw_ref,    # (d, d)                 f32  AutoEncoder target encoder
    tencb_ref,    # (1, d)                 f32
    target_ref,   # (NODES, d)             f32
    mband_ref,    # ((GS+2)*d, GS*d)       f32  banded kron(adj_band, mpnn_w)
    mpb_ref,      # (1, NODES*d)           f32  tile(mpnn_b, NODES)
    pred_ref,     # (B, NODES*d)           f32  OUT
    fx_ref,       # (B, NODES*d)           f32  OUT
    fe_ref,       # (NODES, d)             f32  OUT
    fxacc_ref,    # (B, NODES*d)           f32  VMEM scratch (enc logits)
    fxw_ref,      # (B, (NODES+2)*d)       f32  VMEM scratch (ring-padded Fx)
    *, batch, hw, d, group):

    k = pl.program_id(0)

    @pl.when(k == 0)
    def _init():
        fxacc_ref[...] = jnp.zeros_like(fxacc_ref)

    # ---- 1) "resnet_layer" stripe: per-pixel 1x1 conv (C -> TK) + ReLU +
    #         global average pool.  Each 512-wide feature stripe is reduced
    #         immediately, so the (B*HW, FEAT) ReLU map is never live and the
    #         enc_w DMA of the *next* stripe overlaps this compute.
    # TODO(synk): full pretrained resnet50 conv stack is not reproduced; only
    #             the final projection + adaptive-avg-pool runs in-kernel.
    y = jnp.dot(pix_ref[...], convw_ref[...],
                preferred_element_type=jnp.float32)              # (B*HW, TK)
    y = jnp.maximum(y + convb_ref[...], 0.0)                     # ReLU (f32)
    tk = y.shape[-1]
    pooled = jnp.mean(y.reshape(batch, hw, tk), axis=1)          # (B, TK)

    # ---- 2) AutoEncoder feature path (partial): accumulate Fx logits.
    #         bf16 operands, f32 accumulation in VMEM scratch.
    fxacc_ref[...] += jnp.dot(pooled.astype(jnp.bfloat16), encw_ref[...],
                              preferred_element_type=jnp.float32)

    @pl.when(k == pl.num_programs(0) - 1)
    def _finalize():
        nd = NODES * d

        # Fx = tanh(feat @ enc_w + enc_b)   (lane-dense (B, 68*d) output)
        fx = jnp.tanh(fxacc_ref[...] + encb_ref[...])            # (B, 68*d)
        fx_ref[...] = fx

        # Fe = tanh(target @ tenc_w + tenc_b)
        fe_ref[...] = jnp.tanh(
            jnp.dot(target_ref[...], tencw_ref[...],
                    preferred_element_type=jnp.float32) + tencb_ref[...])

        # ---- 3) MPNN round:  pred = tanh(adj @ Fx_b @ W + b + Fx_b)
        # adj is a row-normalised ring + self-loop matrix (circulant, band=1),
        # so the node mixing only needs each node's +/-1 neighbours.  Build a
        # ring-padded copy of Fx ( [node67 | nodes 0..67 | node0] ) and apply
        # ONE shared banded operand  kron(adj_band, W)  to contiguous lane
        # windows — 4 small (B, 304) @ (304, 272) f32 matmuls instead of the
        # old (B, 1088) @ (1088, 1088) kron matmul.
        fxw_ref[:, d:d + nd] = fx
        fxw_ref[:, 0:d] = fx[:, nd - d:nd]          # left wrap  (node 67)
        fxw_ref[:, d + nd:d + nd + d] = fx[:, 0:d]  # right wrap (node 0)

        gs_d = group * d                  # lanes per node group
        win_d = gs_d + 2 * d              # window incl. both neighbours
        for g in range(NODES // group):   # static unroll (4 groups)
            lo = g * gs_d
            win = fxw_ref[:, lo:lo + win_d]                       # (B, 304)
            msg = jnp.dot(win, mband_ref[...],
                          preferred_element_type=jnp.float32)     # (B, 272)
            pred_ref[:, lo:lo + gs_d] = jnp.tanh(
                msg + mpb_ref[:, lo:lo + gs_d] + fx[:, lo:lo + gs_d])


# ---------------------------------------------------------------------------
# Model wrapper (parameter setup, host-side packing; compute lives in kernel)
# ---------------------------------------------------------------------------
class PallasModel:
    def __init__(self, key, d=16, train=True, in_ch=3, group=17):
        self.TRAIN = train
        self.d = d
        self.group = group
        assert NODES % group == 0, "node-group size must divide 68"
        ks = jax.random.split(key, 7)

        # synthetic "resnet_layer" projection (1x1 conv C -> 2048)
        self.conv_w = 0.1 * jax.random.normal(ks[0], (in_ch, FEAT), jnp.float32)
        self.conv_b = 0.01 * jax.random.normal(ks[1], (FEAT,), jnp.float32)

        # self.linear = nn.Linear(2048, 68) -- present in __init__ but UNUSED
        # in forward(), matching the PyTorch module; weights kept for fidelity.
        self.linear_w = 0.02 * jax.random.normal(ks[2], (FEAT, NODES), jnp.float32)
        self.linear_b = jnp.zeros((NODES,), jnp.float32)

        # AutoEncoder(d): feature encoder 2048 -> 68*d, target encoder d -> d
        self.enc_w = 0.02 * jax.random.normal(ks[3], (FEAT, NODES * d), jnp.float32)
        self.enc_b = jnp.zeros((NODES * d,), jnp.float32)
        self.tenc_w = 0.1 * jax.random.normal(ks[4], (d, d), jnp.float32)
        self.tenc_b = jnp.zeros((d,), jnp.float32)

        # MPNN(d): ring adjacency with self loops (row-normalized) + update W
        eye = jnp.eye(NODES, dtype=jnp.float32)
        ring = jnp.roll(eye, 1, axis=1) + jnp.roll(eye, -1, axis=1)
        adj = eye + ring
        self.adj = adj / jnp.sum(adj, axis=1, keepdims=True)
        self.mpnn_w = 0.1 * jax.random.normal(ks[5], (d, d), jnp.float32)
        self.mpnn_b = 0.05 * jax.random.normal(ks[6], (d,), jnp.float32)

        # --- packed / precomputed kernel parameters (host-side, once) -------
        self.conv_b_row = self.conv_b.reshape(1, FEAT)
        self.enc_b_row = self.enc_b.reshape(1, NODES * d)
        self.tenc_b_row = self.tenc_b.reshape(1, d)
        # bf16 copy of the HBM-dominant operand (MXU-native, halves traffic).
        # TODO(synk): per-column int8 (v5e/v6e) or fp8 (v7x) quantization of
        #             enc_w would halve this again; kept bf16 for portability.
        self.enc_w_bf16 = self.enc_w.astype(jnp.bfloat16)

        # Banded MPNN operand.  adj is circulant (ring + self-loops), so every
        # group of `group` consecutive nodes sees the same local pattern:
        #   msg[group g] = window_g @ kron(adj_band, W)
        # where window_g covers nodes [17g-1 .. 17g+17] of the ring-padded Fx.
        gs = group
        n_loc = jnp.arange(gs)                        # output nodes of group 0
        m_glob = (jnp.arange(gs + 2) - 1) % NODES     # window nodes of group 0
        adj_band = self.adj[n_loc[None, :], m_glob[:, None]]      # (gs+2, gs)
        self.mband = jnp.kron(adj_band, self.mpnn_w).astype(jnp.float32)
        self.mpnn_b_tiled = jnp.tile(self.mpnn_b, NODES).reshape(1, NODES * d)

    def __call__(self, image, target):
        B, C, H, W = image.shape
        d = self.d
        hw = H * W
        assert hw % 8 == 0, "H*W must be a multiple of 8 (sublane tile)"
        if not self.TRAIN:
            target = jnp.zeros((NODES, d), jnp.float32)

        # NCHW -> (B*HW, C).  One 6 KB XLA relayout: the kernel needs the
        # per-pixel channel axis on lanes / HW on sublanes for standard dots.
        pixels = jnp.transpose(image, (0, 2, 3, 1)).reshape(B * hw, C)

        TK = 512                       # feature-stripe width (4 grid steps)
        assert FEAT % TK == 0
        nsteps = FEAT // TK

        kernel = functools.partial(
            _fused_forward_kernel, batch=B, hw=hw, d=d, group=self.group)

        gs_d = self.group * d
        win_d = gs_d + 2 * d

        pred_flat, fx_flat, fe = pl.pallas_call(
            kernel,
            out_shape=(
                jax.ShapeDtypeStruct((B, NODES * d), jnp.float32),  # pred
                jax.ShapeDtypeStruct((B, NODES * d), jnp.float32),  # Fx
                jax.ShapeDtypeStruct((NODES, d), jnp.float32),      # Fe
            ),
            grid_spec=pltpu.PrefetchScalarGridSpec(
                num_scalar_prefetch=0,
                grid=(nsteps,),
                in_specs=[
                    pl.BlockSpec((B * hw, C), lambda k: (0, 0)),        # pixels
                    pl.BlockSpec((C, TK), lambda k: (0, k)),            # conv_w
                    pl.BlockSpec((1, TK), lambda k: (0, k)),            # conv_b
                    pl.BlockSpec((TK, NODES * d), lambda k: (k, 0)),    # enc_w
                    pl.BlockSpec((1, NODES * d), lambda k: (0, 0)),     # enc_b
                    pl.BlockSpec((d, d), lambda k: (0, 0)),             # tenc_w
                    pl.BlockSpec((1, d), lambda k: (0, 0)),             # tenc_b
                    pl.BlockSpec((NODES, d), lambda k: (0, 0)),         # target
                    pl.BlockSpec((win_d, gs_d), lambda k: (0, 0)),      # mband
                    pl.BlockSpec((1, NODES * d), lambda k: (0, 0)),     # mpnn_b
                ],
                out_specs=[
                    pl.BlockSpec((B, NODES * d), lambda k: (0, 0)),
                    pl.BlockSpec((B, NODES * d), lambda k: (0, 0)),
                    pl.BlockSpec((NODES, d), lambda k: (0, 0)),
                ],
                scratch_shapes=[
                    pltpu.VMEM((B, NODES * d), jnp.float32),        # fx logits
                    pltpu.VMEM((B, (NODES + 2) * d), jnp.float32),  # ring pad
                ],
            ),
            compiler_params=pltpu.CompilerParams(
                dimension_semantics=("arbitrary",),
                vmem_limit_bytes=32 * 1024 * 1024),
        )(pixels,
          self.conv_w, self.conv_b_row,
          self.enc_w_bf16, self.enc_b_row,
          self.tenc_w, self.tenc_b_row,
          target,
          self.mband, self.mpnn_b_tiled)

        # free row-major reshapes to the module's contract shapes
        pred = pred_flat.reshape(B, NODES, d)
        Fx = fx_flat.reshape(B, NODES, d)
        return pred, target, Fx, fe


# ---------------------------------------------------------------------------
# Pure-JAX reference.  The MPNN path is UNPACKED (adj @ Fx_b @ W + b + Fx_b)
# so it independently validates the banded/grouped in-kernel formulation.
# ---------------------------------------------------------------------------
def _reference_forward(model, image, target):
    B, C, H, W = image.shape
    d = model.d
    hp = jax.lax.Precision.HIGHEST
    x = jnp.transpose(image, (0, 2, 3, 1)).reshape(B, H * W, C)
    y = jnp.maximum(
        jnp.einsum("bpc,cf->bpf", x, model.conv_w, precision=hp) + model.conv_b,
        0.0)
    feat = jnp.mean(y, axis=1)                                     # (B, FEAT)
    feat16 = feat.astype(jnp.bfloat16).astype(jnp.float32)
    encw = model.enc_w_bf16.astype(jnp.float32)
    fx = jnp.tanh(jnp.dot(feat16, encw, precision=hp) + model.enc_b)
    Fx = fx.reshape(B, NODES, d)
    fe = jnp.tanh(jnp.dot(target, model.tenc_w, precision=hp) + model.tenc_b)
    msg = jnp.einsum("nm,bmi,ij->bnj", model.adj, Fx, model.mpnn_w,
                     precision=hp)
    pred = jnp.tanh(msg + model.mpnn_b[None, None, :] + Fx)
    return pred, target, Fx, fe


if __name__ == "__main__":
    key = jax.random.PRNGKey(0)
    k_img, k_tgt, k_param = jax.random.split(key, 3)

    B, C, H, W = 2, 3, 16, 16
    d = 16
    image = jax.random.normal(k_img, (B, C, H, W), jnp.float32)
    target = jax.random.normal(k_tgt, (NODES, d), jnp.float32)

    model = PallasModel(k_param, d=d, train=True)

    fwd = jax.jit(model.__call__)
    pred, targ, Fx, Fe = fwd(image, target)
    jax.block_until_ready((pred, targ, Fx, Fe))

    assert pred.shape == (B, NODES, d)
    assert targ.shape == (NODES, d)
    assert Fx.shape == (B, NODES, d)
    assert Fe.shape == (NODES, d)
    assert all(bool(jnp.all(jnp.isfinite(t))) for t in (pred, targ, Fx, Fe))

    # numerical sanity check against the pure-JAX (unpacked-MPNN) reference
    r_pred, r_targ, r_Fx, r_Fe = _reference_forward(model, image, target)
    for got, ref, name in ((pred, r_pred, "pred"), (Fx, r_Fx, "Fx"),
                           (Fe, r_Fe, "Fe")):
        err = float(jnp.max(jnp.abs(got - ref)))
        assert err < 2e-2, f"{name} mismatch vs reference: max |err| = {err}"

    print("KERNEL_OK")
</pallas_src>

<mosaic_0001>
module attributes {stable_mosaic.version = 11 : i64} {
  func.func @_fused_forward_kernel(%arg0: i32, %arg1: memref<512x3xf32, #tpu.memory_space<vmem>>, %arg2: memref<3x512xf32, #tpu.memory_space<vmem>>, %arg3: memref<1x512xf32, #tpu.memory_space<vmem>>, %arg4: memref<512x1088xbf16, #tpu.memory_space<vmem>>, %arg5: memref<1x1088xf32, #tpu.memory_space<vmem>>, %arg6: memref<16x16xf32, #tpu.memory_space<vmem>>, %arg7: memref<1x16xf32, #tpu.memory_space<vmem>>, %arg8: memref<68x16xf32, #tpu.memory_space<vmem>>, %arg9: memref<304x272xf32, #tpu.memory_space<vmem>>, %arg10: memref<1x1088xf32, #tpu.memory_space<vmem>>, %arg11: memref<2x1088xf32, #tpu.memory_space<vmem>>, %arg12: memref<2x1088xf32, #tpu.memory_space<vmem>>, %arg13: memref<68x16xf32, #tpu.memory_space<vmem>>, %arg14: memref<2x1088xf32, #tpu.memory_space<vmem>>, %arg15: memref<2x1120xf32, #tpu.memory_space<vmem>>) attributes {dimension_semantics = [#tpu.dimension_semantics<arbitrary>], iteration_bounds = array<i64: 4>, scalar_prefetch = 0 : i64, scratch_operands = 2 : i64, tpu.core_type = #tpu.core_type<tc>, window_params = [{pipeline_mode = #tpu.pipeline_mode<synchronous>, transform_indices = @transform_0, window_bounds = array<i64: 512, 3>}, {transform_indices = @transform_1, window_bounds = array<i64: 3, 512>}, {transform_indices = @transform_2, window_bounds = array<i64: 1, 512>}, {transform_indices = @transform_3, window_bounds = array<i64: 512, 1088>}, {pipeline_mode = #tpu.pipeline_mode<synchronous>, transform_indices = @transform_4, window_bounds = array<i64: 1, 1088>}, {pipeline_mode = #tpu.pipeline_mode<synchronous>, transform_indices = @transform_5, window_bounds = array<i64: 16, 16>}, {pipeline_mode = #tpu.pipeline_mode<synchronous>, transform_indices = @transform_6, window_bounds = array<i64: 1, 16>}, {pipeline_mode = #tpu.pipeline_mode<synchronous>, transform_indices = @transform_7, window_bounds = array<i64: 68, 16>}, {pipeline_mode = #tpu.pipeline_mode<synchronous>, transform_indices = @transform_8, window_bounds = array<i64: 304, 272>}, {pipeline_mode = #tpu.pipeline_mode<synchronous>, transform_indices = @transform_9, window_bounds = array<i64: 1, 1088>}, {pipeline_mode = #tpu.pipeline_mode<synchronous>, transform_indices = @transform_10, window_bounds = array<i64: 2, 1088>}, {pipeline_mode = #tpu.pipeline_mode<synchronous>, transform_indices = @transform_11, window_bounds = array<i64: 2, 1088>}, {pipeline_mode = #tpu.pipeline_mode<synchronous>, transform_indices = @transform_12, window_bounds = array<i64: 68, 16>}]} {
    %c0_i32 = arith.constant 0 : i32
    %0 = arith.cmpi eq, %arg0, %c0_i32 : i32
    %1 = arith.extui %0 : i1 to i32
    %c0_i32_0 = arith.constant 0 : i32
    %2 = arith.cmpi ne, %1, %c0_i32_0 : i32
    scf.if %2 {
      %cst_17 = arith.constant 0.000000e+00 : f32
      %24 = vector.broadcast %cst_17 : f32 to vector<2x1088xf32>
      %c0_18 = arith.constant 0 : index
      %c0_19 = arith.constant 0 : index
      %25 = vector.load %arg14[%c0_18, %c0_19] : memref<2x1088xf32, #tpu.memory_space<vmem>>, vector<2x1088xf32>
      tpu.vector_store %arg14[%c0_18, %c0_19], %24 {strides = array<i32>} : memref<2x1088xf32, #tpu.memory_space<vmem>>, vector<2x1088xf32>,
    } else {
    }
    %c0 = arith.constant 0 : index
    %c0_1 = arith.constant 0 : index
    %3 = vector.load %arg1[%c0, %c0_1] : memref<512x3xf32, #tpu.memory_space<vmem>>, vector<512x3xf32>
    %c0_2 = arith.constant 0 : index
    %c0_3 = arith.constant 0 : index
    %4 = vector.load %arg2[%c0_2, %c0_3] : memref<3x512xf32, #tpu.memory_space<vmem>>, vector<3x512xf32>
    %cst = arith.constant dense<0.000000e+00> : vector<512x512xf32>
    %5 = tpu.matmul %3, %4, %cst {dimension_numbers = #tpu.dot_dimension_numbers<[1], [0], [0], [1], [0, 0, 1, 1], [], []>} : vector<512x3xf32>, vector<3x512xf32>, vector<512x512xf32> -> vector<512x512xf32>
    %c0_4 = arith.constant 0 : index
    %c0_5 = arith.constant 0 : index
    %6 = vector.load %arg3[%c0_4, %c0_5] : memref<1x512xf32, #tpu.memory_space<vmem>>, vector<1x512xf32>
    %7 = vector.broadcast %6 : vector<1x512xf32> to vector<512x512xf32>
    %8 = arith.addf %5, %7 : vector<512x512xf32>
    %cst_6 = arith.constant 0.000000e+00 : f32
    %9 = vector.broadcast %cst_6 : f32 to vector<512x512xf32>
    %10 = arith.maximumf %8, %9 : vector<512x512xf32>
    %11 = vector.shape_cast %10 : vector<512x512xf32> to vector<2x256x512xf32>
    %cst_7 = arith.constant dense<0.000000e+00> : vector<2x512xf32>
    %12 = vector.multi_reduction <add>, %11, %cst_7 [1] : vector<2x256x512xf32> to vector<2x512xf32>
    %cst_8 = arith.constant 2.560000e+02 : f32
    %13 = vector.broadcast %cst_8 : f32 to vector<2x512xf32>
    %14 = arith.divf %12, %13 : vector<2x512xf32>
    %c0_9 = arith.constant 0 : index
    %c0_10 = arith.constant 0 : index
    %15 = vector.load %arg14[%c0_9, %c0_10] : memref<2x1088xf32, #tpu.memory_space<vmem>>, vector<2x1088xf32>
    %16 = arith.truncf %14 : vector<2x512xf32> to vector<2x512xbf16>
    %c0_11 = arith.constant 0 : index
    %c0_12 = arith.constant 0 : index
    %17 = vector.load %arg4[%c0_11, %c0_12] : memref<512x1088xbf16, #tpu.memory_space<vmem>>, vector<512x1088xbf16>
    %cst_13 = arith.constant dense<0.000000e+00> : vector<2x1088xf32>
    %18 = tpu.matmul %16, %17, %cst_13 {dimension_numbers = #tpu.dot_dimension_numbers<[1], [0], [0], [1], [0, 0, 1, 1], [], []>} : vector<2x512xbf16>, vector<512x1088xbf16>, vector<2x1088xf32> -> vector<2x1088xf32>
    %19 = arith.addf %15, %18 : vector<2x1088xf32>
    %c0_14 = arith.constant 0 : index
    %c0_15 = arith.constant 0 : index
    %20 = vector.load %arg14[%c0_14, %c0_15] : memref<2x1088xf32, #tpu.memory_space<vmem>>, vector<2x1088xf32>
    tpu.vector_store %arg14[%c0_14, %c0_15], %19 {strides = array<i32>} : memref<2x1088xf32, #tpu.memory_space<vmem>>, vector<2x1088xf32>,
    %c3_i32 = arith.constant 3 : i32
    %21 = arith.cmpi eq, %arg0, %c3_i32 : i32
    %22 = arith.extui %21 : i1 to i32
    %c0_i32_16 = arith.constant 0 : i32
    %23 = arith.cmpi ne, %22, %c0_i32_16 : i32
    scf.if %23 {
      %c0_17 = arith.constant 0 : index
      %c0_18 = arith.constant 0 : index
      %24 = vector.load %arg14[%c0_17, %c0_18] : memref<2x1088xf32, #tpu.memory_space<vmem>>, vector<2x1088xf32>
      %c0_19 = arith.constant 0 : index
      %c0_20 = arith.constant 0 : index
      %25 = vector.load %arg5[%c0_19, %c0_20] : memref<1x1088xf32, #tpu.memory_space<vmem>>, vector<1x1088xf32>
      %26 = vector.broadcast %25 : vector<1x1088xf32> to vector<2x1088xf32>
      %27 = arith.addf %24, %26 : vector<2x1088xf32>
      %28 = math.tanh %27 : vector<2x1088xf32>
      %c0_21 = arith.constant 0 : index
      %c0_22 = arith.constant 0 : index
      %29 = vector.load %arg12[%c0_21, %c0_22] : memref<2x1088xf32, #tpu.memory_space<vmem>>, vector<2x1088xf32>
      tpu.vector_store %arg12[%c0_21, %c0_22], %28 {strides = array<i32>} : memref<2x1088xf32, #tpu.memory_space<vmem>>, vector<2x1088xf32>,
      %c0_23 = arith.constant 0 : index
      %c0_24 = arith.constant 0 : index
      %30 = vector.load %arg8[%c0_23, %c0_24] : memref<68x16xf32, #tpu.memory_space<vmem>>, vector<68x16xf32>
      %c0_25 = arith.constant 0 : index
      %c0_26 = arith.constant 0 : index
      %31 = vector.load %arg6[%c0_25, %c0_26] : memref<16x16xf32, #tpu.memory_space<vmem>>, vector<16x16xf32>
      %cst_27 = arith.constant dense<0.000000e+00> : vector<68x16xf32>
      %32 = tpu.matmul %30, %31, %cst_27 {dimension_numbers = #tpu.dot_dimension_numbers<[1], [0], [0], [1], [0, 0, 1, 1], [], []>} : vector<68x16xf32>, vector<16x16xf32>, vector<68x16xf32> -> vector<68x16xf32>
      %c0_28 = arith.constant 0 : index
      %c0_29 = arith.constant 0 : index
      %33 = vector.load %arg7[%c0_28, %c0_29] : memref<1x16xf32, #tpu.memory_space<vmem>>, vector<1x16xf32>
      %34 = vector.broadcast %33 : vector<1x16xf32> to vector<68x16xf32>
      %35 = arith.addf %32, %34 : vector<68x16xf32>
      %36 = math.tanh %35 : vector<68x16xf32>
      %c0_30 = arith.constant 0 : index
      %c0_31 = arith.constant 0 : index
      %37 = vector.load %arg13[%c0_30, %c0_31] : memref<68x16xf32, #tpu.memory_space<vmem>>, vector<68x16xf32>
      tpu.vector_store %arg13[%c0_30, %c0_31], %36 {strides = array<i32>} : memref<68x16xf32, #tpu.memory_space<vmem>>, vector<68x16xf32>,
      %c0_32 = arith.constant 0 : index
      %c16 = arith.constant 16 : index
      %38 = vector.load %arg15[%c0_32, %c16] : memref<2x1120xf32, #tpu.memory_space<vmem>>, vector<2x1088xf32>
      tpu.vector_store %arg15[%c0_32, %c16], %28 {strides = array<i32>} : memref<2x1120xf32, #tpu.memory_space<vmem>>, vector<2x1088xf32>,
      %39 = vector.extract_strided_slice %28 {offsets = [0, 1072], sizes = [2, 16], strides = [1, 1]} : vector<2x1088xf32> to vector<2x16xf32>
      %c0_33 = arith.constant 0 : index
      %c0_34 = arith.constant 0 : index
      %40 = vector.load %arg15[%c0_33, %c0_34] : memref<2x1120xf32, #tpu.memory_space<vmem>>, vector<2x16xf32>
      tpu.vector_store %arg15[%c0_33, %c0_34], %39 {strides = array<i32>} : memref<2x1120xf32, #tpu.memory_space<vmem>>, vector<2x16xf32>,
      %41 = vector.extract_strided_slice %28 {offsets = [0, 0], sizes = [2, 16], strides = [1, 1]} : vector<2x1088xf32> to vector<2x16xf32>
      %c0_35 = arith.constant 0 : index
      %c1104 = arith.constant 1104 : index
      %42 = vector.load %arg15[%c0_35, %c1104] : memref<2x1120xf32, #tpu.memory_space<vmem>>, vector<2x16xf32>
      tpu.vector_store %arg15[%c0_35, %c1104], %41 {strides = array<i32>} : memref<2x1120xf32, #tpu.memory_space<vmem>>, vector<2x16xf32>,
      %c0_36 = arith.constant 0 : index
      %c0_37 = arith.constant 0 : index
      %43 = vector.load %arg15[%c0_36, %c0_37] : memref<2x1120xf32, #tpu.memory_space<vmem>>, vector<2x304xf32>
      %c0_38 = arith.constant 0 : index
      %c0_39 = arith.constant 0 : index
      %44 = vector.load %arg9[%c0_38, %c0_39] : memref<304x272xf32, #tpu.memory_space<vmem>>, vector<304x272xf32>
      %cst_40 = arith.constant dense<0.000000e+00> : vector<2x272xf32>
      %45 = tpu.matmul %43, %44, %cst_40 {dimension_numbers = #tpu.dot_dimension_numbers<[1], [0], [0], [1], [0, 0, 1, 1], [], []>} : vector<2x304xf32>, vector<304x272xf32>, vector<2x272xf32> -> vector<2x272xf32>
      %c0_41 = arith.constant 0 : index
      %c0_42 = arith.constant 0 : index
      %46 = vector.load %arg10[%c0_41, %c0_42] : memref<1x1088xf32, #tpu.memory_space<vmem>>, vector<1x272xf32>
      %47 = vector.broadcast %46 : vector<1x272xf32> to vector<2x272xf32>
      %48 = arith.addf %45, %47 : vector<2x272xf32>
      %49 = vector.extract_strided_slice %28 {offsets = [0, 0], sizes = [2, 272], strides = [1, 1]} : vector<2x1088xf32> to vector<2x272xf32>
      %50 = arith.addf %48, %49 : vector<2x272xf32>
      %51 = math.tanh %50 : vector<2x272xf32>
      %c0_43 = arith.constant 0 : index
      %c0_44 = arith.constant 0 : index
      %52 = vector.load %arg11[%c0_43, %c0_44] : memref<2x1088xf32, #tpu.memory_space<vmem>>, vector<2x272xf32>
      tpu.vector_store %arg11[%c0_43, %c0_44], %51 {strides = array<i32>} : memref<2x1088xf32, #tpu.memory_space<vmem>>, vector<2x272xf32>,
      %c0_45 = arith.constant 0 : index
      %c272 = arith.constant 272 : index
      %53 = vector.load %arg15[%c0_45, %c272] : memref<2x1120xf32, #tpu.memory_space<vmem>>, vector<2x304xf32>
      %c0_46 = arith.constant 0 : index
      %c0_47 = arith.constant 0 : index
      %54 = vector.load %arg9[%c0_46, %c0_47] : memref<304x272xf32, #tpu.memory_space<vmem>>, vector<304x272xf32>
      %cst_48 = arith.constant dense<0.000000e+00> : vector<2x272xf32>
      %55 = tpu.matmul %53, %54, %cst_48 {dimension_numbers = #tpu.dot_dimension_numbers<[1], [0], [0], [1], [0, 0, 1, 1], [], []>} : vector<2x304xf32>, vector<304x272xf32>, vector<2x272xf32> -> vector<2x272xf32>
      %c0_49 = arith.constant 0 : index
      %c272_50 = arith.constant 272 : index
      %56 = vector.load %arg10[%c0_49, %c272_50] : memref<1x1088xf32, #tpu.memory_space<vmem>>, vector<1x272xf32>
      %57 = vector.broadcast %56 : vector<1x272xf32> to vector<2x272xf32>
      %58 = arith.addf %55, %57 : vector<2x272xf32>
      %59 = vector.extract_strided_slice %28 {offsets = [0, 272], sizes = [2, 272], strides = [1, 1]} : vector<2x1088xf32> to vector<2x272xf32>
      %60 = arith.addf %58, %59 : vector<2x272xf32>
      %61 = math.tanh %60 : vector<2x272xf32>
      %c0_51 = arith.constant 0 : index
      %c272_52 = arith.constant 272 : index
      %62 = vector.load %arg11[%c0_51, %c272_52] : memref<2x1088xf32, #tpu.memory_space<vmem>>, vector<2x272xf32>
      tpu.vector_store %arg11[%c0_51, %c272_52], %61 {strides = array<i32>} : memref<2x1088xf32, #tpu.memory_space<vmem>>, vector<2x272xf32>,
      %c0_53 = arith.constant 0 : index
      %c544 = arith.constant 544 : index
      %63 = vector.load %arg15[%c0_53, %c544] : memref<2x1120xf32, #tpu.memory_space<vmem>>, vector<2x304xf32>
      %c0_54 = arith.constant 0 : index
      %c0_55 = arith.constant 0 : index
      %64 = vector.load %arg9[%c0_54, %c0_55] : memref<304x272xf32, #tpu.memory_space<vmem>>, vector<304x272xf32>
      %cst_56 = arith.constant dense<0.000000e+00> : vector<2x272xf32>
      %65 = tpu.matmul %63, %64, %cst_56 {dimension_numbers = #tpu.dot_dimension_numbers<[1], [0], [0], [1], [0, 0, 1, 1], [], []>} : vector<2x304xf32>, vector<304x272xf32>, vector<2x272xf32> -> vector<2x272xf32>
      %c0_57 = arith.constant 0 : index
      %c544_58 = arith.constant 544 : index
      %66 = vector.load %arg10[%c0_57, %c544_58] : memref<1x1088xf32, #tpu.memory_space<vmem>>, vector<1x272xf32>
      %67 = vector.broadcast %66 : vector<1x272xf32> to vector<2x272xf32>
      %68 = arith.addf %65, %67 : vector<2x272xf32>
      %69 = vector.extract_strided_slice %28 {offsets = [0, 544], sizes = [2, 272], strides = [1, 1]} : vector<2x1088xf32> to vector<2x272xf32>
      %70 = arith.addf %68, %69 : vector<2x272xf32>
      %71 = math.tanh %70 : vector<2x272xf32>
      %c0_59 = arith.constant 0 : index
      %c544_60 = arith.constant 544 : index
      %72 = vector.load %arg11[%c0_59, %c544_60] : memref<2x1088xf32, #tpu.memory_space<vmem>>, vector<2x272xf32>
      tpu.vector_store %arg11[%c0_59, %c544_60], %71 {strides = array<i32>} : memref<2x1088xf32, #tpu.memory_space<vmem>>, vector<2x272xf32>,
      %c0_61 = arith.constant 0 : index
      %c816 = arith.constant 816 : index
      %73 = vector.load %arg15[%c0_61, %c816] : memref<2x1120xf32, #tpu.memory_space<vmem>>, vector<2x304xf32>
      %c0_62 = arith.constant 0 : index
      %c0_63 = arith.constant 0 : index
      %74 = vector.load %arg9[%c0_62, %c0_63] : memref<304x272xf32, #tpu.memory_space<vmem>>, vector<304x272xf32>
      %cst_64 = arith.constant dense<0.000000e+00> : vector<2x272xf32>
      %75 = tpu.matmul %73, %74, %cst_64 {dimension_numbers = #tpu.dot_dimension_numbers<[1], [0], [0], [1], [0, 0, 1, 1], [], []>} : vector<2x304xf32>, vector<304x272xf32>, vector<2x272xf32> -> vector<2x272xf32>
      %c0_65 = arith.constant 0 : index
      %c816_66 = arith.constant 816 : index
      %76 = vector.load %arg10[%c0_65, %c816_66] : memref<1x1088xf32, #tpu.memory_space<vmem>>, vector<1x272xf32>
      %77 = vector.broadcast %76 : vector<1x272xf32> to vector<2x272xf32>
      %78 = arith.addf %75, %77 : vector<2x272xf32>
      %79 = vector.extract_strided_slice %28 {offsets = [0, 816], sizes = [2, 272], strides = [1, 1]} : vector<2x1088xf32> to vector<2x272xf32>
      %80 = arith.addf %78, %79 : vector<2x272xf32>
      %81 = math.tanh %80 : vector<2x272xf32>
      %c0_67 = arith.constant 0 : index
      %c816_68 = arith.constant 816 : index
      %82 = vector.load %arg11[%c0_67, %c816_68] : memref<2x1088xf32, #tpu.memory_space<vmem>>, vector<2x272xf32>
      tpu.vector_store %arg11[%c0_67, %c816_68], %81 {strides = array<i32>} : memref<2x1088xf32, #tpu.memory_space<vmem>>, vector<2x272xf32>,
    } else {
    }
    return
  }
  func.func @transform_0(%arg0: i32) -> (i32, i32) {
    %c0_i32 = arith.constant 0 : i32
    %c0_i32_0 = arith.constant 0 : i32
    %c0_i32_1 = arith.constant 0 : i32
    return %c0_i32, %c0_i32_0 : i32, i32
  }
  func.func @transform_1(%arg0: i32) -> (i32, i32) {
    %c0_i32 = arith.constant 0 : i32
    %c0_i32_0 = arith.constant 0 : i32
    return %c0_i32, %arg0 : i32, i32
  }
  func.func @transform_2(%arg0: i32) -> (i32, i32) {
    %c0_i32 = arith.constant 0 : i32
    %c0_i32_0 = arith.constant 0 : i32
    return %c0_i32, %arg0 : i32, i32
  }
  func.func @transform_3(%arg0: i32) -> (i32, i32) {
    %c0_i32 = arith.constant 0 : i32
    %c0_i32_0 = arith.constant 0 : i32
    return %arg0, %c0_i32 : i32, i32
  }
  func.func @transform_4(%arg0: i32) -> (i32, i32) {
    %c0_i32 = arith.constant 0 : i32
    %c0_i32_0 = arith.constant 0 : i32
    %c0_i32_1 = arith.constant 0 : i32
    return %c0_i32, %c0_i32_0 : i32, i32
  }
  func.func @transform_5(%arg0: i32) -> (i32, i32) {
    %c0_i32 = arith.constant 0 : i32
    %c0_i32_0 = arith.constant 0 : i32
    %c0_i32_1 = arith.constant 0 : i32
    return %c0_i32, %c0_i32_0 : i32, i32
  }
  func.func @transform_6(%arg0: i32) -> (i32, i32) {
    %c0_i32 = arith.constant 0 : i32
    %c0_i32_0 = arith.constant 0 : i32
    %c0_i32_1 = arith.constant 0 : i32
    return %c0_i32, %c0_i32_0 : i32, i32
  }
  func.func @transform_7(%arg0: i32) -> (i32, i32) {
    %c0_i32 = arith.constant 0 : i32
    %c0_i32_0 = arith.constant 0 : i32
    %c0_i32_1 = arith.constant 0 : i32
    return %c0_i32, %c0_i32_0 : i32, i32
  }
  func.func @transform_8(%arg0: i32) -> (i32, i32) {
    %c0_i32 = arith.constant 0 : i32
    %c0_i32_0 = arith.constant 0 : i32
    %c0_i32_1 = arith.constant 0 : i32
    return %c0_i32, %c0_i32_0 : i32, i32
  }
  func.func @transform_9(%arg0: i32) -> (i32, i32) {
    %c0_i32 = arith.constant 0 : i32
    %c0_i32_0 = arith.constant 0 : i32
    %c0_i32_1 = arith.constant 0 : i32
    return %c0_i32, %c0_i32_0 : i32, i32
  }
  func.func @transform_10(%arg0: i32) -> (i32, i32) {
    %c0_i32 = arith.constant 0 : i32
    %c0_i32_0 = arith.constant 0 : i32
    %c0_i32_1 = arith.constant 0 : i32
    return %c0_i32, %c0_i32_0 : i32, i32
  }
  func.func @transform_11(%arg0: i32) -> (i32, i32) {
    %c0_i32 = arith.constant 0 : i32
    %c0_i32_0 = arith.constant 0 : i32
    %c0_i32_1 = arith.constant 0 : i32
    return %c0_i32, %c0_i32_0 : i32, i32
  }
  func.func @transform_12(%arg0: i32) -> (i32, i32) {
    %c0_i32 = arith.constant 0 : i32
    %c0_i32_0 = arith.constant 0 : i32
    %c0_i32_1 = arith.constant 0 : i32
    return %c0_i32, %c0_i32_0 : i32, i32
  }
}

</mosaic_0001>

<bundles_post_ra>
// kernel: a_call__.1
= control target key start
LH: loop header
LB: loop body
LE: loop exit
PB: predicated region body
PF: predicated region fallthrough
CT: control target
= control target key end

     0   :  { %s8743_s21 = smov 0   ;;  %s11281_s0 = inlined_call_operand.vmem [shape: f32[512,3], index: 0, kind: input, shape index: {}]   ;;  %s11282_s1 = inlined_call_operand.vmem [shape: f32[3,2048], index: 1, kind: input, shape index: {}]   ;;  %s11283_s2 = inlined_call_operand.vmem [shape: f32[1,2048], index: 2, kind: input, shape index: {}]   ;;  %s11284_s3 = inlined_call_operand.vmem [shape: bf16[2048,1088], index: 3, kind: input, shape index: {}]   ;;  %s11285_s4 = inlined_call_operand.vmem [shape: f32[1,1088], index: 4, kind: input, shape index: {}]   ;;  %s11286_s5 = inlined_call_operand.vmem [shape: f32[16,16], index: 5, kind: input, shape index: {}]   ;;  %s11287_s6 = inlined_call_operand.vmem [shape: f32[1,16], index: 6, kind: input, shape index: {}]   ;;  %s11288_s7 = inlined_call_operand.vmem [shape: f32[68,16], index: 7, kind: input, shape index: {}]   ;;  %s11289_s8 = inlined_call_operand.vmem [shape: f32[304,272], index: 8, kind: input, shape index: {}]   ;;  %s11290_s9 = inlined_call_operand.vmem [shape: f32[1,1088], index: 9, kind: input, shape index: {}]   ;;  %s11291_s10 = inlined_call_operand.vmem [shape: f32[2,1088], index: 10, kind: output, shape index: {0}]   ;;  %s11292_s11 = inlined_call_operand.vmem [shape: f32[2,1088], index: 11, kind: output, shape index: {1}]   ;;  %s11293_s12 = inlined_call_operand.vmem [shape: f32[68,16], index: 12, kind: output, shape index: {2}]  }
   0x1 LB: > { %s8749_s22 = sadd.s32 4294967295, %s8664_s21   ;;  %p6884_p0 = scmp.ge.s32.totalorder %s8664_s21, 1  ;;  %s8664_s21 = sphi %s8743_s21, %s23_s21  }
   0x2   : > { %p375_p1 = scmp.lt.s32.totalorder %s8664_s21, 5 }
   0x4   : > { %p376_p2 = pnand %p6884_p0, %p375_p1 }
   0x6   : > { %379 = sbr.rel (%p376_p2) target bundleno = 1752 (0x6d8), region = 60 }
   0xd   : > { %s6885_s23 = sshll.u32 %s8749_s22, 2  ;;  %s6888_s24 = sshll.u32 %s8749_s22, 6 }
   0xe   : > { %p423_p3 = scmp.lt.s32.totalorder %s6885_s23, 15  ;;  %p434_p4 = scmp.lt.s32.totalorder %s6888_s24, 255 }
   0xf   : > { %p6890_p5 = scmp.ne.s32.totalorder %s8749_s22, 0 }
  0x10   : > { %s11357_s23 = smov (!%p423_p3, %s6885_s23), 15  ;;  %s11359_s24 = smov (!%p434_p4, %s6888_s24), 255 }
  0x11   : > { %s6886_s25 = sshll.u32 %s11357_s23, 2  ;;  %s431_s28 = scalar_lea.vmem %s11283_s2, %s11357_s23  ;;  %vm447_vm0 = vcmask (!%p6890_p5), 517120   ;;  %v8666_v0 = vmov (!%p6890_p5), 0.0  }
  0x12   : > { %s426_s13 = scalar_lea.vmem %s11282_s1, %s6886_s25  ;;  %s8150_s14 = smul.u32 36, %s11359_s24  ;;  %445 = vst [vmem:[#allocation2] sm:$0xff] (!%p6890_p5), %v8666_v0  ;;  %446 = vst [vmem:[#allocation2 + $0x8] sm:$0xff] (!%p6890_p5), %v8666_v0 }
  0x13   : > { %444 = sbr.rel (%p6890_p5) target bundleno = 26 (0x1a), region = 64  ;;  %448 = vst.msk [vmem:[#allocation2 + $0x10] sm:$0x3] (!%p6890_p5), %vm447_vm0, %v8666_v0 }
  0x14   : > { %s8768_s17 = scalar_lea.vmem %s11284_s3, %s8150_s14 }
  0x1a PF: > { %v513_v1 = vld [vmem:[%s426_s13] sm:$0x77]  ;;  %vm734_vm1 = vcmask 1042432   ;;  %v514_v2 = vld [vmem:[%s426_s13 + $0x8] sm:$0x77]  ;;  %v8667_v5 = vmov 0.0  }
  0x1b   : > { %v539_v3 = vcombine.high %v513_v1, %v513_v1  ;;  %v540_v4 = vcombine.high %v514_v2, %v514_v2  ;;  %807 = vmatprep.mubr.f32.mxu0 %v8667_v5  ;;  %1256 = vmatprep.mubr.f32.mxu1 %v8667_v5  ;;  %v449_v6 = vld [vmem:[%s11281_s0] sm:$0xff]  ;;  %vm541_vm2 = vcmask 23552   ;;  %v450_v7 = vld [vmem:[%s11281_s0 + $0x8] sm:$0xff]  ;;  %v451_v8 = vld [vmem:[%s11281_s0 + $0x10] sm:$0xff]  ;;  %vm2549_vm3 = vcmask 1041409   ;;  %p7311_p6 = scmp.ne.s32.totalorder %s8749_s22, 3 }
  0x1c   : > { %v452_v9 = vld [vmem:[%s11281_s0 + $0x18] sm:$0xff]  ;;  %v453_v10 = vld [vmem:[%s11281_s0 + $0x20] sm:$0xff]  ;;  %v454_v11 = vld [vmem:[%s11281_s0 + $0x28] sm:$0xff]  ;;  %vm4500_vm4 = vcmask 517120  }
  0x1d   : > { %6891 = vmatprep.subr.msk.mxu0 %vm734_vm1, %v539_v3  ;;  %6957 = vmatprep.subr.msk.mxu1 %vm734_vm1, %v540_v4  ;;  %v455_v12 = vld [vmem:[%s11281_s0 + $0x30] sm:$0xff]  ;;  %v456_v13 = vld [vmem:[%s11281_s0 + $0x38] sm:$0xff]  ;;  %v457_v14 = vld [vmem:[%s11281_s0 + $0x40] sm:$0xff] }
  0x1e   : > { %6892 = vmatpush1.msk.msra.mxu0 %vm734_vm1, %v513_v1  ;;  %6958 = vmatpush1.msk.msra.mxu1 %vm734_vm1, %v514_v2  ;;  %v458_v15 = vld [vmem:[%s11281_s0 + $0x48] sm:$0xff]  ;;  %v459_v16 = vld [vmem:[%s11281_s0 + $0x50] sm:$0xff]  ;;  %v460_v17 = vld [vmem:[%s11281_s0 + $0x58] sm:$0xff] }
  0x1f   : > { %6893 = vmatmul.mubr.msk.f32.vlgmr.msra.gmra.mrb[0].mxu0 %vm541_vm2, %v449_v6  ;;  %6959 = vmatmul.mubr.msk.f32.vlgmr.msra.gmra.mrb[0].mxu1 %vm541_vm2, %v449_v6  ;;  %v461_v18 = vld [vmem:[%s11281_s0 + $0x60] sm:$0xff]  ;;  %v462_v19 = vld [vmem:[%s11281_s0 + $0x68] sm:$0xff]  ;;  %v463_v20 = vld [vmem:[%s11281_s0 + $0x70] sm:$0xff] }
  0x20   : > { %813 = vmatprep.mubr.f32.mxu0 %v8667_v5  ;;  %1262 = vmatprep.mubr.f32.mxu1 %v8667_v5  ;;  %v464_v21 = vld [vmem:[%s11281_s0 + $0x78] sm:$0xff]  ;;  %v465_v22 = vld [vmem:[%s11281_s0 + $0x80] sm:$0xff]  ;;  %v466_v23 = vld [vmem:[%s11281_s0 + $0x88] sm:$0xff] }
  0x21   : > { %v467_v24 = vld [vmem:[%s11281_s0 + $0x90] sm:$0xff]  ;;  %v468_v25 = vld [vmem:[%s11281_s0 + $0x98] sm:$0xff]  ;;  %v469_v26 = vld [vmem:[%s11281_s0 + $0xa0] sm:$0xff] }
  0x22   : > { %v470_v27 = vld [vmem:[%s11281_s0 + $0xa8] sm:$0xff]  ;;  %v471_v28 = vld [vmem:[%s11281_s0 + $0xb0] sm:$0xff]  ;;  %v472_v29 = vld [vmem:[%s11281_s0 + $0xb8] sm:$0xff] }
  0x23   : > { %6894 = vmatmul.mubr.msk.f32.gmra.mrb[2].mxu0 %vm541_vm2, %v450_v7  ;;  %6960 = vmatmul.mubr.msk.f32.gmra.mrb[2].mxu1 %vm541_vm2, %v450_v7  ;;  %v473_v30 = vld [vmem:[%s11281_s0 + $0xc0] sm:$0xff]  ;;  %v474_v31 = vld [vmem:[%s11281_s0 + $0xc8] sm:$0xff]  ;;  %v475_v32 = vld [vmem:[%s11281_s0 + $0xd0] sm:$0xff] }
  0x24   : > { %819 = vmatprep.mubr.f32.mxu0 %v8667_v5  ;;  %1268 = vmatprep.mubr.f32.mxu1 %v8667_v5  ;;  %v476_v33 = vld [vmem:[%s11281_s0 + $0xd8] sm:$0xff]  ;;  %v477_v34 = vld [vmem:[%s11281_s0 + $0xe0] sm:$0xff]  ;;  %v478_v35 = vld [vmem:[%s11281_s0 + $0xe8] sm:$0xff] }
  0x25   : > { %v8173_v36 = vld [vmem:[%s8768_s17] ss:$36 sps:$4 sm:$0xff]   ;;  %v8178_v38 = vld [vmem:[%s8768_s17 + $0xc] ss:$36 sps:$4 sm:$0xff]   ;;  %v480_v41 = vld [vmem:[%s11281_s0 + $0xf8] sm:$0xff] }
  0x26   : > { %v8175_v37 = vld [vmem:[%s8768_s17 + $0x4] ss:$36 sps:$4 sm:$0xff]   ;;  %v479_v39 = vld [vmem:[%s11281_s0 + $0xf0] sm:$0xff]  ;;  %4116 = vmatprep.subr.bf16.mxu1 %v8178_v38  ;;  %v484_v49 = vld [vmem:[%s11281_s0 + $0x118] sm:$0xff] }
  0x27   : > { %6895 = vmatmul.mubr.msk.f32.gmra.mrb[4].mxu0 %vm541_vm2, %v451_v8  ;;  %6961 = vmatmul.mubr.msk.f32.gmra.mrb[4].mxu1 %vm541_vm2, %v451_v8  ;;  %v8176_v40 = vld [vmem:[%s8768_s17 + $0x8] ss:$36 sps:$4 sm:$0xff]   ;;  %v481_v42 = vld [vmem:[%s11281_s0 + $0x100] sm:$0xff]  ;;  %v8184_v46 = vld [vmem:[%s8768_s17 + $0x54] ss:$36 sps:$4 sm:$0xff]  }
  0x28   : > { %825 = vmatprep.mubr.f32.mxu0 %v8667_v5  ;;  %1274 = vmatprep.mubr.f32.mxu1 %v8667_v5  ;;  %v482_v43 = vld [vmem:[%s11281_s0 + $0x108] sm:$0xff]  ;;  %v8182_v47 = vld [vmem:[%s8768_s17 + $0x50] ss:$36 sps:$4 sm:$0xff]   ;;  %v485_v50 = vld [vmem:[%s11281_s0 + $0x120] sm:$0xff] }
  0x29   : > { %4034 = vmatprep.subr.bf16.mxu0 %v8175_v37  ;;  %4117 = vmatpush1.bf16.msra.mxu1 %v8176_v40  ;;  %v8181_v44 = vld [vmem:[%s8768_s17 + $0x4c] ss:$36 sps:$4 sm:$0xff]   ;;  %v8187_v52 = vld [vmem:[%s8768_s17 + $0x94] ss:$36 sps:$4 sm:$0xff]   ;;  %v8190_v54 = vld [vmem:[%s8768_s17 + $0x9c] ss:$36 sps:$4 sm:$0xff]  }
  0x2a   : > { %4035 = vmatpush1.bf16.msra.mxu0 %v8173_v36  ;;  %v8179_v45 = vld [vmem:[%s8768_s17 + $0x48] ss:$36 sps:$4 sm:$0xff]   ;;  %v483_v48 = vld [vmem:[%s11281_s0 + $0x110] sm:$0xff]  ;;  %4118 = vmatprep.subr.bf16.mxu1 %v8184_v46  ;;  %v8188_v55 = vld [vmem:[%s8768_s17 + $0x98] ss:$36 sps:$4 sm:$0xff]  }
  0x2b   : > { %6896 = vmatmul.mubr.msk.f32.gmra.mrb[6].mxu0 %vm541_vm2, %v452_v9  ;;  %6962 = vmatmul.mubr.msk.f32.gmra.mrb[6].mxu1 %vm541_vm2, %v452_v9  ;;  %v486_v51 = vld [vmem:[%s11281_s0 + $0x128] sm:$0xff]  ;;  %v8185_v53 = vld [vmem:[%s8768_s17 + $0x90] ss:$36 sps:$4 sm:$0xff]   ;;  %v488_v57 = vld [vmem:[%s11281_s0 + $0x138] sm:$0xff] }
  0x2c   : > { %831 = vmatprep.mubr.f32.mxu0 %v8667_v5  ;;  %1280 = vmatprep.mubr.f32.mxu1 %v8667_v5  ;;  %v487_v56 = vld [vmem:[%s11281_s0 + $0x130] sm:$0xff]  ;;  %v489_v58 = vld [vmem:[%s11281_s0 + $0x140] sm:$0xff]  ;;  %v490_v59 = vld [vmem:[%s11281_s0 + $0x148] sm:$0xff] }
  0x2d   : > { %4036 = vmatprep.subr.bf16.mxu0 %v8181_v44  ;;  %4119 = vmatpush1.bf16.msra.mxu1 %v8182_v47  ;;  %v8193_v60 = vld [vmem:[%s8768_s17 + $0xdc] ss:$36 sps:$4 sm:$0xff]   ;;  %v8196_v62 = vld [vmem:[%s8768_s17 + $0xe4] ss:$36 sps:$4 sm:$0xff]   ;;  %v491_v0 = vld [vmem:[%s11281_s0 + $0x150] sm:$0xff] }
  0x2e   : > { %4037 = vmatpush1.bf16.msra.mxu0 %v8179_v45  ;;  %4120 = vmatprep.subr.bf16.mxu1 %v8190_v54  ;;  %v8191_v61 = vld [vmem:[%s8768_s17 + $0xd8] ss:$36 sps:$4 sm:$0xff]   ;;  %v8194_v63 = vld [vmem:[%s8768_s17 + $0xe0] ss:$36 sps:$4 sm:$0xff]   ;;  %v494_v3 = vld [vmem:[%s11281_s0 + $0x168] sm:$0xff] }
  0x2f   : > { %6897 = vmatmul.mubr.msk.f32.gmra.mrb[8].mxu0 %vm541_vm2, %v453_v10  ;;  %6963 = vmatmul.mubr.msk.f32.gmra.mrb[8].mxu1 %vm541_vm2, %v453_v10  ;;  %v492_v1 = vld [vmem:[%s11281_s0 + $0x158] sm:$0xff]  ;;  %v493_v2 = vld [vmem:[%s11281_s0 + $0x160] sm:$0xff]  ;;  %v8202_v7 = vld [vmem:[%s8768_s17 + $0x12c] ss:$36 sps:$4 sm:$0xff]  }
  0x30   : > { %837 = vmatprep.mubr.f32.mxu0 %v8667_v5  ;;  %1286 = vmatprep.mubr.f32.mxu1 %v8667_v5  ;;  %v8199_v4 = vld [vmem:[%s8768_s17 + $0x124] ss:$36 sps:$4 sm:$0xff]   ;;  %v495_v9 = vld [vmem:[%s11281_s0 + $0x170] sm:$0xff]  ;;  %v496_v10 = vld [vmem:[%s11281_s0 + $0x178] sm:$0xff] }
  0x31   : > { %4038 = vmatprep.subr.bf16.mxu0 %v8187_v52  ;;  %4121 = vmatpush1.bf16.msra.mxu1 %v8188_v55  ;;  %v8197_v6 = vld [vmem:[%s8768_s17 + $0x120] ss:$36 sps:$4 sm:$0xff]   ;;  %v8200_v8 = vld [vmem:[%s8768_s17 + $0x128] ss:$36 sps:$4 sm:$0xff]   ;;  %v8212_v37 = vld [vmem:[%s8768_s17 + $0x1b8] ss:$36 sps:$4 sm:$0xff]  }
  0x32   : > { %4039 = vmatpush1.bf16.msra.mxu0 %v8185_v53  ;;  %4122 = vmatprep.subr.bf16.mxu1 %v8196_v62  ;;  %v504_v53 = vld [vmem:[%s11281_s0 + $0x1b8] sm:$0xff] }
  0x33   : > { %6898 = vmatmul.mubr.msk.f32.gmra.mrb[10].mxu0 %vm541_vm2, %v454_v11  ;;  %6964 = vmatmul.mubr.msk.f32.gmra.mrb[10].mxu1 %vm541_vm2, %v454_v11  ;;  %v497_v11 = vld [vmem:[%s11281_s0 + $0x180] sm:$0xff] }
  0x34   : > { %843 = vmatprep.mubr.f32.mxu0 %v8667_v5  ;;  %1292 = vmatprep.mubr.f32.mxu1 %v8667_v5 }
  0x35   : > { %4040 = vmatprep.subr.bf16.mxu0 %v8193_v60  ;;  %4123 = vmatpush1.bf16.msra.mxu1 %v8194_v63 }
  0x36   : > { %4041 = vmatpush1.bf16.msra.mxu0 %v8191_v61  ;;  %4124 = vmatprep.subr.bf16.mxu1 %v8202_v7 }
  0x37   : > { %6899 = vmatmul.mubr.msk.f32.gmra.mrb[12].mxu0 %vm541_vm2, %v455_v12  ;;  %6965 = vmatmul.mubr.msk.f32.gmra.mrb[12].mxu1 %vm541_vm2, %v455_v12  ;;  %v498_v12 = vld [vmem:[%s11281_s0 + $0x188] sm:$0xff] }
  0x38   : > { %849 = vmatprep.mubr.f32.mxu0 %v8667_v5  ;;  %1298 = vmatprep.mubr.f32.mxu1 %v8667_v5 }
  0x39   : > { %4042 = vmatprep.subr.bf16.mxu0 %v8199_v4  ;;  %4125 = vmatpush1.bf16.msra.mxu1 %v8200_v8  ;;  %v505_v8 = vld [vmem:[%s11281_s0 + $0x1c0] sm:$0xff] }
  0x3a   : > { %4043 = vmatpush1.bf16.msra.mxu0 %v8197_v6 }
  0x3b   : > { %6900 = vmatmul.mubr.msk.f32.gmra.mrb[14].mxu0 %vm541_vm2, %v456_v13  ;;  %6966 = vmatmul.mubr.msk.f32.gmra.mrb[14].mxu1 %vm541_vm2, %v456_v13  ;;  %v8205_v13 = vld [vmem:[%s8768_s17 + $0x16c] ss:$36 sps:$4 sm:$0xff]  }
  0x3c   : > { %855 = vmatprep.mubr.f32.mxu0 %v8667_v5  ;;  %1304 = vmatprep.mubr.f32.mxu1 %v8667_v5 }
  0x3d   : > { %4044 = vmatprep.subr.bf16.mxu0 %v8205_v13 }
  0x3f   : > { %6901 = vmatmul.mubr.msk.f32.gmra.mrb[16].mxu0 %vm541_vm2, %v457_v14  ;;  %6967 = vmatmul.mubr.msk.f32.gmra.mrb[16].mxu1 %vm541_vm2, %v457_v14  ;;  %v8203_v14 = vld [vmem:[%s8768_s17 + $0x168] ss:$36 sps:$4 sm:$0xff]  }
  0x40   : > { %861 = vmatprep.mubr.f32.mxu0 %v8667_v5  ;;  %1310 = vmatprep.mubr.f32.mxu1 %v8667_v5 }
  0x41   : > { %4045 = vmatpush1.bf16.msra.mxu0 %v8203_v14 }
  0x43   : > { %6902 = vmatmul.mubr.msk.f32.gmra.mrb[18].mxu0 %vm541_vm2, %v458_v15  ;;  %6968 = vmatmul.mubr.msk.f32.gmra.mrb[18].mxu1 %vm541_vm2, %v458_v15  ;;  %v8208_v15 = vld [vmem:[%s8768_s17 + $0x174] ss:$36 sps:$4 sm:$0xff]  }
  0x44   : > { %867 = vmatprep.mubr.f32.mxu0 %v8667_v5  ;;  %1316 = vmatprep.mubr.f32.mxu1 %v8667_v5 }
  0x45   : > { %4126 = vmatprep.subr.bf16.mxu1 %v8208_v15 }
  0x47   : > { %6903 = vmatmul.mubr.msk.f32.gmra.mrb[20].mxu0 %vm541_vm2, %v459_v16  ;;  %6969 = vmatmul.mubr.msk.f32.gmra.mrb[20].mxu1 %vm541_vm2, %v459_v16  ;;  %v8206_v16 = vld [vmem:[%s8768_s17 + $0x170] ss:$36 sps:$4 sm:$0xff]  }
  0x48   : > { %873 = vmatprep.mubr.f32.mxu0 %v8667_v5  ;;  %1322 = vmatprep.mubr.f32.mxu1 %v8667_v5 }
  0x49   : > { %4127 = vmatpush1.bf16.msra.mxu1 %v8206_v16 }
  0x4b   : > { %6904 = vmatmul.mubr.msk.f32.gmra.mrb[22].mxu0 %vm541_vm2, %v460_v17  ;;  %6970 = vmatmul.mubr.msk.f32.gmra.mrb[22].mxu1 %vm541_vm2, %v460_v17  ;;  %v499_v17 = vld [vmem:[%s11281_s0 + $0x190] sm:$0xff] }
  0x4c   : > { %879 = vmatprep.mubr.f32.mxu0 %v8667_v5  ;;  %1328 = vmatprep.mubr.f32.mxu1 %v8667_v5 }
  0x4f   : > { %6905 = vmatmul.mubr.msk.f32.gmra.mrb[24].mxu0 %vm541_vm2, %v461_v18  ;;  %6971 = vmatmul.mubr.msk.f32.gmra.mrb[24].mxu1 %vm541_vm2, %v461_v18  ;;  %v517_v18 = vlaneseq }
  0x50   : > { %885 = vmatprep.mubr.f32.mxu0 %v8667_v5  ;;  %1334 = vmatprep.mubr.f32.mxu1 %v8667_v5 }
  0x53   : > { %6906 = vmatmul.mubr.msk.f32.gmra.mrb[26].mxu0 %vm541_vm2, %v462_v19  ;;  %6972 = vmatmul.mubr.msk.f32.gmra.mrb[26].mxu1 %vm541_vm2, %v462_v19  ;;  %v500_v19 = vld [vmem:[%s11281_s0 + $0x198] sm:$0xff] }
  0x54   : > { %891 = vmatprep.mubr.f32.mxu0 %v8667_v5  ;;  %1340 = vmatprep.mubr.f32.mxu1 %v8667_v5 }
  0x57   : > { %6907 = vmatmul.mubr.msk.f32.gmra.mrb[28].mxu0 %vm541_vm2, %v463_v20  ;;  %6973 = vmatmul.mubr.msk.f32.gmra.mrb[28].mxu1 %vm541_vm2, %v463_v20  ;;  %v9157_v20 = vshrl.u32 %v517_v18, 7 }
  0x58   : > { %897 = vmatprep.mubr.f32.mxu0 %v8667_v5  ;;  %1346 = vmatprep.mubr.f32.mxu1 %v8667_v5 }
  0x5b   : > { %6908 = vmatmul.mubr.msk.f32.gmra.mrb[30].mxu0 %vm541_vm2, %v464_v21  ;;  %6974 = vmatmul.mubr.msk.f32.gmra.mrb[30].mxu1 %vm541_vm2, %v464_v21  ;;  %v9162_v21 = vsub.s32 2, %v9157_v20 }
  0x5c   : > { %903 = vmatprep.mubr.f32.mxu0 %v8667_v5  ;;  %1352 = vmatprep.mubr.f32.mxu1 %v8667_v5 }
  0x5d   : > { %11319 = vst [vmem:[#allocation4_spill] sm:$0xff] %v9162_v21 }
  0x5f   : > { %6909 = vmatmul.mubr.msk.f32.gmra.mrb[32].mxu0 %vm541_vm2, %v465_v22  ;;  %6975 = vmatmul.mubr.msk.f32.gmra.mrb[32].mxu1 %vm541_vm2, %v465_v22  ;;  %v501_v22 = vld [vmem:[%s11281_s0 + $0x1a0] sm:$0xff] }
  0x60   : > { %909 = vmatprep.mubr.f32.mxu0 %v8667_v5  ;;  %1358 = vmatprep.mubr.f32.mxu1 %v8667_v5 }
  0x63   : > { %6910 = vmatmul.mubr.msk.f32.gmra.mrb[34].mxu0 %vm541_vm2, %v466_v23  ;;  %6976 = vmatmul.mubr.msk.f32.gmra.mrb[34].mxu1 %vm541_vm2, %v466_v23  ;;  %v531_v23 = vsub.s32 3, %v9157_v20 }
  0x64   : > { %915 = vmatprep.mubr.f32.mxu0 %v8667_v5  ;;  %1364 = vmatprep.mubr.f32.mxu1 %v8667_v5 }
  0x67   : > { %6911 = vmatmul.mubr.msk.f32.gmra.mrb[36].mxu0 %vm541_vm2, %v467_v24  ;;  %6977 = vmatmul.mubr.msk.f32.gmra.mrb[36].mxu1 %vm541_vm2, %v467_v24  ;;  %v9171_v24 = vsub.s32 0, %v9157_v20 }
  0x68   : > { %921 = vmatprep.mubr.f32.mxu0 %v8667_v5  ;;  %1370 = vmatprep.mubr.f32.mxu1 %v8667_v5 }
  0x69   : > { %11320 = vst [vmem:[#allocation5_spill] sm:$0xff] %v9171_v24 }
  0x6b   : > { %6912 = vmatmul.mubr.msk.f32.gmra.mrb[38].mxu0 %vm541_vm2, %v468_v25  ;;  %6978 = vmatmul.mubr.msk.f32.gmra.mrb[38].mxu1 %vm541_vm2, %v468_v25  ;;  %v515_v25 = vld [vmem:[%s431_s28] sm:$0xf] }
  0x6c   : > { %927 = vmatprep.mubr.f32.mxu0 %v8667_v5  ;;  %1376 = vmatprep.mubr.f32.mxu1 %v8667_v5 }
  0x6f   : > { %6913 = vmatmul.mubr.msk.f32.gmra.mrb[40].mxu0 %vm541_vm2, %v469_v26  ;;  %6979 = vmatmul.mubr.msk.f32.gmra.mrb[40].mxu1 %vm541_vm2, %v469_v26  ;;  %v9179_v26 = vsub.s32 1, %v9157_v20 }
  0x70   : > { %933 = vmatprep.mubr.f32.mxu0 %v8667_v5  ;;  %1382 = vmatprep.mubr.f32.mxu1 %v8667_v5 }
  0x71   : > { %11321 = vst [vmem:[#allocation6_spill] sm:$0xff] %v9179_v26 }
  0x73   : > { %6914 = vmatmul.mubr.msk.f32.gmra.mrb[42].mxu0 %vm541_vm2, %v470_v27  ;;  %6980 = vmatmul.mubr.msk.f32.gmra.mrb[42].mxu1 %vm541_vm2, %v470_v27  ;;  %v9184_v27 = vrot.slane %v515_v25, %v9162_v21 }
  0x74   : > { %939 = vmatprep.mubr.f32.mxu0 %v8667_v5  ;;  %1388 = vmatprep.mubr.f32.mxu1 %v8667_v5 }
  0x77   : > { %6915 = vmatmul.mubr.msk.f32.gmra.mrb[44].mxu0 %vm541_vm2, %v471_v28  ;;  %6981 = vmatmul.mubr.msk.f32.gmra.mrb[44].mxu1 %vm541_vm2, %v471_v28  ;;  %v502_v28 = vld [vmem:[%s11281_s0 + $0x1a8] sm:$0xff] }
  0x78   : > { %945 = vmatprep.mubr.f32.mxu0 %v8667_v5  ;;  %1394 = vmatprep.mubr.f32.mxu1 %v8667_v5 }
  0x7b   : > { %6916 = vmatmul.mubr.msk.f32.gmra.mrb[46].mxu0 %vm541_vm2, %v472_v29  ;;  %6982 = vmatmul.mubr.msk.f32.gmra.mrb[46].mxu1 %vm541_vm2, %v472_v29  ;;  %v9193_v29 = vrot.slane %v515_v25, %v531_v23 }
  0x7c   : > { %951 = vmatprep.mubr.f32.mxu0 %v8667_v5  ;;  %1400 = vmatprep.mubr.f32.mxu1 %v8667_v5 }
  0x7f   : > { %6917 = vmatmul.mubr.msk.f32.gmra.mrb[48].mxu0 %vm541_vm2, %v473_v30  ;;  %6983 = vmatmul.mubr.msk.f32.gmra.mrb[48].mxu1 %vm541_vm2, %v473_v30  ;;  %v8211_v30 = vld [vmem:[%s8768_s17 + $0x1b4] ss:$36 sps:$4 sm:$0xff]  }
  0x80   : > { %957 = vmatprep.mubr.f32.mxu0 %v8667_v5  ;;  %1406 = vmatprep.mubr.f32.mxu1 %v8667_v5 }
  0x81   : > { %4046 = vmatprep.subr.bf16.mxu0 %v8211_v30 }
  0x83   : > { %6918 = vmatmul.mubr.msk.f32.gmra.mrb[50].mxu0 %vm541_vm2, %v474_v31  ;;  %6984 = vmatmul.mubr.msk.f32.gmra.mrb[50].mxu1 %vm541_vm2, %v474_v31  ;;  %v9197_v31 = vrot.slane %v515_v25, %v9171_v24 }
  0x84   : > { %963 = vmatprep.mubr.f32.mxu0 %v8667_v5  ;;  %1412 = vmatprep.mubr.f32.mxu1 %v8667_v5 }
  0x87   : > { %6919 = vmatmul.mubr.msk.f32.gmra.mrb[52].mxu0 %vm541_vm2, %v475_v32  ;;  %6985 = vmatmul.mubr.msk.f32.gmra.mrb[52].mxu1 %vm541_vm2, %v475_v32  ;;  %v8209_v32 = vld [vmem:[%s8768_s17 + $0x1b0] ss:$36 sps:$4 sm:$0xff]  }
  0x88   : > { %969 = vmatprep.mubr.f32.mxu0 %v8667_v5  ;;  %1418 = vmatprep.mubr.f32.mxu1 %v8667_v5 }
  0x89   : > { %4047 = vmatpush1.bf16.msra.mxu0 %v8209_v32  ;;  %v506_v32 = vld [vmem:[%s11281_s0 + $0x1c8] sm:$0xff] }
  0x8b   : > { %6920 = vmatmul.mubr.msk.f32.gmra.mrb[54].mxu0 %vm541_vm2, %v476_v33  ;;  %6986 = vmatmul.mubr.msk.f32.gmra.mrb[54].mxu1 %vm541_vm2, %v476_v33  ;;  %v8214_v33 = vld [vmem:[%s8768_s17 + $0x1bc] ss:$36 sps:$4 sm:$0xff]  }
  0x8c   : > { %975 = vmatprep.mubr.f32.mxu0 %v8667_v5  ;;  %1424 = vmatprep.mubr.f32.mxu1 %v8667_v5 }
  0x8d   : > { %4128 = vmatprep.subr.bf16.mxu1 %v8214_v33 }
  0x8e   : > { %4129 = vmatpush1.bf16.msra.mxu1 %v8212_v37 }
  0x8f   : > { %6921 = vmatmul.mubr.msk.f32.gmra.mrb[56].mxu0 %vm541_vm2, %v477_v34  ;;  %6987 = vmatmul.mubr.msk.f32.gmra.mrb[56].mxu1 %vm541_vm2, %v477_v34 }
  0x90   : > { %981 = vmatprep.mubr.f32.mxu0 %v8667_v5  ;;  %1430 = vmatprep.mubr.f32.mxu1 %v8667_v5 }
  0x93   : > { %6922 = vmatmul.mubr.msk.f32.gmra.mrb[58].mxu0 %vm541_vm2, %v478_v35  ;;  %6988 = vmatmul.mubr.msk.f32.gmra.mrb[58].mxu1 %vm541_vm2, %v478_v35  ;;  %v9202_v35 = vrot.slane %v515_v25, %v9179_v26 }
  0x94   : > { %987 = vmatprep.mubr.f32.mxu0 %v8667_v5  ;;  %1436 = vmatprep.mubr.f32.mxu1 %v8667_v5 }
  0x97   : > { %6923 = vmatmul.mubr.msk.f32.gmra.mrb[60].mxu0 %vm541_vm2, %v479_v39  ;;  %6989 = vmatmul.mubr.msk.f32.gmra.mrb[60].mxu1 %vm541_vm2, %v479_v39 }
  0x98   : > { %993 = vmatprep.mubr.f32.mxu0 %v8667_v5  ;;  %1442 = vmatprep.mubr.f32.mxu1 %v8667_v5 }
  0x9b   : > { %6924 = vmatmul.mubr.msk.f32.gmra.mrb[62].mxu0 %vm541_vm2, %v480_v41  ;;  %6990 = vmatmul.mubr.msk.f32.gmra.mrb[62].mxu1 %vm541_vm2, %v480_v41  ;;  %v503_v41 = vld [vmem:[%s11281_s0 + $0x1b0] sm:$0xff] }
  0x9c   : > { %999 = vmatprep.mubr.f32.mxu0 %v8667_v5  ;;  %1448 = vmatprep.mubr.f32.mxu1 %v8667_v5 }
  0x9f   : > { %6925 = vmatmul.mubr.msk.f32.gmra.mrb[64].mxu0 %vm541_vm2, %v481_v42  ;;  %6991 = vmatmul.mubr.msk.f32.gmra.mrb[64].mxu1 %vm541_vm2, %v481_v42 }
  0xa0   : > { %1005 = vmatprep.mubr.f32.mxu0 %v8667_v5  ;;  %1454 = vmatprep.mubr.f32.mxu1 %v8667_v5 }
  0xa3   : > { %6926 = vmatmul.mubr.msk.f32.gmra.mrb[66].mxu0 %vm541_vm2, %v482_v43  ;;  %6992 = vmatmul.mubr.msk.f32.gmra.mrb[66].mxu1 %vm541_vm2, %v482_v43 }
  0xa4   : > { %1011 = vmatprep.mubr.f32.mxu0 %v8667_v5  ;;  %1460 = vmatprep.mubr.f32.mxu1 %v8667_v5 }
  0xa7   : > { %6927 = vmatmul.mubr.msk.f32.gmra.mrb[68].mxu0 %vm541_vm2, %v483_v48  ;;  %6993 = vmatmul.mubr.msk.f32.gmra.mrb[68].mxu1 %vm541_vm2, %v483_v48 }
  0xa8   : > { %1017 = vmatprep.mubr.f32.mxu0 %v8667_v5  ;;  %1466 = vmatprep.mubr.f32.mxu1 %v8667_v5 }
  0xab   : > { %6928 = vmatmul.mubr.msk.f32.gmra.mrb[70].mxu0 %vm541_vm2, %v484_v49  ;;  %6994 = vmatmul.mubr.msk.f32.gmra.mrb[70].mxu1 %vm541_vm2, %v484_v49 }
  0xac   : > { %1023 = vmatprep.mubr.f32.mxu0 %v8667_v5  ;;  %1472 = vmatprep.mubr.f32.mxu1 %v8667_v5 }
  0xaf   : > { %6929 = vmatmul.mubr.msk.f32.gmra.mrb[72].mxu0 %vm541_vm2, %v485_v50  ;;  %6995 = vmatmul.mubr.msk.f32.gmra.mrb[72].mxu1 %vm541_vm2, %v485_v50 }
  0xb0   : > { %1029 = vmatprep.mubr.f32.mxu0 %v8667_v5  ;;  %1478 = vmatprep.mubr.f32.mxu1 %v8667_v5 }
  0xb3   : > { %6930 = vmatmul.mubr.msk.f32.gmra.mrb[74].mxu0 %vm541_vm2, %v486_v51  ;;  %6996 = vmatmul.mubr.msk.f32.gmra.mrb[74].mxu1 %vm541_vm2, %v486_v51 }
  0xb4   : > { %1035 = vmatprep.mubr.f32.mxu0 %v8667_v5  ;;  %1484 = vmatprep.mubr.f32.mxu1 %v8667_v5 }
  0xb7   : > { %6931 = vmatmul.mubr.msk.f32.gmra.mrb[76].mxu0 %vm541_vm2, %v487_v56  ;;  %6997 = vmatmul.mubr.msk.f32.gmra.mrb[76].mxu1 %vm541_vm2, %v487_v56 }
  0xb8   : > { %1041 = vmatprep.mubr.f32.mxu0 %v8667_v5  ;;  %1490 = vmatprep.mubr.f32.mxu1 %v8667_v5 }
  0xbb   : > { %6932 = vmatmul.mubr.msk.f32.gmra.mrb[78].mxu0 %vm541_vm2, %v488_v57  ;;  %6998 = vmatmul.mubr.msk.f32.gmra.mrb[78].mxu1 %vm541_vm2, %v488_v57 }
  0xbc   : > { %1047 = vmatprep.mubr.f32.mxu0 %v8667_v5  ;;  %1496 = vmatprep.mubr.f32.mxu1 %v8667_v5 }
  0xbf   : > { %6933 = vmatmul.mubr.msk.f32.gmra.mrb[80].mxu0 %vm541_vm2, %v489_v58  ;;  %6999 = vmatmul.mubr.msk.f32.gmra.mrb[80].mxu1 %vm541_vm2, %v489_v58 }
  0xc0   : > { %1053 = vmatprep.mubr.f32.mxu0 %v8667_v5  ;;  %1502 = vmatprep.mubr.f32.mxu1 %v8667_v5 }
  0xc3   : > { %6934 = vmatmul.mubr.msk.f32.gmra.mrb[82].mxu0 %vm541_vm2, %v490_v59  ;;  %7000 = vmatmul.mubr.msk.f32.gmra.mrb[82].mxu1 %vm541_vm2, %v490_v59 }
  0xc4   : > { %1059 = vmatprep.mubr.f32.mxu0 %v8667_v5  ;;  %1508 = vmatprep.mubr.f32.mxu1 %v8667_v5 }
  0xc7   : > { %6935 = vmatmul.mubr.msk.f32.gmra.mrb[84].mxu0 %vm541_vm2, %v491_v0  ;;  %7001 = vmatmul.mubr.msk.f32.gmra.mrb[84].mxu1 %vm541_vm2, %v491_v0 }
  0xc8   : > { %1065 = vmatprep.mubr.f32.mxu0 %v8667_v5  ;;  %1514 = vmatprep.mubr.f32.mxu1 %v8667_v5 }
  0xcb   : > { %6936 = vmatmul.mubr.msk.f32.gmra.mrb[86].mxu0 %vm541_vm2, %v492_v1  ;;  %7002 = vmatmul.mubr.msk.f32.gmra.mrb[86].mxu1 %vm541_vm2, %v492_v1 }
  0xcc   : > { %1071 = vmatprep.mubr.f32.mxu0 %v8667_v5  ;;  %1520 = vmatprep.mubr.f32.mxu1 %v8667_v5 }
  0xcf   : > { %6937 = vmatmul.mubr.msk.f32.gmra.mrb[88].mxu0 %vm541_vm2, %v493_v2  ;;  %7003 = vmatmul.mubr.msk.f32.gmra.mrb[88].mxu1 %vm541_vm2, %v493_v2 }
  0xd0   : > { %1077 = vmatprep.mubr.f32.mxu0 %v8667_v5  ;;  %1526 = vmatprep.mubr.f32.mxu1 %v8667_v5 }
  0xd3   : > { %6938 = vmatmul.mubr.msk.f32.gmra.mrb[90].mxu0 %vm541_vm2, %v494_v3  ;;  %7004 = vmatmul.mubr.msk.f32.gmra.mrb[90].mxu1 %vm541_vm2, %v494_v3 }
  0xd4   : > { %1083 = vmatprep.mubr.f32.mxu0 %v8667_v5  ;;  %1532 = vmatprep.mubr.f32.mxu1 %v8667_v5 }
  0xd7   : > { %6939 = vmatmul.mubr.msk.f32.gmra.mrb[92].mxu0 %vm541_vm2, %v495_v9  ;;  %7005 = vmatmul.mubr.msk.f32.gmra.mrb[92].mxu1 %vm541_vm2, %v495_v9 }
  0xd8   : > { %1089 = vmatprep.mubr.f32.mxu0 %v8667_v5  ;;  %1538 = vmatprep.mubr.f32.mxu1 %v8667_v5 }
  0xdb   : > { %6940 = vmatmul.mubr.msk.f32.gmra.mrb[94].mxu0 %vm541_vm2, %v496_v10  ;;  %7006 = vmatmul.mubr.msk.f32.gmra.mrb[94].mxu1 %vm541_vm2, %v496_v10 }
  0xdc   : > { %1095 = vmatprep.mubr.f32.mxu0 %v8667_v5  ;;  %1544 = vmatprep.mubr.f32.mxu1 %v8667_v5 }
  0xdf   : > { %6941 = vmatmul.mubr.msk.f32.gmra.mrb[96].mxu0 %vm541_vm2, %v497_v11  ;;  %7007 = vmatmul.mubr.msk.f32.gmra.mrb[96].mxu1 %vm541_vm2, %v497_v11 }
  0xe0   : > { %1101 = vmatprep.mubr.f32.mxu0 %v8667_v5  ;;  %1550 = vmatprep.mubr.f32.mxu1 %v8667_v5 }
  0xe3   : > { %6942 = vmatmul.mubr.msk.f32.gmra.mrb[98].mxu0 %vm541_vm2, %v498_v12  ;;  %7008 = vmatmul.mubr.msk.f32.gmra.mrb[98].mxu1 %vm541_vm2, %v498_v12 }
  0xe4   : > { %1107 = vmatprep.mubr.f32.mxu0 %v8667_v5  ;;  %1556 = vmatprep.mubr.f32.mxu1 %v8667_v5 }
  0xe7   : > { %6943 = vmatmul.mubr.msk.f32.gmra.mrb[100].mxu0 %vm541_vm2, %v499_v17  ;;  %7009 = vmatmul.mubr.msk.f32.gmra.mrb[100].mxu1 %vm541_vm2, %v499_v17 }
  0xe8   : > { %1113 = vmatprep.mubr.f32.mxu0 %v8667_v5  ;;  %1562 = vmatprep.mubr.f32.mxu1 %v8667_v5 }
  0xeb   : > { %6944 = vmatmul.mubr.msk.f32.gmra.mrb[102].mxu0 %vm541_vm2, %v500_v19  ;;  %7010 = vmatmul.mubr.msk.f32.gmra.mrb[102].mxu1 %vm541_vm2, %v500_v19 }
  0xec   : > { %1119 = vmatprep.mubr.f32.mxu0 %v8667_v5  ;;  %1568 = vmatprep.mubr.f32.mxu1 %v8667_v5 }
  0xef   : > { %6945 = vmatmul.mubr.msk.f32.gmra.mrb[104].mxu0 %vm541_vm2, %v501_v22  ;;  %7011 = vmatmul.mubr.msk.f32.gmra.mrb[104].mxu1 %vm541_vm2, %v501_v22 }
  0xf0   : > { %1125 = vmatprep.mubr.f32.mxu0 %v8667_v5  ;;  %1574 = vmatprep.mubr.f32.mxu1 %v8667_v5 }
  0xf2   : > { %v809_v34 = vpop.f32.mrb[0].mxu0  ;;  %v1258_v36 = vpop.f32.mrb[0].mxu1 }
  0xf3   : > { %v811_v38 = vpop.f32.mrb[1].mxu0  ;;  %6946 = vmatmul.mubr.msk.f32.gmra.mrb[106].mxu0 %vm541_vm2, %v502_v28  ;;  %7012 = vmatmul.mubr.msk.f32.gmra.mrb[106].mxu1 %vm541_vm2, %v502_v28  ;;  %v1259_v39 = vadd.f32 %v1258_v36, %v9184_v27  ;;  %v1260_v40 = vpop.f32.mrb[1].mxu1  ;;  %v810_v43 = vadd.f32 %v809_v34, %v9197_v31 }
  0xf4   : > { %1131 = vmatprep.mubr.f32.mxu0 %v8667_v5  ;;  %1580 = vmatprep.mubr.f32.mxu1 %v8667_v5  ;;  %v1261_v42 = vadd.f32 %v1260_v40, %v9193_v29  ;;  %v812_v44 = vadd.f32 %v811_v38, %v9202_v35 }
  0xf5   : > { %v1643_v49 = vmax.f32 %v1259_v39, 0.0  ;;  %v1641_v56 = vmax.f32 %v810_v43, 0.0 }
  0xf6   : > { %v815_v45 = vpop.f32.mrb[2].mxu0  ;;  %v1264_v46 = vpop.f32.mrb[2].mxu1  ;;  %v1644_v54 = vmax.f32 %v1261_v42, 0.0  ;;  %v1642_v59 = vmax.f32 %v812_v44, 0.0 }
  0xf7   : > { %v816_v47 = vadd.f32 %v815_v45, %v9197_v31  ;;  %v817_v48 = vpop.f32.mrb[3].mxu0  ;;  %6947 = vmatmul.mubr.msk.f32.gmra.mrb[108].mxu0 %vm541_vm2, %v503_v41  ;;  %7013 = vmatmul.mubr.msk.f32.gmra.mrb[108].mxu1 %vm541_vm2, %v503_v41  ;;  %v1265_v50 = vadd.f32 %v1264_v46, %v9184_v27  ;;  %v1266_v51 = vpop.f32.mrb[3].mxu1 }
  0xf8   : > { %v818_v52 = vadd.f32 %v817_v48, %v9202_v35  ;;  %1137 = vmatprep.mubr.f32.mxu0 %v8667_v5  ;;  %1586 = vmatprep.mubr.f32.mxu1 %v8667_v5  ;;  %v1267_v55 = vadd.f32 %v1266_v51, %v9193_v29  ;;  %v507_v51 = vld [vmem:[%s11281_s0 + $0x1d0] sm:$0xff] }
  0xf9   : > { %v1645_v57 = vmax.f32 %v816_v47, 0.0  ;;  %v1647_v58 = vmax.f32 %v1265_v50, 0.0 }
  0xfa   : > { %v1646_v60 = vmax.f32 %v818_v52, 0.0  ;;  %v821_v61 = vpop.f32.mrb[4].mxu0  ;;  %v1648_v62 = vmax.f32 %v1267_v55, 0.0  ;;  %v1270_v63 = vpop.f32.mrb[4].mxu1 }
  0xfb   : > { %v1897_v0 = vadd.f32 %v1645_v57, %v1641_v56  ;;  %v822_v1 = vadd.f32 %v821_v61, %v9197_v31  ;;  %v823_v2 = vpop.f32.mrb[5].mxu0  ;;  %6948 = vmatmul.mubr.msk.f32.gmra.mrb[110].mxu0 %vm541_vm2, %v504_v53  ;;  %7014 = vmatmul.mubr.msk.f32.gmra.mrb[110].mxu1 %vm541_vm2, %v504_v53  ;;  %v1971_v3 = vadd.f32 %v1647_v58, %v1643_v49  ;;  %v1272_v4 = vpop.f32.mrb[5].mxu1 }
  0xfc   : > { %v1934_v6 = vadd.f32 %v1646_v60, %v1642_v59  ;;  %v824_v7 = vadd.f32 %v823_v2, %v9202_v35  ;;  %1143 = vmatprep.mubr.f32.mxu0 %v8667_v5  ;;  %1592 = vmatprep.mubr.f32.mxu1 %v8667_v5  ;;  %v2008_v9 = vadd.f32 %v1648_v62, %v1644_v54  ;;  %v8215_v60 = vld [vmem:[%s8768_s17 + $0x1f8] ss:$36 sps:$4 sm:$0xff]  }
  0xfd   : > { %v1649_v10 = vmax.f32 %v822_v1, 0.0  ;;  %v1271_v11 = vadd.f32 %v1270_v63, %v9184_v27  ;;  %v1273_v12 = vadd.f32 %v1272_v4, %v9193_v29 }
  0xfe   : > { %v1650_v13 = vmax.f32 %v824_v7, 0.0  ;;  %v827_v14 = vpop.f32.mrb[6].mxu0  ;;  %v1276_v15 = vpop.f32.mrb[6].mxu1  ;;  %v508_v7 = vld [vmem:[%s11281_s0 + $0x1d8] sm:$0xff] }
  0xff   : > { %v1898_v16 = vadd.f32 %v1897_v0, %v1649_v10  ;;  %v828_v17 = vadd.f32 %v827_v14, %v9197_v31  ;;  %v829_v18 = vpop.f32.mrb[7].mxu0  ;;  %6949 = vmatmul.mubr.msk.f32.gmra.mrb[112].mxu0 %vm541_vm2, %v505_v8  ;;  %7015 = vmatmul.mubr.msk.f32.gmra.mrb[112].mxu1 %vm541_vm2, %v505_v8  ;;  %v1651_v19 = vmax.f32 %v1271_v11, 0.0  ;;  %v1652_v22 = vmax.f32 %v1273_v12, 0.0  ;;  %v1278_v25 = vpop.f32.mrb[7].mxu1 }
 0x100   : > { %v1935_v28 = vadd.f32 %v1934_v6, %v1650_v13  ;;  %v830_v30 = vadd.f32 %v829_v18, %v9202_v35  ;;  %1149 = vmatprep.mubr.f32.mxu0 %v8667_v5  ;;  %1598 = vmatprep.mubr.f32.mxu1 %v8667_v5  ;;  %v1277_v33 = vadd.f32 %v1276_v15, %v9184_v27  ;;  %v8218_v13 = vld [vmem:[%s8768_s17 + $0x200] ss:$36 sps:$4 sm:$0xff]  }
 0x101   : > { %v1653_v34 = vmax.f32 %v828_v17, 0.0  ;;  %v1972_v36 = vadd.f32 %v1971_v3, %v1651_v19  ;;  %v2009_v37 = vadd.f32 %v2008_v9, %v1652_v22  ;;  %v1279_v38 = vadd.f32 %v1278_v25, %v9193_v29  ;;  %v8217_v3 = vld [vmem:[%s8768_s17 + $0x1fc] ss:$36 sps:$4 sm:$0xff]   ;;  %v8220_v9 = vld [vmem:[%s8768_s17 + $0x204] ss:$36 sps:$4 sm:$0xff]  }
 0x102   : > { %v1654_v39 = vmax.f32 %v830_v30, 0.0  ;;  %v833_v40 = vpop.f32.mrb[8].mxu0  ;;  %v1655_v41 = vmax.f32 %v1277_v33, 0.0  ;;  %v1282_v42 = vpop.f32.mrb[8].mxu1  ;;  %4048 = vmatprep.subr.bf16.mxu0 %v8217_v3  ;;  %4130 = vmatprep.subr.bf16.mxu1 %v8220_v9 }
 0x103   : > { %v1899_v43 = vadd.f32 %v1898_v16, %v1653_v34  ;;  %v834_v44 = vadd.f32 %v833_v40, %v9197_v31  ;;  %v835_v45 = vpop.f32.mrb[9].mxu0  ;;  %6950 = vmatmul.mubr.msk.f32.gmra.mrb[114].mxu0 %vm541_vm2, %v506_v32  ;;  %7016 = vmatmul.mubr.msk.f32.gmra.mrb[114].mxu1 %vm541_vm2, %v506_v32  ;;  %v1656_v46 = vmax.f32 %v1279_v38, 0.0  ;;  %v1283_v47 = vadd.f32 %v1282_v42, %v9184_v27  ;;  %v1284_v48 = vpop.f32.mrb[9].mxu1  ;;  %v509_v34 = vld [vmem:[%s11281_s0 + $0x1e0] sm:$0xff] }
 0x104   : > { %v1936_v49 = vadd.f32 %v1935_v28, %v1654_v39  ;;  %v836_v50 = vadd.f32 %v835_v45, %v9202_v35  ;;  %1155 = vmatprep.mubr.f32.mxu0 %v8667_v5  ;;  %1604 = vmatprep.mubr.f32.mxu1 %v8667_v5  ;;  %v1973_v52 = vadd.f32 %v1972_v36, %v1655_v41 }
 0x105   : > { %v1657_v53 = vmax.f32 %v834_v44, 0.0  ;;  %v2010_v54 = vadd.f32 %v2009_v37, %v1656_v46  ;;  %v1659_v55 = vmax.f32 %v1283_v47, 0.0  ;;  %v1285_v56 = vadd.f32 %v1284_v48, %v9193_v29  ;;  %4049 = vmatpush1.bf16.msra.mxu0 %v8215_v60  ;;  %4131 = vmatpush1.bf16.msra.mxu1 %v8218_v13 }
 0x106   : > { %v1658_v57 = vmax.f32 %v836_v50, 0.0  ;;  %v839_v58 = vpop.f32.mrb[10].mxu0  ;;  %v1288_v59 = vpop.f32.mrb[10].mxu1 }
 0x107   : > { %v1900_v61 = vadd.f32 %v1899_v43, %v1657_v53  ;;  %v840_v62 = vadd.f32 %v839_v58, %v9197_v31  ;;  %v841_v63 = vpop.f32.mrb[11].mxu0  ;;  %6951 = vmatmul.mubr.msk.f32.gmra.mrb[116].mxu0 %vm541_vm2, %v507_v51  ;;  %7017 = vmatmul.mubr.msk.f32.gmra.mrb[116].mxu1 %vm541_vm2, %v507_v51  ;;  %v1974_v0 = vadd.f32 %v1973_v52, %v1659_v55  ;;  %v1660_v1 = vmax.f32 %v1285_v56, 0.0  ;;  %v1290_v2 = vpop.f32.mrb[11].mxu1  ;;  %v510_v52 = vld [vmem:[%s11281_s0 + $0x1e8] sm:$0xff]  ;;  %v8221_v58 = vld [vmem:[%s8768_s17 + $0x240] ss:$36 sps:$4 sm:$0xff]  }
 0x108   : > { %v1937_v4 = vadd.f32 %v1936_v49, %v1658_v57  ;;  %v842_v6 = vadd.f32 %v841_v63, %v9202_v35  ;;  %1161 = vmatprep.mubr.f32.mxu0 %v8667_v5  ;;  %1610 = vmatprep.mubr.f32.mxu1 %v8667_v5  ;;  %v1289_v8 = vadd.f32 %v1288_v59, %v9184_v27  ;;  %v8226_v59 = vld [vmem:[%s8768_s17 + $0x24c] ss:$36 sps:$4 sm:$0xff]  }
 0x109   : > { %v1661_v10 = vmax.f32 %v840_v62, 0.0  ;;  %v2011_v11 = vadd.f32 %v2010_v54, %v1660_v1  ;;  %v1291_v12 = vadd.f32 %v1290_v2, %v9193_v29  ;;  %v8223_v54 = vld [vmem:[%s8768_s17 + $0x244] ss:$36 sps:$4 sm:$0xff]   ;;  %4132 = vmatprep.subr.bf16.mxu1 %v8226_v59 }
 0x10a   : > { %v1662_v14 = vmax.f32 %v842_v6, 0.0  ;;  %v845_v15 = vpop.f32.mrb[12].mxu0  ;;  %v1663_v16 = vmax.f32 %v1289_v8, 0.0  ;;  %v1294_v17 = vpop.f32.mrb[12].mxu1  ;;  %4050 = vmatprep.subr.bf16.mxu0 %v8223_v54 }
 0x10b   : > { %v1901_v18 = vadd.f32 %v1900_v61, %v1661_v10  ;;  %v846_v19 = vadd.f32 %v845_v15, %v9197_v31  ;;  %v847_v22 = vpop.f32.mrb[13].mxu0  ;;  %6952 = vmatmul.mubr.msk.f32.gmra.mrb[118].mxu0 %vm541_vm2, %v508_v7  ;;  %7018 = vmatmul.mubr.msk.f32.gmra.mrb[118].mxu1 %vm541_vm2, %v508_v7  ;;  %v1664_v25 = vmax.f32 %v1291_v12, 0.0  ;;  %v1295_v28 = vadd.f32 %v1294_v17, %v9184_v27  ;;  %v1296_v30 = vpop.f32.mrb[13].mxu1  ;;  %v511_v10 = vld [vmem:[%s11281_s0 + $0x1f0] sm:$0xff] }
 0x10c   : > { %v1938_v32 = vadd.f32 %v1937_v4, %v1662_v14  ;;  %v848_v33 = vadd.f32 %v847_v22, %v9202_v35  ;;  %1167 = vmatprep.mubr.f32.mxu0 %v8667_v5  ;;  %1616 = vmatprep.mubr.f32.mxu1 %v8667_v5  ;;  %v1975_v36 = vadd.f32 %v1974_v0, %v1663_v16  ;;  %v8224_v0 = vld [vmem:[%s8768_s17 + $0x248] ss:$36 sps:$4 sm:$0xff]  }
 0x10d   : > { %v1665_v37 = vmax.f32 %v846_v19, 0.0  ;;  %v2012_v38 = vadd.f32 %v2011_v11, %v1664_v25  ;;  %v1667_v39 = vmax.f32 %v1295_v28, 0.0  ;;  %v1297_v40 = vadd.f32 %v1296_v30, %v9193_v29  ;;  %4051 = vmatpush1.bf16.msra.mxu0 %v8221_v58  ;;  %4133 = vmatpush1.bf16.msra.mxu1 %v8224_v0 }
 0x10e   : > { %v1666_v41 = vmax.f32 %v848_v33, 0.0  ;;  %v851_v42 = vpop.f32.mrb[14].mxu0  ;;  %v1300_v43 = vpop.f32.mrb[14].mxu1 }
 0x10f   : > { %v1902_v44 = vadd.f32 %v1901_v18, %v1665_v37  ;;  %v852_v45 = vadd.f32 %v851_v42, %v9197_v31  ;;  %v853_v46 = vpop.f32.mrb[15].mxu0  ;;  %6953 = vmatmul.mubr.msk.f32.gmra.mrb[120].mxu0 %vm541_vm2, %v509_v34  ;;  %7019 = vmatmul.mubr.msk.f32.gmra.mrb[120].mxu1 %vm541_vm2, %v509_v34  ;;  %v1976_v47 = vadd.f32 %v1975_v36, %v1667_v39  ;;  %v1668_v48 = vmax.f32 %v1297_v40, 0.0  ;;  %v1302_v49 = vpop.f32.mrb[15].mxu1  ;;  %v512_v36 = vld [vmem:[%s11281_s0 + $0x1f8] sm:$0xff] }
 0x110   : > { %v1939_v50 = vadd.f32 %v1938_v32, %v1666_v41  ;;  %v854_v51 = vadd.f32 %v853_v46, %v9202_v35  ;;  %1173 = vmatprep.mubr.f32.mxu0 %v8667_v5  ;;  %1622 = vmatprep.mubr.f32.mxu1 %v8667_v5  ;;  %v1301_v53 = vadd.f32 %v1300_v43, %v9184_v27 }
 0x111   : > { %v1669_v55 = vmax.f32 %v852_v45, 0.0  ;;  %v2013_v56 = vadd.f32 %v2012_v38, %v1668_v48  ;;  %v1303_v57 = vadd.f32 %v1302_v49, %v9193_v29 }
 0x112   : > { %v1670_v60 = vmax.f32 %v854_v51, 0.0  ;;  %v857_v61 = vpop.f32.mrb[16].mxu0  ;;  %v1671_v62 = vmax.f32 %v1301_v53, 0.0  ;;  %v1306_v63 = vpop.f32.mrb[16].mxu1 }
 0x113   : > { %v1903_v1 = vadd.f32 %v1902_v44, %v1669_v55  ;;  %v858_v2 = vadd.f32 %v857_v61, %v9197_v31  ;;  %v859_v3 = vpop.f32.mrb[17].mxu0  ;;  %6954 = vmatmul.mubr.msk.f32.gmra.mrb[122].mxu0 %vm541_vm2, %v510_v52  ;;  %7020 = vmatmul.mubr.msk.f32.gmra.mrb[122].mxu1 %vm541_vm2, %v510_v52  ;;  %v1672_v4 = vmax.f32 %v1303_v57, 0.0  ;;  %v1307_v6 = vadd.f32 %v1306_v63, %v9184_v27  ;;  %v1308_v7 = vpop.f32.mrb[17].mxu1 }
 0x114   : > { %v1940_v8 = vadd.f32 %v1939_v50, %v1670_v60  ;;  %v860_v9 = vadd.f32 %v859_v3, %v9202_v35  ;;  %1179 = vmatprep.mubr.f32.mxu0 %v8667_v5  ;;  %1628 = vmatprep.mubr.f32.mxu1 %v8667_v5  ;;  %v1977_v11 = vadd.f32 %v1976_v47, %v1671_v62 }
 0x115   : > { %v1673_v12 = vmax.f32 %v858_v2, 0.0  ;;  %v2014_v13 = vadd.f32 %v2013_v56, %v1672_v4  ;;  %v1675_v14 = vmax.f32 %v1307_v6, 0.0  ;;  %v1309_v15 = vadd.f32 %v1308_v7, %v9193_v29 }
 0x116   : > { %v1674_v16 = vmax.f32 %v860_v9, 0.0  ;;  %v863_v17 = vpop.f32.mrb[18].mxu0  ;;  %v1312_v18 = vpop.f32.mrb[18].mxu1  ;;  %v8229_v9 = vld [vmem:[%s8768_s17 + $0x28c] ss:$36 sps:$4 sm:$0xff]  }
 0x117   : > { %v1904_v19 = vadd.f32 %v1903_v1, %v1673_v12  ;;  %v864_v22 = vadd.f32 %v863_v17, %v9197_v31  ;;  %v865_v25 = vpop.f32.mrb[19].mxu0  ;;  %6955 = vmatmul.mubr.msk.f32.gmra.mrb[124].mxu0 %vm541_vm2, %v511_v10  ;;  %7021 = vmatmul.mubr.msk.f32.gmra.mrb[124].mxu1 %vm541_vm2, %v511_v10  ;;  %v1978_v28 = vadd.f32 %v1977_v11, %v1675_v14  ;;  %v1676_v30 = vmax.f32 %v1309_v15, 0.0  ;;  %v1314_v32 = vpop.f32.mrb[19].mxu1  ;;  %v8230_v12 = vld [vmem:[%s8768_s17 + $0x290] ss:$36 sps:$4 sm:$0xff]  }
 0x118   : > { %v1941_v33 = vadd.f32 %v1940_v8, %v1674_v16  ;;  %v866_v34 = vadd.f32 %v865_v25, %v9202_v35  ;;  %1185 = vmatprep.mubr.f32.mxu0 %v8667_v5  ;;  %1634 = vmatprep.mubr.f32.mxu1 %v8667_v5  ;;  %v1313_v37 = vadd.f32 %v1312_v18, %v9184_v27  ;;  %v8227_v8 = vld [vmem:[%s8768_s17 + $0x288] ss:$36 sps:$4 sm:$0xff]  }
 0x119   : > { %v1677_v38 = vmax.f32 %v864_v22, 0.0  ;;  %v2015_v39 = vadd.f32 %v2014_v13, %v1676_v30  ;;  %v1315_v40 = vadd.f32 %v1314_v32, %v9193_v29  ;;  %v8232_v13 = vld [vmem:[%s8768_s17 + $0x294] ss:$36 sps:$4 sm:$0xff]   ;;  %4052 = vmatprep.subr.bf16.mxu0 %v8229_v9 }
 0x11a   : > { %v1678_v41 = vmax.f32 %v866_v34, 0.0  ;;  %v869_v42 = vpop.f32.mrb[20].mxu0  ;;  %v1679_v43 = vmax.f32 %v1313_v37, 0.0  ;;  %v1318_v44 = vpop.f32.mrb[20].mxu1  ;;  %4134 = vmatprep.subr.bf16.mxu1 %v8232_v13  ;;  %4053 = vmatpush1.bf16.msra.mxu0 %v8227_v8 }
 0x11b   : > { %v1905_v45 = vadd.f32 %v1904_v19, %v1677_v38  ;;  %v870_v46 = vadd.f32 %v869_v42, %v9197_v31  ;;  %v871_v47 = vpop.f32.mrb[21].mxu0  ;;  %6956 = vmatmul.mubr.msk.f32.gmra.mrb[126].mxu0 %vm541_vm2, %v512_v36  ;;  %7022 = vmatmul.mubr.msk.f32.gmra.mrb[126].mxu1 %vm541_vm2, %v512_v36  ;;  %v1680_v5 = vmax.f32 %v1315_v40, 0.0  ;;  %v1319_v48 = vadd.f32 %v1318_v44, %v9184_v27  ;;  %v1320_v49 = vpop.f32.mrb[21].mxu1 }
 0x11c   : > { %v1942_v50 = vadd.f32 %v1941_v33, %v1678_v41  ;;  %v872_v51 = vadd.f32 %v871_v47, %v9202_v35  ;;  %v1979_v52 = vadd.f32 %v1978_v28, %v1679_v43  ;;  %v1321_v53 = vadd.f32 %v1320_v49, %v9193_v29  ;;  %4135 = vmatpush1.bf16.msra.mxu1 %v8230_v12 }
 0x11d   : > { %v1681_v54 = vmax.f32 %v870_v46, 0.0  ;;  %v2016_v55 = vadd.f32 %v2015_v39, %v1680_v5  ;;  %v1683_v56 = vmax.f32 %v1319_v48, 0.0 }
 0x11e   : > { %v1682_v57 = vmax.f32 %v872_v51, 0.0  ;;  %v875_v58 = vpop.f32.mrb[22].mxu0  ;;  %v1684_v59 = vmax.f32 %v1321_v53, 0.0  ;;  %v1324_v60 = vpop.f32.mrb[22].mxu1 }
 0x11f   : > { %v1906_v61 = vadd.f32 %v1905_v45, %v1681_v54  ;;  %v876_v62 = vadd.f32 %v875_v58, %v9197_v31  ;;  %v877_v63 = vpop.f32.mrb[23].mxu0  ;;  %v1980_v0 = vadd.f32 %v1979_v52, %v1683_v56  ;;  %v1325_v1 = vadd.f32 %v1324_v60, %v9184_v27  ;;  %v1326_v2 = vpop.f32.mrb[23].mxu1 }
 0x120   : > { %v1943_v3 = vadd.f32 %v1942_v50, %v1682_v57  ;;  %v878_v4 = vadd.f32 %v877_v63, %v9202_v35  ;;  %v2017_v6 = vadd.f32 %v2016_v55, %v1684_v59  ;;  %v1327_v7 = vadd.f32 %v1326_v2, %v9193_v29 }
 0x121   : > { %v1685_v10 = vmax.f32 %v876_v62, 0.0  ;;  %v1687_v11 = vmax.f32 %v1325_v1, 0.0 }
 0x122   : > { %v1686_v14 = vmax.f32 %v878_v4, 0.0  ;;  %v881_v15 = vpop.f32.mrb[24].mxu0  ;;  %v1688_v16 = vmax.f32 %v1327_v7, 0.0  ;;  %v1330_v17 = vpop.f32.mrb[24].mxu1 }
 0x123   : > { %v1907_v18 = vadd.f32 %v1906_v61, %v1685_v10  ;;  %v882_v19 = vadd.f32 %v881_v15, %v9197_v31  ;;  %v883_v22 = vpop.f32.mrb[25].mxu0  ;;  %v1981_v25 = vadd.f32 %v1980_v0, %v1687_v11  ;;  %v1331_v28 = vadd.f32 %v1330_v17, %v9184_v27  ;;  %v1332_v30 = vpop.f32.mrb[25].mxu1 }
 0x124   : > { %v1944_v32 = vadd.f32 %v1943_v3, %v1686_v14  ;;  %v884_v33 = vadd.f32 %v883_v22, %v9202_v35  ;;  %v2018_v34 = vadd.f32 %v2017_v6, %v1688_v16  ;;  %v1333_v36 = vadd.f32 %v1332_v30, %v9193_v29 }
 0x125   : > { %v1689_v37 = vmax.f32 %v882_v19, 0.0  ;;  %v1691_v38 = vmax.f32 %v1331_v28, 0.0  ;;  %v8235_v28 = vld [vmem:[%s8768_s17 + $0x2d4] ss:$36 sps:$4 sm:$0xff]  }
 0x126   : > { %v1690_v39 = vmax.f32 %v884_v33, 0.0  ;;  %v887_v40 = vpop.f32.mrb[26].mxu0  ;;  %v1692_v41 = vmax.f32 %v1333_v36, 0.0  ;;  %v1336_v42 = vpop.f32.mrb[26].mxu1  ;;  %v8236_v33 = vld [vmem:[%s8768_s17 + $0x2d8] ss:$36 sps:$4 sm:$0xff]   ;;  %4054 = vmatprep.subr.bf16.mxu0 %v8235_v28 }
 0x127   : > { %v1908_v43 = vadd.f32 %v1907_v18, %v1689_v37  ;;  %v888_v44 = vadd.f32 %v887_v40, %v9197_v31  ;;  %v889_v45 = vpop.f32.mrb[27].mxu0  ;;  %v1982_v46 = vadd.f32 %v1981_v25, %v1691_v38  ;;  %v1337_v47 = vadd.f32 %v1336_v42, %v9184_v27  ;;  %v1338_v5 = vpop.f32.mrb[27].mxu1  ;;  %v8233_v25 = vld [vmem:[%s8768_s17 + $0x2d0] ss:$36 sps:$4 sm:$0xff]  }
 0x128   : > { %v1945_v48 = vadd.f32 %v1944_v32, %v1690_v39  ;;  %v890_v49 = vadd.f32 %v889_v45, %v9202_v35  ;;  %v2019_v50 = vadd.f32 %v2018_v34, %v1692_v41  ;;  %v1339_v51 = vadd.f32 %v1338_v5, %v9193_v29  ;;  %v8238_v34 = vld [vmem:[%s8768_s17 + $0x2dc] ss:$36 sps:$4 sm:$0xff]   ;;  %4055 = vmatpush1.bf16.msra.mxu0 %v8233_v25 }
 0x129   : > { %v1693_v52 = vmax.f32 %v888_v44, 0.0  ;;  %v1695_v53 = vmax.f32 %v1337_v47, 0.0  ;;  %4136 = vmatprep.subr.bf16.mxu1 %v8238_v34 }
 0x12a   : > { %v1694_v54 = vmax.f32 %v890_v49, 0.0  ;;  %v893_v55 = vpop.f32.mrb[28].mxu0  ;;  %v1696_v56 = vmax.f32 %v1339_v51, 0.0  ;;  %v1342_v57 = vpop.f32.mrb[28].mxu1  ;;  %4137 = vmatpush1.bf16.msra.mxu1 %v8236_v33 }
 0x12b   : > { %v1909_v58 = vadd.f32 %v1908_v43, %v1693_v52  ;;  %v894_v59 = vadd.f32 %v893_v55, %v9197_v31  ;;  %v895_v60 = vpop.f32.mrb[29].mxu0  ;;  %v1983_v61 = vadd.f32 %v1982_v46, %v1695_v53  ;;  %v1343_v62 = vadd.f32 %v1342_v57, %v9184_v27  ;;  %v1344_v63 = vpop.f32.mrb[29].mxu1 }
 0x12c   : > { %v1946_v0 = vadd.f32 %v1945_v48, %v1694_v54  ;;  %v896_v1 = vadd.f32 %v895_v60, %v9202_v35  ;;  %v2020_v2 = vadd.f32 %v2019_v50, %v1696_v56  ;;  %v1345_v3 = vadd.f32 %v1344_v63, %v9193_v29 }
 0x12d   : > { %v1697_v4 = vmax.f32 %v894_v59, 0.0  ;;  %v1699_v6 = vmax.f32 %v1343_v62, 0.0 }
 0x12e   : > { %v1698_v7 = vmax.f32 %v896_v1, 0.0  ;;  %v899_v8 = vpop.f32.mrb[30].mxu0  ;;  %v1700_v9 = vmax.f32 %v1345_v3, 0.0  ;;  %v1348_v10 = vpop.f32.mrb[30].mxu1 }
 0x12f   : > { %v1910_v11 = vadd.f32 %v1909_v58, %v1697_v4  ;;  %v900_v12 = vadd.f32 %v899_v8, %v9197_v31  ;;  %v901_v13 = vpop.f32.mrb[31].mxu0  ;;  %v1984_v14 = vadd.f32 %v1983_v61, %v1699_v6  ;;  %v1349_v15 = vadd.f32 %v1348_v10, %v9184_v27  ;;  %v1350_v16 = vpop.f32.mrb[31].mxu1 }
 0x130   : > { %v1947_v17 = vadd.f32 %v1946_v0, %v1698_v7  ;;  %v902_v18 = vadd.f32 %v901_v13, %v9202_v35  ;;  %v2021_v19 = vadd.f32 %v2020_v2, %v1700_v9  ;;  %v1351_v22 = vadd.f32 %v1350_v16, %v9193_v29 }
 0x131   : > { %v1701_v30 = vmax.f32 %v900_v12, 0.0  ;;  %v1703_v32 = vmax.f32 %v1349_v15, 0.0 }
 0x132   : > { %v1702_v36 = vmax.f32 %v902_v18, 0.0  ;;  %v905_v37 = vpop.f32.mrb[32].mxu0  ;;  %v1704_v38 = vmax.f32 %v1351_v22, 0.0  ;;  %v1354_v39 = vpop.f32.mrb[32].mxu1 }
 0x133   : > { %v1911_v40 = vadd.f32 %v1910_v11, %v1701_v30  ;;  %v906_v41 = vadd.f32 %v905_v37, %v9197_v31  ;;  %v907_v42 = vpop.f32.mrb[33].mxu0  ;;  %v1985_v43 = vadd.f32 %v1984_v14, %v1703_v32  ;;  %v1355_v44 = vadd.f32 %v1354_v39, %v9184_v27  ;;  %v1356_v45 = vpop.f32.mrb[33].mxu1 }
 0x134   : > { %v1948_v46 = vadd.f32 %v1947_v17, %v1702_v36  ;;  %v908_v47 = vadd.f32 %v907_v42, %v9202_v35  ;;  %v2022_v5 = vadd.f32 %v2021_v19, %v1704_v38  ;;  %v1357_v48 = vadd.f32 %v1356_v45, %v9193_v29 }
 0x135   : > { %v1705_v49 = vmax.f32 %v906_v41, 0.0  ;;  %v1707_v50 = vmax.f32 %v1355_v44, 0.0  ;;  %v8241_v44 = vld [vmem:[%s8768_s17 + $0x31c] ss:$36 sps:$4 sm:$0xff]  }
 0x136   : > { %v1706_v51 = vmax.f32 %v908_v47, 0.0  ;;  %v911_v52 = vpop.f32.mrb[34].mxu0  ;;  %v1708_v53 = vmax.f32 %v1357_v48, 0.0  ;;  %v1360_v54 = vpop.f32.mrb[34].mxu1  ;;  %v8242_v47 = vld [vmem:[%s8768_s17 + $0x320] ss:$36 sps:$4 sm:$0xff]   ;;  %4056 = vmatprep.subr.bf16.mxu0 %v8241_v44 }
 0x137   : > { %v1912_v55 = vadd.f32 %v1911_v40, %v1705_v49  ;;  %v912_v56 = vadd.f32 %v911_v52, %v9197_v31  ;;  %v913_v57 = vpop.f32.mrb[35].mxu0  ;;  %v1986_v58 = vadd.f32 %v1985_v43, %v1707_v50  ;;  %v1361_v59 = vadd.f32 %v1360_v54, %v9184_v27  ;;  %v1362_v60 = vpop.f32.mrb[35].mxu1  ;;  %v8239_v43 = vld [vmem:[%s8768_s17 + $0x318] ss:$36 sps:$4 sm:$0xff]  }
 0x138   : > { %v1949_v61 = vadd.f32 %v1948_v46, %v1706_v51  ;;  %v914_v62 = vadd.f32 %v913_v57, %v9202_v35  ;;  %v2023_v63 = vadd.f32 %v2022_v5, %v1708_v53  ;;  %v1363_v0 = vadd.f32 %v1362_v60, %v9193_v29  ;;  %v8244_v5 = vld [vmem:[%s8768_s17 + $0x324] ss:$36 sps:$4 sm:$0xff]   ;;  %4057 = vmatpush1.bf16.msra.mxu0 %v8239_v43 }
 0x139   : > { %v1709_v1 = vmax.f32 %v912_v56, 0.0  ;;  %v1711_v2 = vmax.f32 %v1361_v59, 0.0  ;;  %4138 = vmatprep.subr.bf16.mxu1 %v8244_v5 }
 0x13a   : > { %v1710_v3 = vmax.f32 %v914_v62, 0.0  ;;  %v917_v4 = vpop.f32.mrb[36].mxu0  ;;  %v1712_v6 = vmax.f32 %v1363_v0, 0.0  ;;  %v1366_v7 = vpop.f32.mrb[36].mxu1  ;;  %4139 = vmatpush1.bf16.msra.mxu1 %v8242_v47 }
 0x13b   : > { %v1913_v8 = vadd.f32 %v1912_v55, %v1709_v1  ;;  %v918_v9 = vadd.f32 %v917_v4, %v9197_v31  ;;  %v919_v10 = vpop.f32.mrb[37].mxu0  ;;  %v1987_v11 = vadd.f32 %v1986_v58, %v1711_v2  ;;  %v1367_v12 = vadd.f32 %v1366_v7, %v9184_v27  ;;  %v1368_v13 = vpop.f32.mrb[37].mxu1 }
 0x13c   : > { %v1950_v14 = vadd.f32 %v1949_v61, %v1710_v3  ;;  %v920_v15 = vadd.f32 %v919_v10, %v9202_v35  ;;  %v2024_v16 = vadd.f32 %v2023_v63, %v1712_v6  ;;  %v1369_v17 = vadd.f32 %v1368_v13, %v9193_v29 }
 0x13d   : > { %v1713_v18 = vmax.f32 %v918_v9, 0.0  ;;  %v1715_v19 = vmax.f32 %v1367_v12, 0.0 }
 0x13e   : > { %v1714_v22 = vmax.f32 %v920_v15, 0.0  ;;  %v923_v25 = vpop.f32.mrb[38].mxu0  ;;  %v1716_v28 = vmax.f32 %v1369_v17, 0.0  ;;  %v1372_v30 = vpop.f32.mrb[38].mxu1 }
 0x13f   : > { %v1914_v32 = vadd.f32 %v1913_v8, %v1713_v18  ;;  %v924_v33 = vadd.f32 %v923_v25, %v9197_v31  ;;  %v925_v34 = vpop.f32.mrb[39].mxu0  ;;  %v1988_v36 = vadd.f32 %v1987_v11, %v1715_v19  ;;  %v1373_v37 = vadd.f32 %v1372_v30, %v9184_v27  ;;  %v1374_v38 = vpop.f32.mrb[39].mxu1 }
 0x140   : > { %v1951_v39 = vadd.f32 %v1950_v14, %v1714_v22  ;;  %v926_v40 = vadd.f32 %v925_v34, %v9202_v35  ;;  %v2025_v41 = vadd.f32 %v2024_v16, %v1716_v28  ;;  %v1375_v42 = vadd.f32 %v1374_v38, %v9193_v29 }
 0x141   : > { %v1717_v45 = vmax.f32 %v924_v33, 0.0  ;;  %v1719_v46 = vmax.f32 %v1373_v37, 0.0 }
 0x142   : > { %v1718_v48 = vmax.f32 %v926_v40, 0.0  ;;  %v929_v49 = vpop.f32.mrb[40].mxu0  ;;  %v1720_v50 = vmax.f32 %v1375_v42, 0.0  ;;  %v1378_v51 = vpop.f32.mrb[40].mxu1 }
 0x143   : > { %v1915_v52 = vadd.f32 %v1914_v32, %v1717_v45  ;;  %v930_v53 = vadd.f32 %v929_v49, %v9197_v31  ;;  %v931_v54 = vpop.f32.mrb[41].mxu0  ;;  %v1989_v55 = vadd.f32 %v1988_v36, %v1719_v46  ;;  %v1379_v56 = vadd.f32 %v1378_v51, %v9184_v27  ;;  %v1380_v57 = vpop.f32.mrb[41].mxu1 }
 0x144   : > { %v1952_v58 = vadd.f32 %v1951_v39, %v1718_v48  ;;  %v932_v59 = vadd.f32 %v931_v54, %v9202_v35  ;;  %v2026_v60 = vadd.f32 %v2025_v41, %v1720_v50  ;;  %v1381_v61 = vadd.f32 %v1380_v57, %v9193_v29 }
 0x145   : > { %v1721_v62 = vmax.f32 %v930_v53, 0.0  ;;  %v1723_v63 = vmax.f32 %v1379_v56, 0.0  ;;  %v8247_v56 = vld [vmem:[%s8768_s17 + $0x364] ss:$36 sps:$4 sm:$0xff]  }
 0x146   : > { %v1722_v0 = vmax.f32 %v932_v59, 0.0  ;;  %v935_v1 = vpop.f32.mrb[42].mxu0  ;;  %v1724_v2 = vmax.f32 %v1381_v61, 0.0  ;;  %v1384_v3 = vpop.f32.mrb[42].mxu1  ;;  %v8248_v59 = vld [vmem:[%s8768_s17 + $0x368] ss:$36 sps:$4 sm:$0xff]   ;;  %4058 = vmatprep.subr.bf16.mxu0 %v8247_v56 }
 0x147   : > { %v1916_v4 = vadd.f32 %v1915_v52, %v1721_v62  ;;  %v936_v6 = vadd.f32 %v935_v1, %v9197_v31  ;;  %v937_v7 = vpop.f32.mrb[43].mxu0  ;;  %v1990_v8 = vadd.f32 %v1989_v55, %v1723_v63  ;;  %v1385_v9 = vadd.f32 %v1384_v3, %v9184_v27  ;;  %v1386_v10 = vpop.f32.mrb[43].mxu1  ;;  %v8245_v55 = vld [vmem:[%s8768_s17 + $0x360] ss:$36 sps:$4 sm:$0xff]  }
 0x148   : > { %v1953_v11 = vadd.f32 %v1952_v58, %v1722_v0  ;;  %v938_v12 = vadd.f32 %v937_v7, %v9202_v35  ;;  %v2027_v13 = vadd.f32 %v2026_v60, %v1724_v2  ;;  %v1387_v14 = vadd.f32 %v1386_v10, %v9193_v29  ;;  %v8250_v60 = vld [vmem:[%s8768_s17 + $0x36c] ss:$36 sps:$4 sm:$0xff]   ;;  %4059 = vmatpush1.bf16.msra.mxu0 %v8245_v55 }
 0x149   : > { %v1725_v15 = vmax.f32 %v936_v6, 0.0  ;;  %v1727_v16 = vmax.f32 %v1385_v9, 0.0  ;;  %4140 = vmatprep.subr.bf16.mxu1 %v8250_v60 }
 0x14a   : > { %v1726_v17 = vmax.f32 %v938_v12, 0.0  ;;  %v941_v18 = vpop.f32.mrb[44].mxu0  ;;  %v1728_v19 = vmax.f32 %v1387_v14, 0.0  ;;  %v1390_v22 = vpop.f32.mrb[44].mxu1  ;;  %4141 = vmatpush1.bf16.msra.mxu1 %v8248_v59 }
 0x14b   : > { %v1917_v25 = vadd.f32 %v1916_v4, %v1725_v15  ;;  %v942_v28 = vadd.f32 %v941_v18, %v9197_v31  ;;  %v943_v30 = vpop.f32.mrb[45].mxu0  ;;  %v1991_v32 = vadd.f32 %v1990_v8, %v1727_v16  ;;  %v1391_v33 = vadd.f32 %v1390_v22, %v9184_v27  ;;  %v1392_v34 = vpop.f32.mrb[45].mxu1 }
 0x14c   : > { %v1954_v36 = vadd.f32 %v1953_v11, %v1726_v17  ;;  %v944_v37 = vadd.f32 %v943_v30, %v9202_v35  ;;  %v2028_v38 = vadd.f32 %v2027_v13, %v1728_v19  ;;  %v1393_v39 = vadd.f32 %v1392_v34, %v9193_v29 }
 0x14d   : > { %v1729_v40 = vmax.f32 %v942_v28, 0.0  ;;  %v1731_v41 = vmax.f32 %v1391_v33, 0.0 }
 0x14e   : > { %v1730_v42 = vmax.f32 %v944_v37, 0.0  ;;  %v947_v43 = vpop.f32.mrb[46].mxu0  ;;  %v1732_v44 = vmax.f32 %v1393_v39, 0.0  ;;  %v1396_v45 = vpop.f32.mrb[46].mxu1 }
 0x14f   : > { %v1918_v46 = vadd.f32 %v1917_v25, %v1729_v40  ;;  %v948_v47 = vadd.f32 %v947_v43, %v9197_v31  ;;  %v949_v5 = vpop.f32.mrb[47].mxu0  ;;  %v1992_v48 = vadd.f32 %v1991_v32, %v1731_v41  ;;  %v1397_v49 = vadd.f32 %v1396_v45, %v9184_v27  ;;  %v1398_v50 = vpop.f32.mrb[47].mxu1 }
 0x150   : > { %v1955_v51 = vadd.f32 %v1954_v36, %v1730_v42  ;;  %v950_v52 = vadd.f32 %v949_v5, %v9202_v35  ;;  %v2029_v53 = vadd.f32 %v2028_v38, %v1732_v44  ;;  %v1399_v54 = vadd.f32 %v1398_v50, %v9193_v29 }
 0x151   : > { %v1733_v57 = vmax.f32 %v948_v47, 0.0  ;;  %v1735_v58 = vmax.f32 %v1397_v49, 0.0 }
 0x152   : > { %v1734_v61 = vmax.f32 %v950_v52, 0.0  ;;  %v953_v62 = vpop.f32.mrb[48].mxu0  ;;  %v1736_v63 = vmax.f32 %v1399_v54, 0.0  ;;  %v1402_v0 = vpop.f32.mrb[48].mxu1 }
 0x153   : > { %v1919_v1 = vadd.f32 %v1918_v46, %v1733_v57  ;;  %v954_v2 = vadd.f32 %v953_v62, %v9197_v31  ;;  %v955_v3 = vpop.f32.mrb[49].mxu0  ;;  %v1993_v4 = vadd.f32 %v1992_v48, %v1735_v58  ;;  %v1403_v6 = vadd.f32 %v1402_v0, %v9184_v27  ;;  %v1404_v7 = vpop.f32.mrb[49].mxu1 }
 0x154   : > { %v1956_v8 = vadd.f32 %v1955_v51, %v1734_v61  ;;  %v956_v9 = vadd.f32 %v955_v3, %v9202_v35  ;;  %v2030_v10 = vadd.f32 %v2029_v53, %v1736_v63  ;;  %v1405_v11 = vadd.f32 %v1404_v7, %v9193_v29 }
 0x155   : > { %v1737_v12 = vmax.f32 %v954_v2, 0.0  ;;  %v1739_v13 = vmax.f32 %v1403_v6, 0.0  ;;  %v8253_v6 = vld [vmem:[%s8768_s17 + $0x3ac] ss:$36 sps:$4 sm:$0xff]  }
 0x156   : > { %v1738_v14 = vmax.f32 %v956_v9, 0.0  ;;  %v959_v15 = vpop.f32.mrb[50].mxu0  ;;  %v1740_v16 = vmax.f32 %v1405_v11, 0.0  ;;  %v1408_v17 = vpop.f32.mrb[50].mxu1  ;;  %v8254_v9 = vld [vmem:[%s8768_s17 + $0x3b0] ss:$36 sps:$4 sm:$0xff]   ;;  %4060 = vmatprep.subr.bf16.mxu0 %v8253_v6 }
 0x157   : > { %v1920_v18 = vadd.f32 %v1919_v1, %v1737_v12  ;;  %v960_v19 = vadd.f32 %v959_v15, %v9197_v31  ;;  %v961_v22 = vpop.f32.mrb[51].mxu0  ;;  %v1994_v25 = vadd.f32 %v1993_v4, %v1739_v13  ;;  %v1409_v28 = vadd.f32 %v1408_v17, %v9184_v27  ;;  %v1410_v30 = vpop.f32.mrb[51].mxu1  ;;  %v8251_v4 = vld [vmem:[%s8768_s17 + $0x3a8] ss:$36 sps:$4 sm:$0xff]  }
 0x158   : > { %v1957_v32 = vadd.f32 %v1956_v8, %v1738_v14  ;;  %v962_v33 = vadd.f32 %v961_v22, %v9202_v35  ;;  %v2031_v34 = vadd.f32 %v2030_v10, %v1740_v16  ;;  %v1411_v36 = vadd.f32 %v1410_v30, %v9193_v29  ;;  %v8256_v10 = vld [vmem:[%s8768_s17 + $0x3b4] ss:$36 sps:$4 sm:$0xff]   ;;  %4061 = vmatpush1.bf16.msra.mxu0 %v8251_v4 }
 0x159   : > { %v1741_v37 = vmax.f32 %v960_v19, 0.0  ;;  %v1743_v38 = vmax.f32 %v1409_v28, 0.0  ;;  %4142 = vmatprep.subr.bf16.mxu1 %v8256_v10 }
 0x15a   : > { %v1742_v39 = vmax.f32 %v962_v33, 0.0  ;;  %v965_v40 = vpop.f32.mrb[52].mxu0  ;;  %v1744_v41 = vmax.f32 %v1411_v36, 0.0  ;;  %v1414_v42 = vpop.f32.mrb[52].mxu1  ;;  %4143 = vmatpush1.bf16.msra.mxu1 %v8254_v9 }
 0x15b   : > { %v1921_v43 = vadd.f32 %v1920_v18, %v1741_v37  ;;  %v966_v44 = vadd.f32 %v965_v40, %v9197_v31  ;;  %v967_v45 = vpop.f32.mrb[53].mxu0  ;;  %v1995_v46 = vadd.f32 %v1994_v25, %v1743_v38  ;;  %v1415_v47 = vadd.f32 %v1414_v42, %v9184_v27  ;;  %v1416_v5 = vpop.f32.mrb[53].mxu1 }
 0x15c   : > { %v1958_v48 = vadd.f32 %v1957_v32, %v1742_v39  ;;  %v968_v49 = vadd.f32 %v967_v45, %v9202_v35  ;;  %v2032_v50 = vadd.f32 %v2031_v34, %v1744_v41  ;;  %v1417_v51 = vadd.f32 %v1416_v5, %v9193_v29 }
 0x15d   : > { %v1745_v52 = vmax.f32 %v966_v44, 0.0  ;;  %v1747_v53 = vmax.f32 %v1415_v47, 0.0 }
 0x15e   : > { %v1746_v54 = vmax.f32 %v968_v49, 0.0  ;;  %v971_v55 = vpop.f32.mrb[54].mxu0  ;;  %v1748_v56 = vmax.f32 %v1417_v51, 0.0  ;;  %v1420_v57 = vpop.f32.mrb[54].mxu1 }
 0x15f   : > { %v1922_v58 = vadd.f32 %v1921_v43, %v1745_v52  ;;  %v972_v59 = vadd.f32 %v971_v55, %v9197_v31  ;;  %v973_v60 = vpop.f32.mrb[55].mxu0  ;;  %v1996_v61 = vadd.f32 %v1995_v46, %v1747_v53  ;;  %v1421_v62 = vadd.f32 %v1420_v57, %v9184_v27  ;;  %v1422_v63 = vpop.f32.mrb[55].mxu1 }
 0x160   : > { %v1959_v0 = vadd.f32 %v1958_v48, %v1746_v54  ;;  %v974_v1 = vadd.f32 %v973_v60, %v9202_v35  ;;  %v2033_v2 = vadd.f32 %v2032_v50, %v1748_v56  ;;  %v1423_v3 = vadd.f32 %v1422_v63, %v9193_v29 }
 0x161   : > { %v1749_v7 = vmax.f32 %v972_v59, 0.0  ;;  %v1751_v8 = vmax.f32 %v1421_v62, 0.0 }
 0x162   : > { %v1750_v11 = vmax.f32 %v974_v1, 0.0  ;;  %v977_v12 = vpop.f32.mrb[56].mxu0  ;;  %v1752_v13 = vmax.f32 %v1423_v3, 0.0  ;;  %v1426_v14 = vpop.f32.mrb[56].mxu1 }
 0x163   : > { %v1923_v15 = vadd.f32 %v1922_v58, %v1749_v7  ;;  %v978_v16 = vadd.f32 %v977_v12, %v9197_v31  ;;  %v979_v17 = vpop.f32.mrb[57].mxu0  ;;  %v1997_v18 = vadd.f32 %v1996_v61, %v1751_v8  ;;  %v1427_v19 = vadd.f32 %v1426_v14, %v9184_v27  ;;  %v1428_v22 = vpop.f32.mrb[57].mxu1 }
 0x164   : > { %v1960_v25 = vadd.f32 %v1959_v0, %v1750_v11  ;;  %v980_v28 = vadd.f32 %v979_v17, %v9202_v35  ;;  %v2034_v30 = vadd.f32 %v2033_v2, %v1752_v13  ;;  %v1429_v32 = vadd.f32 %v1428_v22, %v9193_v29 }
 0x165   : > { %v1753_v33 = vmax.f32 %v978_v16, 0.0  ;;  %v1755_v34 = vmax.f32 %v1427_v19, 0.0  ;;  %v8259_v19 = vld [vmem:[%s8768_s17 + $0x3f4] ss:$36 sps:$4 sm:$0xff]  }
 0x166   : > { %v1754_v36 = vmax.f32 %v980_v28, 0.0  ;;  %v983_v37 = vpop.f32.mrb[58].mxu0  ;;  %v1756_v38 = vmax.f32 %v1429_v32, 0.0  ;;  %v1432_v39 = vpop.f32.mrb[58].mxu1  ;;  %v8260_v28 = vld [vmem:[%s8768_s17 + $0x3f8] ss:$36 sps:$4 sm:$0xff]   ;;  %4062 = vmatprep.subr.bf16.mxu0 %v8259_v19 }
 0x167   : > { %v1924_v40 = vadd.f32 %v1923_v15, %v1753_v33  ;;  %v984_v41 = vadd.f32 %v983_v37, %v9197_v31  ;;  %v985_v42 = vpop.f32.mrb[59].mxu0  ;;  %v1998_v43 = vadd.f32 %v1997_v18, %v1755_v34  ;;  %v1433_v44 = vadd.f32 %v1432_v39, %v9184_v27  ;;  %v1434_v45 = vpop.f32.mrb[59].mxu1  ;;  %v8257_v18 = vld [vmem:[%s8768_s17 + $0x3f0] ss:$36 sps:$4 sm:$0xff]  }
 0x168   : > { %v1961_v46 = vadd.f32 %v1960_v25, %v1754_v36  ;;  %v986_v47 = vadd.f32 %v985_v42, %v9202_v35  ;;  %v2035_v5 = vadd.f32 %v2034_v30, %v1756_v38  ;;  %v1435_v48 = vadd.f32 %v1434_v45, %v9193_v29  ;;  %v8262_v30 = vld [vmem:[%s8768_s17 + $0x3fc] ss:$36 sps:$4 sm:$0xff]   ;;  %4063 = vmatpush1.bf16.msra.mxu0 %v8257_v18 }
 0x169   : > { %v1757_v49 = vmax.f32 %v984_v41, 0.0  ;;  %v1759_v50 = vmax.f32 %v1433_v44, 0.0  ;;  %4144 = vmatprep.subr.bf16.mxu1 %v8262_v30 }
 0x16a   : > { %v1758_v51 = vmax.f32 %v986_v47, 0.0  ;;  %v989_v52 = vpop.f32.mrb[60].mxu0  ;;  %v1760_v53 = vmax.f32 %v1435_v48, 0.0  ;;  %v1438_v54 = vpop.f32.mrb[60].mxu1  ;;  %4145 = vmatpush1.bf16.msra.mxu1 %v8260_v28 }
 0x16b   : > { %v1925_v55 = vadd.f32 %v1924_v40, %v1757_v49  ;;  %v1999_v56 = vadd.f32 %v1998_v43, %v1759_v50  ;;  %v990_v57 = vadd.f32 %v989_v52, %v9197_v31  ;;  %v991_v58 = vpop.f32.mrb[61].mxu0  ;;  %v1439_v59 = vadd.f32 %v1438_v54, %v9184_v27  ;;  %v1440_v60 = vpop.f32.mrb[61].mxu1 }
 0x16c   : > { %v1962_v61 = vadd.f32 %v1961_v46, %v1758_v51  ;;  %v2036_v62 = vadd.f32 %v2035_v5, %v1760_v53  ;;  %v992_v63 = vadd.f32 %v991_v58, %v9202_v35  ;;  %v1441_v0 = vadd.f32 %v1440_v60, %v9193_v29 }
 0x16d   : > { %v1761_v1 = vmax.f32 %v990_v57, 0.0  ;;  %v1763_v2 = vmax.f32 %v1439_v59, 0.0 }
 0x16e   : > { %v1762_v3 = vmax.f32 %v992_v63, 0.0  ;;  %v1764_v4 = vmax.f32 %v1441_v0, 0.0  ;;  %v995_v6 = vpop.f32.mrb[62].mxu0  ;;  %v1444_v7 = vpop.f32.mrb[62].mxu1 }
 0x16f   : > { %v1926_v8 = vadd.f32 %v1925_v55, %v1761_v1  ;;  %v2000_v9 = vadd.f32 %v1999_v56, %v1763_v2  ;;  %v996_v10 = vadd.f32 %v995_v6, %v9197_v31  ;;  %v1445_v11 = vadd.f32 %v1444_v7, %v9184_v27  ;;  %v997_v12 = vpop.f32.mrb[63].mxu0  ;;  %v1446_v13 = vpop.f32.mrb[63].mxu1 }
 0x170   : > { %v1963_v14 = vadd.f32 %v1962_v61, %v1762_v3  ;;  %v2037_v15 = vadd.f32 %v2036_v62, %v1764_v4  ;;  %v998_v16 = vadd.f32 %v997_v12, %v9202_v35  ;;  %v1447_v17 = vadd.f32 %v1446_v13, %v9193_v29 }
 0x171   : > { %v1765_v22 = vmax.f32 %v996_v10, 0.0  ;;  %v1767_v25 = vmax.f32 %v1445_v11, 0.0 }
 0x172   : > { %v1766_v32 = vmax.f32 %v998_v16, 0.0  ;;  %v1768_v33 = vmax.f32 %v1447_v17, 0.0  ;;  %v1001_v34 = vpop.f32.mrb[64].mxu0  ;;  %v1450_v36 = vpop.f32.mrb[64].mxu1 }
 0x173   : > { %v9437_v37 = vadd.f32 %v1926_v8, %v1765_v22  ;;  %v9439_v38 = vadd.f32 %v2000_v9, %v1767_v25  ;;  %v1003_v39 = vpop.f32.mrb[65].mxu0  ;;  %v1451_v40 = vadd.f32 %v1450_v36, %v9184_v27  ;;  %v1452_v41 = vpop.f32.mrb[65].mxu1  ;;  %v1002_v44 = vadd.f32 %v1001_v34, %v9197_v31 }
 0x174   : > { %v9442_v42 = vadd.f32 %v1963_v14, %v1766_v32  ;;  %v9444_v43 = vadd.f32 %v2037_v15, %v1768_v33  ;;  %v1004_v45 = vadd.f32 %v1003_v39, %v9202_v35  ;;  %v1453_v47 = vadd.f32 %v1452_v41, %v9193_v29 }
 0x175   : > { %v1769_v54 = vmax.f32 %v1002_v44, 0.0  ;;  %v1771_v56 = vmax.f32 %v1451_v40, 0.0 }
 0x176   : > { %v1007_v46 = vpop.f32.mrb[66].mxu0  ;;  %v1456_v5 = vpop.f32.mrb[66].mxu1  ;;  %v1770_v58 = vmax.f32 %v1004_v45, 0.0  ;;  %v1772_v61 = vmax.f32 %v1453_v47, 0.0  ;;  %v8268_v47 = vld [vmem:[%s8768_s17 + $0x444] ss:$36 sps:$4 sm:$0xff]  }
 0x177   : > { %v1008_v48 = vadd.f32 %v1007_v46, %v9197_v31  ;;  %v1009_v49 = vpop.f32.mrb[67].mxu0  ;;  %v1457_v50 = vadd.f32 %v1456_v5, %v9184_v27  ;;  %v1458_v51 = vpop.f32.mrb[67].mxu1  ;;  %v8265_v46 = vld [vmem:[%s8768_s17 + $0x43c] ss:$36 sps:$4 sm:$0xff]   ;;  %4146 = vmatprep.subr.bf16.mxu1 %v8268_v47 }
 0x178   : > { %v1010_v52 = vadd.f32 %v1009_v49, %v9202_v35  ;;  %v1459_v53 = vadd.f32 %v1458_v51, %v9193_v29  ;;  %v8263_v51 = vld [vmem:[%s8768_s17 + $0x438] ss:$36 sps:$4 sm:$0xff]   ;;  %4064 = vmatprep.subr.bf16.mxu0 %v8265_v46 }
 0x179   : > { %v1773_v55 = vmax.f32 %v1008_v48, 0.0  ;;  %v1775_v57 = vmax.f32 %v1457_v50, 0.0  ;;  %4065 = vmatpush1.bf16.msra.mxu0 %v8263_v51 }
 0x17a   : > { %v1774_v59 = vmax.f32 %v1010_v52, 0.0  ;;  %v1013_v60 = vpop.f32.mrb[68].mxu0  ;;  %v1776_v62 = vmax.f32 %v1459_v53, 0.0  ;;  %v1462_v63 = vpop.f32.mrb[68].mxu1 }
 0x17b   : > { %v2045_v0 = vadd.f32 %v1773_v55, %v1769_v54  ;;  %v1014_v1 = vadd.f32 %v1013_v60, %v9197_v31  ;;  %v1015_v2 = vpop.f32.mrb[69].mxu0  ;;  %v1464_v3 = vpop.f32.mrb[69].mxu1  ;;  %v2119_v8 = vadd.f32 %v1775_v57, %v1771_v56  ;;  %v1463_v22 = vadd.f32 %v1462_v63, %v9184_v27 }
 0x17c   : > { %v2082_v4 = vadd.f32 %v1774_v59, %v1770_v58  ;;  %v1016_v6 = vadd.f32 %v1015_v2, %v9202_v35  ;;  %v2156_v11 = vadd.f32 %v1776_v62, %v1772_v61  ;;  %v1465_v30 = vadd.f32 %v1464_v3, %v9193_v29  ;;  %v8266_v58 = vld [vmem:[%s8768_s17 + $0x440] ss:$36 sps:$4 sm:$0xff]  }
 0x17d   : > { %v1777_v7 = vmax.f32 %v1014_v1, 0.0  ;;  %v1779_v45 = vmax.f32 %v1463_v22, 0.0  ;;  %4147 = vmatpush1.bf16.msra.mxu1 %v8266_v58  ;;  %v8271_v3 = vld [vmem:[%s8768_s17 + $0x484] ss:$36 sps:$4 sm:$0xff]  }
 0x17e   : > { %v1778_v9 = vmax.f32 %v1016_v6, 0.0  ;;  %v1019_v10 = vpop.f32.mrb[70].mxu0  ;;  %v1468_v12 = vpop.f32.mrb[70].mxu1  ;;  %v1780_v49 = vmax.f32 %v1465_v30, 0.0  ;;  %4075 = vmatprep.subr.bf16.mxu0 %v8271_v3 }
 0x17f   : > { %v2046_v13 = vadd.f32 %v2045_v0, %v1777_v7  ;;  %v1020_v14 = vadd.f32 %v1019_v10, %v9197_v31  ;;  %v1021_v15 = vpop.f32.mrb[71].mxu0  ;;  %v1470_v16 = vpop.f32.mrb[71].mxu1  ;;  %v2120_v55 = vadd.f32 %v2119_v8, %v1779_v45  ;;  %v1469_v56 = vadd.f32 %v1468_v12, %v9184_v27 }
 0x180   : > { %v2083_v17 = vadd.f32 %v2082_v4, %v1778_v9  ;;  %v1022_v18 = vadd.f32 %v1021_v15, %v9202_v35  ;;  %v2157_v61 = vadd.f32 %v2156_v11, %v1780_v49  ;;  %v1471_v62 = vadd.f32 %v1470_v16, %v9193_v29  ;;  %v8274_v4 = vld [vmem:[%s8768_s17 + $0x48c] ss:$36 sps:$4 sm:$0xff]  }
 0x181   : > { %v1781_v19 = vmax.f32 %v1020_v14, 0.0  ;;  %v1783_v0 = vmax.f32 %v1469_v56, 0.0  ;;  %4157 = vmatprep.subr.bf16.mxu1 %v8274_v4 }
 0x182   : > { %v1782_v25 = vmax.f32 %v1022_v18, 0.0  ;;  %v1025_v28 = vpop.f32.mrb[72].mxu0  ;;  %v1474_v32 = vpop.f32.mrb[72].mxu1  ;;  %v1784_v8 = vmax.f32 %v1471_v62, 0.0 }
 0x183   : > { %v2047_v33 = vadd.f32 %v2046_v13, %v1781_v19  ;;  %v1026_v34 = vadd.f32 %v1025_v28, %v9197_v31  ;;  %v1027_v36 = vpop.f32.mrb[73].mxu0  ;;  %v1476_v39 = vpop.f32.mrb[73].mxu1  ;;  %v1475_v1 = vadd.f32 %v1474_v32, %v9184_v27  ;;  %v2121_v15 = vadd.f32 %v2120_v55, %v1783_v0 }
 0x184   : > { %v2084_v40 = vadd.f32 %v2083_v17, %v1782_v25  ;;  %v1028_v41 = vadd.f32 %v1027_v36, %v9202_v35  ;;  %v1477_v2 = vadd.f32 %v1476_v39, %v9193_v29  ;;  %v2158_v22 = vadd.f32 %v2157_v61, %v1784_v8 }
 0x185   : > { %v1785_v44 = vmax.f32 %v1026_v34, 0.0  ;;  %v1787_v16 = vmax.f32 %v1475_v1, 0.0 }
 0x186   : > { %v1786_v5 = vmax.f32 %v1028_v41, 0.0  ;;  %v1031_v48 = vpop.f32.mrb[74].mxu0  ;;  %v1480_v50 = vpop.f32.mrb[74].mxu1  ;;  %v1788_v25 = vmax.f32 %v1477_v2, 0.0 }
 0x187   : > { %v2048_v52 = vadd.f32 %v2047_v33, %v1785_v44  ;;  %v1032_v53 = vadd.f32 %v1031_v48, %v9197_v31  ;;  %v1033_v54 = vpop.f32.mrb[75].mxu0  ;;  %v1482_v57 = vpop.f32.mrb[75].mxu1  ;;  %v1481_v9 = vadd.f32 %v1480_v50, %v9184_v27  ;;  %v2122_v30 = vadd.f32 %v2121_v15, %v1787_v16 }
 0x188   : > { %v2085_v59 = vadd.f32 %v2084_v40, %v1786_v5  ;;  %v1034_v60 = vadd.f32 %v1033_v54, %v9202_v35  ;;  %v1483_v10 = vadd.f32 %v1482_v57, %v9193_v29  ;;  %v2159_v39 = vadd.f32 %v2158_v22, %v1788_v25 }
 0x189   : > { %v1789_v63 = vmax.f32 %v1032_v53, 0.0  ;;  %v1791_v32 = vmax.f32 %v1481_v9, 0.0 }
 0x18a   : > { %v1790_v6 = vmax.f32 %v1034_v60, 0.0  ;;  %v1037_v7 = vpop.f32.mrb[76].mxu0  ;;  %v1486_v11 = vpop.f32.mrb[76].mxu1  ;;  %v1792_v33 = vmax.f32 %v1483_v10, 0.0 }
 0x18b   : > { %v2049_v12 = vadd.f32 %v2048_v52, %v1789_v63  ;;  %v1038_v13 = vadd.f32 %v1037_v7, %v9197_v31  ;;  %v1039_v14 = vpop.f32.mrb[77].mxu0  ;;  %v1488_v17 = vpop.f32.mrb[77].mxu1  ;;  %v1487_v40 = vadd.f32 %v1486_v11, %v9184_v27  ;;  %v2123_v5 = vadd.f32 %v2122_v30, %v1791_v32 }
 0x18c   : > { %v2086_v18 = vadd.f32 %v2085_v59, %v1790_v6  ;;  %v1040_v19 = vadd.f32 %v1039_v14, %v9202_v35  ;;  %v1489_v41 = vadd.f32 %v1488_v17, %v9193_v29  ;;  %v2160_v52 = vadd.f32 %v2159_v39, %v1792_v33 }
 0x18d   : > { %v1793_v28 = vmax.f32 %v1038_v13, 0.0  ;;  %v1795_v53 = vmax.f32 %v1487_v40, 0.0 }
 0x18e   : > { %v1794_v34 = vmax.f32 %v1040_v19, 0.0  ;;  %v1043_v36 = vpop.f32.mrb[78].mxu0  ;;  %v1492_v44 = vpop.f32.mrb[78].mxu1  ;;  %v1796_v55 = vmax.f32 %v1489_v41, 0.0 }
 0x18f   : > { %v2050_v45 = vadd.f32 %v2049_v12, %v1793_v28  ;;  %v1044_v46 = vadd.f32 %v1043_v36, %v9197_v31  ;;  %v1045_v47 = vpop.f32.mrb[79].mxu0  ;;  %v1493_v48 = vadd.f32 %v1492_v44, %v9184_v27  ;;  %v1494_v49 = vpop.f32.mrb[79].mxu1  ;;  %v2124_v60 = vadd.f32 %v2123_v5, %v1795_v53 }
 0x190   : > { %v2087_v50 = vadd.f32 %v2086_v18, %v1794_v34  ;;  %v1046_v51 = vadd.f32 %v1045_v47, %v9202_v35  ;;  %v1495_v57 = vadd.f32 %v1494_v49, %v9193_v29  ;;  %v2161_v1 = vadd.f32 %v2160_v52, %v1796_v55 }
 0x191   : > { %v1797_v54 = vmax.f32 %v1044_v46, 0.0  ;;  %v1799_v56 = vmax.f32 %v1493_v48, 0.0 }
 0x192   : > { %v1798_v58 = vmax.f32 %v1046_v51, 0.0  ;;  %v1049_v59 = vpop.f32.mrb[80].mxu0  ;;  %v1498_v61 = vpop.f32.mrb[80].mxu1  ;;  %v1800_v2 = vmax.f32 %v1495_v57, 0.0 }
 0x193   : > { %v2051_v62 = vadd.f32 %v2050_v45, %v1797_v54  ;;  %v1050_v63 = vadd.f32 %v1049_v59, %v9197_v31  ;;  %v1051_v0 = vpop.f32.mrb[81].mxu0  ;;  %v1500_v3 = vpop.f32.mrb[81].mxu1  ;;  %v2125_v7 = vadd.f32 %v2124_v60, %v1799_v56  ;;  %v1499_v8 = vadd.f32 %v1498_v61, %v9184_v27 }
 0x194   : > { %v2088_v4 = vadd.f32 %v2087_v50, %v1798_v58  ;;  %v1052_v6 = vadd.f32 %v1051_v0, %v9202_v35  ;;  %v2162_v10 = vadd.f32 %v2161_v1, %v1800_v2  ;;  %v1501_v11 = vadd.f32 %v1500_v3, %v9193_v29 }
 0x195   : > { %v1801_v9 = vmax.f32 %v1050_v63, 0.0  ;;  %v1803_v14 = vmax.f32 %v1499_v8, 0.0 }
 0x196   : > { %v1802_v12 = vmax.f32 %v1052_v6, 0.0  ;;  %v1055_v13 = vpop.f32.mrb[82].mxu0  ;;  %v1504_v15 = vpop.f32.mrb[82].mxu1  ;;  %v1804_v19 = vmax.f32 %v1501_v11, 0.0 }
 0x197   : > { %v2052_v16 = vadd.f32 %v2051_v62, %v1801_v9  ;;  %v1056_v17 = vadd.f32 %v1055_v13, %v9197_v31  ;;  %v1057_v18 = vpop.f32.mrb[83].mxu0  ;;  %v1505_v22 = vadd.f32 %v1504_v15, %v9184_v27  ;;  %v1506_v25 = vpop.f32.mrb[83].mxu1  ;;  %v2126_v32 = vadd.f32 %v2125_v7, %v1803_v14 }
 0x198   : > { %v2089_v28 = vadd.f32 %v2088_v4, %v1802_v12  ;;  %v1058_v30 = vadd.f32 %v1057_v18, %v9202_v35  ;;  %v1507_v33 = vadd.f32 %v1506_v25, %v9193_v29  ;;  %v2163_v36 = vadd.f32 %v2162_v10, %v1804_v19 }
 0x199   : > { %v1805_v34 = vmax.f32 %v1056_v17, 0.0  ;;  %v1807_v39 = vmax.f32 %v1505_v22, 0.0 }
 0x19a   : > { %v1806_v40 = vmax.f32 %v1058_v30, 0.0  ;;  %v1061_v41 = vpop.f32.mrb[84].mxu0  ;;  %v1808_v44 = vmax.f32 %v1507_v33, 0.0  ;;  %v1510_v45 = vpop.f32.mrb[84].mxu1 }
 0x19b   : > { %v2053_v46 = vadd.f32 %v2052_v16, %v1805_v34  ;;  %v1062_v47 = vadd.f32 %v1061_v41, %v9197_v31  ;;  %v1063_v5 = vpop.f32.mrb[85].mxu0  ;;  %v2127_v48 = vadd.f32 %v2126_v32, %v1807_v39  ;;  %v1511_v49 = vadd.f32 %v1510_v45, %v9184_v27  ;;  %v1512_v50 = vpop.f32.mrb[85].mxu1 }
 0x19c   : > { %v2090_v51 = vadd.f32 %v2089_v28, %v1806_v40  ;;  %v1064_v52 = vadd.f32 %v1063_v5, %v9202_v35  ;;  %v2164_v53 = vadd.f32 %v2163_v36, %v1808_v44  ;;  %v1513_v54 = vadd.f32 %v1512_v50, %v9193_v29 }
 0x19d   : > { %v1809_v55 = vmax.f32 %v1062_v47, 0.0  ;;  %v1811_v56 = vmax.f32 %v1511_v49, 0.0 }
 0x19e   : > { %v1810_v57 = vmax.f32 %v1064_v52, 0.0  ;;  %v1067_v58 = vpop.f32.mrb[86].mxu0  ;;  %v1812_v59 = vmax.f32 %v1513_v54, 0.0  ;;  %v1516_v60 = vpop.f32.mrb[86].mxu1 }
 0x19f   : > { %v2054_v61 = vadd.f32 %v2053_v46, %v1809_v55  ;;  %v1068_v62 = vadd.f32 %v1067_v58, %v9197_v31  ;;  %v1069_v63 = vpop.f32.mrb[87].mxu0  ;;  %v2128_v0 = vadd.f32 %v2127_v48, %v1811_v56  ;;  %v1517_v1 = vadd.f32 %v1516_v60, %v9184_v27  ;;  %v1518_v2 = vpop.f32.mrb[87].mxu1 }
 0x1a0   : > { %v2091_v3 = vadd.f32 %v2090_v51, %v1810_v57  ;;  %v1070_v4 = vadd.f32 %v1069_v63, %v9202_v35  ;;  %v2165_v6 = vadd.f32 %v2164_v53, %v1812_v59  ;;  %v1519_v7 = vadd.f32 %v1518_v2, %v9193_v29 }
 0x1a1   : > { %v1813_v8 = vmax.f32 %v1068_v62, 0.0  ;;  %v1815_v9 = vmax.f32 %v1517_v1, 0.0 }
 0x1a2   : > { %v1814_v10 = vmax.f32 %v1070_v4, 0.0  ;;  %v1073_v11 = vpop.f32.mrb[88].mxu0  ;;  %v1816_v12 = vmax.f32 %v1519_v7, 0.0  ;;  %v1522_v13 = vpop.f32.mrb[88].mxu1 }
 0x1a3   : > { %v2055_v14 = vadd.f32 %v2054_v61, %v1813_v8  ;;  %v1074_v15 = vadd.f32 %v1073_v11, %v9197_v31  ;;  %v1075_v16 = vpop.f32.mrb[89].mxu0  ;;  %v2129_v17 = vadd.f32 %v2128_v0, %v1815_v9  ;;  %v1523_v18 = vadd.f32 %v1522_v13, %v9184_v27  ;;  %v1524_v19 = vpop.f32.mrb[89].mxu1 }
 0x1a4   : > { %v2092_v22 = vadd.f32 %v2091_v3, %v1814_v10  ;;  %v1076_v25 = vadd.f32 %v1075_v16, %v9202_v35  ;;  %v2166_v28 = vadd.f32 %v2165_v6, %v1816_v12  ;;  %v1525_v30 = vadd.f32 %v1524_v19, %v9193_v29 }
 0x1a5   : > { %v1817_v32 = vmax.f32 %v1074_v15, 0.0  ;;  %v1819_v33 = vmax.f32 %v1523_v18, 0.0 }
 0x1a6   : > { %v1818_v34 = vmax.f32 %v1076_v25, 0.0  ;;  %v1079_v36 = vpop.f32.mrb[90].mxu0  ;;  %v1820_v39 = vmax.f32 %v1525_v30, 0.0  ;;  %v1528_v40 = vpop.f32.mrb[90].mxu1 }
 0x1a7   : > { %v2056_v41 = vadd.f32 %v2055_v14, %v1817_v32  ;;  %v1080_v44 = vadd.f32 %v1079_v36, %v9197_v31  ;;  %v1081_v45 = vpop.f32.mrb[91].mxu0  ;;  %v2130_v46 = vadd.f32 %v2129_v17, %v1819_v33  ;;  %v1529_v47 = vadd.f32 %v1528_v40, %v9184_v27  ;;  %v1530_v5 = vpop.f32.mrb[91].mxu1 }
 0x1a8   : > { %v2093_v48 = vadd.f32 %v2092_v22, %v1818_v34  ;;  %v1082_v49 = vadd.f32 %v1081_v45, %v9202_v35  ;;  %v2167_v50 = vadd.f32 %v2166_v28, %v1820_v39  ;;  %v1531_v51 = vadd.f32 %v1530_v5, %v9193_v29 }
 0x1a9   : > { %v1821_v52 = vmax.f32 %v1080_v44, 0.0  ;;  %v1823_v53 = vmax.f32 %v1529_v47, 0.0 }
 0x1aa   : > { %v1822_v54 = vmax.f32 %v1082_v49, 0.0  ;;  %v1085_v55 = vpop.f32.mrb[92].mxu0  ;;  %v1824_v56 = vmax.f32 %v1531_v51, 0.0  ;;  %v1534_v57 = vpop.f32.mrb[92].mxu1 }
 0x1ab   : > { %v2057_v58 = vadd.f32 %v2056_v41, %v1821_v52  ;;  %v1086_v59 = vadd.f32 %v1085_v55, %v9197_v31  ;;  %v1087_v60 = vpop.f32.mrb[93].mxu0  ;;  %v2131_v61 = vadd.f32 %v2130_v46, %v1823_v53  ;;  %v1535_v62 = vadd.f32 %v1534_v57, %v9184_v27  ;;  %v1536_v63 = vpop.f32.mrb[93].mxu1 }
 0x1ac   : > { %v2094_v0 = vadd.f32 %v2093_v48, %v1822_v54  ;;  %v1088_v1 = vadd.f32 %v1087_v60, %v9202_v35  ;;  %v2168_v2 = vadd.f32 %v2167_v50, %v1824_v56  ;;  %v1537_v3 = vadd.f32 %v1536_v63, %v9193_v29 }
 0x1ad   : > { %v1825_v4 = vmax.f32 %v1086_v59, 0.0  ;;  %v1827_v6 = vmax.f32 %v1535_v62, 0.0 }
 0x1ae   : > { %v1826_v7 = vmax.f32 %v1088_v1, 0.0  ;;  %v1091_v8 = vpop.f32.mrb[94].mxu0  ;;  %v1828_v9 = vmax.f32 %v1537_v3, 0.0  ;;  %v1540_v10 = vpop.f32.mrb[94].mxu1 }
 0x1af   : > { %v2058_v11 = vadd.f32 %v2057_v58, %v1825_v4  ;;  %v1092_v12 = vadd.f32 %v1091_v8, %v9197_v31  ;;  %v1093_v13 = vpop.f32.mrb[95].mxu0  ;;  %v2132_v14 = vadd.f32 %v2131_v61, %v1827_v6  ;;  %v1541_v15 = vadd.f32 %v1540_v10, %v9184_v27  ;;  %v1542_v16 = vpop.f32.mrb[95].mxu1 }
 0x1b0   : > { %v2095_v17 = vadd.f32 %v2094_v0, %v1826_v7  ;;  %v1094_v18 = vadd.f32 %v1093_v13, %v9202_v35  ;;  %v2169_v19 = vadd.f32 %v2168_v2, %v1828_v9  ;;  %v1543_v22 = vadd.f32 %v1542_v16, %v9193_v29 }
 0x1b1   : > { %v1829_v25 = vmax.f32 %v1092_v12, 0.0  ;;  %v1831_v28 = vmax.f32 %v1541_v15, 0.0 }
 0x1b2   : > { %v1830_v30 = vmax.f32 %v1094_v18, 0.0  ;;  %v1097_v32 = vpop.f32.mrb[96].mxu0  ;;  %v1832_v33 = vmax.f32 %v1543_v22, 0.0  ;;  %v1546_v34 = vpop.f32.mrb[96].mxu1 }
 0x1b3   : > { %v2059_v36 = vadd.f32 %v2058_v11, %v1829_v25  ;;  %v1098_v39 = vadd.f32 %v1097_v32, %v9197_v31  ;;  %v1099_v40 = vpop.f32.mrb[97].mxu0  ;;  %v2133_v41 = vadd.f32 %v2132_v14, %v1831_v28  ;;  %v1547_v44 = vadd.f32 %v1546_v34, %v9184_v27  ;;  %v1548_v45 = vpop.f32.mrb[97].mxu1 }
 0x1b4   : > { %v2096_v46 = vadd.f32 %v2095_v17, %v1830_v30  ;;  %v1100_v47 = vadd.f32 %v1099_v40, %v9202_v35  ;;  %v2170_v5 = vadd.f32 %v2169_v19, %v1832_v33  ;;  %v1549_v48 = vadd.f32 %v1548_v45, %v9193_v29 }
 0x1b5   : > { %v1833_v49 = vmax.f32 %v1098_v39, 0.0  ;;  %v1835_v50 = vmax.f32 %v1547_v44, 0.0 }
 0x1b6   : > { %v1834_v51 = vmax.f32 %v1100_v47, 0.0  ;;  %v1103_v52 = vpop.f32.mrb[98].mxu0  ;;  %v1836_v53 = vmax.f32 %v1549_v48, 0.0  ;;  %v1552_v54 = vpop.f32.mrb[98].mxu1 }
 0x1b7   : > { %v2060_v55 = vadd.f32 %v2059_v36, %v1833_v49  ;;  %v1104_v56 = vadd.f32 %v1103_v52, %v9197_v31  ;;  %v1105_v57 = vpop.f32.mrb[99].mxu0  ;;  %v2134_v58 = vadd.f32 %v2133_v41, %v1835_v50  ;;  %v1553_v59 = vadd.f32 %v1552_v54, %v9184_v27  ;;  %v1554_v60 = vpop.f32.mrb[99].mxu1 }
 0x1b8   : > { %v2097_v61 = vadd.f32 %v2096_v46, %v1834_v51  ;;  %v1106_v62 = vadd.f32 %v1105_v57, %v9202_v35  ;;  %v2171_v63 = vadd.f32 %v2170_v5, %v1836_v53  ;;  %v1555_v0 = vadd.f32 %v1554_v60, %v9193_v29 }
 0x1b9   : > { %v1837_v1 = vmax.f32 %v1104_v56, 0.0  ;;  %v1839_v2 = vmax.f32 %v1553_v59, 0.0 }
 0x1ba   : > { %v1838_v3 = vmax.f32 %v1106_v62, 0.0  ;;  %v1109_v4 = vpop.f32.mrb[100].mxu0  ;;  %v1840_v6 = vmax.f32 %v1555_v0, 0.0  ;;  %v1558_v7 = vpop.f32.mrb[100].mxu1 }
 0x1bb   : > { %v2061_v8 = vadd.f32 %v2060_v55, %v1837_v1  ;;  %v1110_v9 = vadd.f32 %v1109_v4, %v9197_v31  ;;  %v1111_v10 = vpop.f32.mrb[101].mxu0  ;;  %v2135_v11 = vadd.f32 %v2134_v58, %v1839_v2  ;;  %v1559_v12 = vadd.f32 %v1558_v7, %v9184_v27  ;;  %v1560_v13 = vpop.f32.mrb[101].mxu1 }
 0x1bc   : > { %v2098_v14 = vadd.f32 %v2097_v61, %v1838_v3  ;;  %v1112_v15 = vadd.f32 %v1111_v10, %v9202_v35  ;;  %v2172_v16 = vadd.f32 %v2171_v63, %v1840_v6  ;;  %v1561_v17 = vadd.f32 %v1560_v13, %v9193_v29 }
 0x1bd   : > { %v1841_v18 = vmax.f32 %v1110_v9, 0.0  ;;  %v1843_v19 = vmax.f32 %v1559_v12, 0.0 }
 0x1be   : > { %v1842_v22 = vmax.f32 %v1112_v15, 0.0  ;;  %v1115_v25 = vpop.f32.mrb[102].mxu0  ;;  %v1844_v28 = vmax.f32 %v1561_v17, 0.0  ;;  %v1564_v30 = vpop.f32.mrb[102].mxu1 }
 0x1bf   : > { %v2062_v32 = vadd.f32 %v2061_v8, %v1841_v18  ;;  %v1116_v33 = vadd.f32 %v1115_v25, %v9197_v31  ;;  %v1117_v34 = vpop.f32.mrb[103].mxu0  ;;  %v2136_v36 = vadd.f32 %v2135_v11, %v1843_v19  ;;  %v1565_v39 = vadd.f32 %v1564_v30, %v9184_v27  ;;  %v1566_v40 = vpop.f32.mrb[103].mxu1 }
 0x1c0   : > { %v2099_v41 = vadd.f32 %v2098_v14, %v1842_v22  ;;  %v1118_v44 = vadd.f32 %v1117_v34, %v9202_v35  ;;  %v2173_v45 = vadd.f32 %v2172_v16, %v1844_v28  ;;  %v1567_v46 = vadd.f32 %v1566_v40, %v9193_v29 }
 0x1c1   : > { %v1845_v47 = vmax.f32 %v1116_v33, 0.0  ;;  %v1847_v5 = vmax.f32 %v1565_v39, 0.0 }
 0x1c2   : > { %v1846_v48 = vmax.f32 %v1118_v44, 0.0  ;;  %v1121_v49 = vpop.f32.mrb[104].mxu0  ;;  %v1848_v50 = vmax.f32 %v1567_v46, 0.0  ;;  %v1570_v51 = vpop.f32.mrb[104].mxu1 }
 0x1c3   : > { %v2063_v52 = vadd.f32 %v2062_v32, %v1845_v47  ;;  %v1122_v53 = vadd.f32 %v1121_v49, %v9197_v31  ;;  %v1123_v54 = vpop.f32.mrb[105].mxu0  ;;  %v2137_v55 = vadd.f32 %v2136_v36, %v1847_v5  ;;  %v1571_v56 = vadd.f32 %v1570_v51, %v9184_v27  ;;  %v1572_v57 = vpop.f32.mrb[105].mxu1 }
 0x1c4   : > { %v2100_v58 = vadd.f32 %v2099_v41, %v1846_v48  ;;  %v1124_v59 = vadd.f32 %v1123_v54, %v9202_v35  ;;  %v2174_v60 = vadd.f32 %v2173_v45, %v1848_v50  ;;  %v1573_v61 = vadd.f32 %v1572_v57, %v9193_v29 }
 0x1c5   : > { %v1849_v62 = vmax.f32 %v1122_v53, 0.0  ;;  %v1851_v63 = vmax.f32 %v1571_v56, 0.0 }
 0x1c6   : > { %v1850_v0 = vmax.f32 %v1124_v59, 0.0  ;;  %v1127_v1 = vpop.f32.mrb[106].mxu0  ;;  %v1852_v2 = vmax.f32 %v1573_v61, 0.0  ;;  %v1576_v3 = vpop.f32.mrb[106].mxu1 }
 0x1c7   : > { %v2064_v4 = vadd.f32 %v2063_v52, %v1849_v62  ;;  %v1128_v6 = vadd.f32 %v1127_v1, %v9197_v31  ;;  %v1129_v7 = vpop.f32.mrb[107].mxu0  ;;  %v2138_v8 = vadd.f32 %v2137_v55, %v1851_v63  ;;  %v1577_v9 = vadd.f32 %v1576_v3, %v9184_v27  ;;  %v1578_v10 = vpop.f32.mrb[107].mxu1 }
 0x1c8   : > { %v2101_v11 = vadd.f32 %v2100_v58, %v1850_v0  ;;  %v1130_v12 = vadd.f32 %v1129_v7, %v9202_v35  ;;  %v2175_v13 = vadd.f32 %v2174_v60, %v1852_v2  ;;  %v1579_v14 = vadd.f32 %v1578_v10, %v9193_v29 }
 0x1c9   : > { %v1853_v15 = vmax.f32 %v1128_v6, 0.0  ;;  %v1855_v16 = vmax.f32 %v1577_v9, 0.0 }
 0x1ca   : > { %v1854_v17 = vmax.f32 %v1130_v12, 0.0  ;;  %v1133_v18 = vpop.f32.mrb[108].mxu0  ;;  %v1856_v19 = vmax.f32 %v1579_v14, 0.0  ;;  %v1582_v22 = vpop.f32.mrb[108].mxu1 }
 0x1cb   : > { %v2065_v25 = vadd.f32 %v2064_v4, %v1853_v15  ;;  %v1134_v28 = vadd.f32 %v1133_v18, %v9197_v31  ;;  %v1135_v30 = vpop.f32.mrb[109].mxu0  ;;  %v2139_v32 = vadd.f32 %v2138_v8, %v1855_v16  ;;  %v1583_v33 = vadd.f32 %v1582_v22, %v9184_v27  ;;  %v1584_v34 = vpop.f32.mrb[109].mxu1 }
 0x1cc   : > { %v2102_v36 = vadd.f32 %v2101_v11, %v1854_v17  ;;  %v1136_v39 = vadd.f32 %v1135_v30, %v9202_v35  ;;  %v2176_v40 = vadd.f32 %v2175_v13, %v1856_v19  ;;  %v1585_v41 = vadd.f32 %v1584_v34, %v9193_v29 }
 0x1cd   : > { %v1857_v44 = vmax.f32 %v1134_v28, 0.0  ;;  %v1859_v45 = vmax.f32 %v1583_v33, 0.0 }
 0x1ce   : > { %v1858_v46 = vmax.f32 %v1136_v39, 0.0  ;;  %v1139_v47 = vpop.f32.mrb[110].mxu0  ;;  %v1860_v5 = vmax.f32 %v1585_v41, 0.0  ;;  %v1588_v48 = vpop.f32.mrb[110].mxu1 }
 0x1cf   : > { %v2066_v49 = vadd.f32 %v2065_v25, %v1857_v44  ;;  %v1140_v50 = vadd.f32 %v1139_v47, %v9197_v31  ;;  %v1141_v51 = vpop.f32.mrb[111].mxu0  ;;  %v2140_v52 = vadd.f32 %v2139_v32, %v1859_v45  ;;  %v1589_v53 = vadd.f32 %v1588_v48, %v9184_v27  ;;  %v1590_v54 = vpop.f32.mrb[111].mxu1 }
 0x1d0   : > { %v2103_v55 = vadd.f32 %v2102_v36, %v1858_v46  ;;  %v1142_v56 = vadd.f32 %v1141_v51, %v9202_v35  ;;  %v2177_v57 = vadd.f32 %v2176_v40, %v1860_v5  ;;  %v1591_v58 = vadd.f32 %v1590_v54, %v9193_v29 }
 0x1d1   : > { %v1861_v59 = vmax.f32 %v1140_v50, 0.0  ;;  %v1863_v60 = vmax.f32 %v1589_v53, 0.0 }
 0x1d2   : > { %v1862_v61 = vmax.f32 %v1142_v56, 0.0  ;;  %v1145_v62 = vpop.f32.mrb[112].mxu0  ;;  %v1864_v63 = vmax.f32 %v1591_v58, 0.0  ;;  %v1594_v0 = vpop.f32.mrb[112].mxu1 }
 0x1d3   : > { %v2067_v1 = vadd.f32 %v2066_v49, %v1861_v59  ;;  %v1146_v2 = vadd.f32 %v1145_v62, %v9197_v31  ;;  %v1147_v3 = vpop.f32.mrb[113].mxu0  ;;  %v2141_v4 = vadd.f32 %v2140_v52, %v1863_v60  ;;  %v1595_v6 = vadd.f32 %v1594_v0, %v9184_v27  ;;  %v1596_v7 = vpop.f32.mrb[113].mxu1 }
 0x1d4   : > { %v2104_v8 = vadd.f32 %v2103_v55, %v1862_v61  ;;  %v1148_v9 = vadd.f32 %v1147_v3, %v9202_v35  ;;  %v2178_v10 = vadd.f32 %v2177_v57, %v1864_v63  ;;  %v1597_v11 = vadd.f32 %v1596_v7, %v9193_v29 }
 0x1d5   : > { %v1865_v12 = vmax.f32 %v1146_v2, 0.0  ;;  %v1867_v13 = vmax.f32 %v1595_v6, 0.0 }
 0x1d6   : > { %v1866_v14 = vmax.f32 %v1148_v9, 0.0  ;;  %v1151_v15 = vpop.f32.mrb[114].mxu0  ;;  %v1868_v16 = vmax.f32 %v1597_v11, 0.0  ;;  %v1600_v17 = vpop.f32.mrb[114].mxu1 }
 0x1d7   : > { %v2068_v18 = vadd.f32 %v2067_v1, %v1865_v12  ;;  %v1152_v19 = vadd.f32 %v1151_v15, %v9197_v31  ;;  %v1153_v22 = vpop.f32.mrb[115].mxu0  ;;  %v2142_v25 = vadd.f32 %v2141_v4, %v1867_v13  ;;  %v1601_v28 = vadd.f32 %v1600_v17, %v9184_v27  ;;  %v1602_v30 = vpop.f32.mrb[115].mxu1 }
 0x1d8   : > { %v2105_v32 = vadd.f32 %v2104_v8, %v1866_v14  ;;  %v1154_v33 = vadd.f32 %v1153_v22, %v9202_v35  ;;  %v2179_v34 = vadd.f32 %v2178_v10, %v1868_v16  ;;  %v1603_v36 = vadd.f32 %v1602_v30, %v9193_v29 }
 0x1d9   : > { %v1869_v39 = vmax.f32 %v1152_v19, 0.0  ;;  %v1871_v40 = vmax.f32 %v1601_v28, 0.0 }
 0x1da   : > { %v1870_v41 = vmax.f32 %v1154_v33, 0.0  ;;  %v1157_v44 = vpop.f32.mrb[116].mxu0  ;;  %v1872_v45 = vmax.f32 %v1603_v36, 0.0  ;;  %v1606_v46 = vpop.f32.mrb[116].mxu1  ;;  %v1928_v33 = vrot.slane %v9437_v37, 4 }
 0x1db   : > { %v2069_v47 = vadd.f32 %v2068_v18, %v1869_v39  ;;  %v1158_v5 = vadd.f32 %v1157_v44, %v9197_v31  ;;  %v1159_v48 = vpop.f32.mrb[117].mxu0  ;;  %v2143_v49 = vadd.f32 %v2142_v25, %v1871_v40  ;;  %v1607_v50 = vadd.f32 %v1606_v46, %v9184_v27  ;;  %v1608_v51 = vpop.f32.mrb[117].mxu1 }
 0x1dc   : > { %v2106_v52 = vadd.f32 %v2105_v32, %v1870_v41  ;;  %v1160_v53 = vadd.f32 %v1159_v48, %v9202_v35  ;;  %v2180_v54 = vadd.f32 %v2179_v34, %v1872_v45  ;;  %v1609_v55 = vadd.f32 %v1608_v51, %v9193_v29 }
 0x1dd   : > { %v1873_v56 = vmax.f32 %v1158_v5, 0.0  ;;  %v1875_v57 = vmax.f32 %v1607_v50, 0.0  ;;  %v2002_v34 = vrot.slane %v9439_v38, 4  ;;  %v1965_v40 = vrot.slane %v9442_v42, 4 }
 0x1de   : > { %v1874_v58 = vmax.f32 %v1160_v53, 0.0  ;;  %v1163_v59 = vpop.f32.mrb[118].mxu0  ;;  %v1876_v60 = vmax.f32 %v1609_v55, 0.0  ;;  %v1612_v61 = vpop.f32.mrb[118].mxu1  ;;  %v2039_v41 = vrot.slane %v9444_v43, 4 }
 0x1df   : > { %v2070_v62 = vadd.f32 %v2069_v47, %v1873_v56  ;;  %v1164_v63 = vadd.f32 %v1163_v59, %v9197_v31  ;;  %v1165_v0 = vpop.f32.mrb[119].mxu0  ;;  %v2144_v1 = vadd.f32 %v2143_v49, %v1875_v57  ;;  %v1613_v2 = vadd.f32 %v1612_v61, %v9184_v27  ;;  %v1614_v3 = vpop.f32.mrb[119].mxu1 }
 0x1e0   : > { %v2107_v4 = vadd.f32 %v2106_v52, %v1874_v58  ;;  %v1166_v6 = vadd.f32 %v1165_v0, %v9202_v35  ;;  %v2181_v7 = vadd.f32 %v2180_v54, %v1876_v60  ;;  %v1615_v8 = vadd.f32 %v1614_v3, %v9193_v29 }
 0x1e1   : > { %v1877_v9 = vmax.f32 %v1164_v63, 0.0  ;;  %v1879_v10 = vmax.f32 %v1613_v2, 0.0  ;;  %v1929_v57 = vadd.f32 %v1928_v33, %v9437_v37  ;;  %v2003_v58 = vadd.f32 %v2002_v34, %v9439_v38 }
 0x1e2   : > { %v1878_v11 = vmax.f32 %v1166_v6, 0.0  ;;  %v1169_v12 = vpop.f32.mrb[120].mxu0  ;;  %v1880_v13 = vmax.f32 %v1615_v8, 0.0  ;;  %v1618_v14 = vpop.f32.mrb[120].mxu1  ;;  %v1966_v61 = vadd.f32 %v1965_v40, %v9442_v42 }
 0x1e3   : > { %v2071_v15 = vadd.f32 %v2070_v62, %v1877_v9  ;;  %v1170_v16 = vadd.f32 %v1169_v12, %v9197_v31  ;;  %v1171_v17 = vpop.f32.mrb[121].mxu0  ;;  %v2145_v18 = vadd.f32 %v2144_v1, %v1879_v10  ;;  %v1619_v19 = vadd.f32 %v1618_v14, %v9184_v27  ;;  %v1620_v22 = vpop.f32.mrb[121].mxu1 }
 0x1e4   : > { %v2108_v25 = vadd.f32 %v2107_v4, %v1878_v11  ;;  %v1172_v28 = vadd.f32 %v1171_v17, %v9202_v35  ;;  %v2182_v30 = vadd.f32 %v2181_v7, %v1880_v13  ;;  %v1621_v32 = vadd.f32 %v1620_v22, %v9193_v29 }
 0x1e5   : > { %v1881_v36 = vmax.f32 %v1170_v16, 0.0  ;;  %v1883_v39 = vmax.f32 %v1619_v19, 0.0  ;;  %v2040_v62 = vadd.f32 %v2039_v41, %v9444_v43  ;;  %v1930_v11 = vrot.slane %v1929_v57, 2 }
 0x1e6   : > { %v1882_v44 = vmax.f32 %v1172_v28, 0.0  ;;  %v1175_v45 = vpop.f32.mrb[122].mxu0  ;;  %v1884_v46 = vmax.f32 %v1621_v32, 0.0  ;;  %v1624_v47 = vpop.f32.mrb[122].mxu1  ;;  %v2004_v43 = vrot.slane %v2003_v58, 2  ;;  %v1967_v14 = vrot.slane %v1966_v61, 2 }
 0x1e7   : > { %v2072_v5 = vadd.f32 %v2071_v15, %v1881_v36  ;;  %v1176_v48 = vadd.f32 %v1175_v45, %v9197_v31  ;;  %v1177_v49 = vpop.f32.mrb[123].mxu0  ;;  %v2146_v50 = vadd.f32 %v2145_v18, %v1883_v39  ;;  %v1625_v51 = vadd.f32 %v1624_v47, %v9184_v27  ;;  %v1626_v52 = vpop.f32.mrb[123].mxu1 }
 0x1e8   : > { %v2109_v53 = vadd.f32 %v2108_v25, %v1882_v44  ;;  %v1178_v54 = vadd.f32 %v1177_v49, %v9202_v35  ;;  %v2183_v55 = vadd.f32 %v2182_v30, %v1884_v46  ;;  %v1627_v56 = vadd.f32 %v1626_v52, %v9193_v29 }
 0x1e9   : > { %v1885_v59 = vmax.f32 %v1176_v48, 0.0  ;;  %v1887_v60 = vmax.f32 %v1625_v51, 0.0  ;;  %v2041_v15 = vrot.slane %v2040_v62, 2  ;;  %v1931_v41 = vadd.f32 %v1930_v11, %v1929_v57 }
 0x1ea   : > { %v1886_v63 = vmax.f32 %v1178_v54, 0.0  ;;  %v1181_v0 = vpop.f32.mrb[124].mxu0  ;;  %v1888_v1 = vmax.f32 %v1627_v56, 0.0  ;;  %v1630_v2 = vpop.f32.mrb[124].mxu1  ;;  %v2005_v44 = vadd.f32 %v2004_v43, %v2003_v58  ;;  %v1968_v47 = vadd.f32 %v1967_v14, %v1966_v61 }
 0x1eb   : > { %v2073_v3 = vadd.f32 %v2072_v5, %v1885_v59  ;;  %v2147_v4 = vadd.f32 %v2146_v50, %v1887_v60  ;;  %v1182_v6 = vadd.f32 %v1181_v0, %v9197_v31  ;;  %v1183_v7 = vpop.f32.mrb[125].mxu0  ;;  %v1631_v8 = vadd.f32 %v1630_v2, %v9184_v27  ;;  %v1632_v37 = vpop.f32.mrb[125].mxu1 }
 0x1ec   : > { %v2110_v9 = vadd.f32 %v2109_v53, %v1886_v63  ;;  %v2184_v38 = vadd.f32 %v2183_v55, %v1888_v1  ;;  %v1184_v10 = vadd.f32 %v1183_v7, %v9202_v35  ;;  %v1633_v42 = vadd.f32 %v1632_v37, %v9193_v29 }
 0x1ed   : > { %v1889_v12 = vmax.f32 %v1182_v6, 0.0  ;;  %v1891_v13 = vmax.f32 %v1631_v8, 0.0  ;;  %v2042_v5 = vadd.f32 %v2041_v15, %v2040_v62  ;;  %v1932_v52 = vrot.slane %v1931_v41, 1 }
 0x1ee   : > { %v1890_v16 = vmax.f32 %v1184_v10, 0.0  ;;  %v1892_v17 = vmax.f32 %v1633_v42, 0.0  ;;  %v1187_v18 = vpop.f32.mrb[126].mxu0  ;;  %v1636_v19 = vpop.f32.mrb[126].mxu1  ;;  %v2006_v53 = vrot.slane %v2005_v44, 1  ;;  %v1969_v56 = vrot.slane %v1968_v47, 1 }
 0x1ef   : > { %v2074_v22 = vadd.f32 %v2073_v3, %v1889_v12  ;;  %v2148_v25 = vadd.f32 %v2147_v4, %v1891_v13  ;;  %v1188_v28 = vadd.f32 %v1187_v18, %v9197_v31  ;;  %v1637_v30 = vadd.f32 %v1636_v19, %v9184_v27  ;;  %v1189_v32 = vpop.f32.mrb[127].mxu0  ;;  %v1638_v33 = vpop.f32.mrb[127].mxu1 }
 0x1f0   : > { %v2111_v34 = vadd.f32 %v2110_v9, %v1890_v16  ;;  %v2185_v36 = vadd.f32 %v2184_v38, %v1892_v17  ;;  %v1190_v39 = vadd.f32 %v1189_v32, %v9202_v35  ;;  %v1639_v40 = vadd.f32 %v1638_v33, %v9193_v29 }
 0x1f1   : > { %v1893_v45 = vmax.f32 %v1188_v28, 0.0  ;;  %v1895_v46 = vmax.f32 %v1637_v30, 0.0  ;;  %v2043_v35 = vrot.slane %v2042_v5, 1  ;;  %v1933_v61 = vadd.f32 %v1932_v52, %v1931_v41 }
 0x1f2   : > { %v1894_v48 = vmax.f32 %v1190_v39, 0.0  ;;  %v1896_v49 = vmax.f32 %v1639_v40, 0.0  ;;  %v2007_v62 = vadd.f32 %v2006_v53, %v2005_v44  ;;  %v1970_v2 = vadd.f32 %v1969_v56, %v1968_v47 }
 0x1f3   : > { %v2075_v50 = vadd.f32 %v2074_v22, %v1893_v45  ;;  %v2149_v31 = vadd.f32 %v2148_v25, %v1895_v46  ;;  %v2044_v3 = vadd.f32 %v2043_v35, %v2042_v5  ;;  %v2194_v38 = vmul.f32 0.00390625, %v1933_v61  ;;  %v8277_v35 = vld [vmem:[%s8768_s17 + $0x4cc] ss:$36 sps:$4 sm:$0xff]  }
 0x1f4   : > { %v2112_v51 = vadd.f32 %v2111_v34, %v1894_v48  ;;  %v2186_v27 = vadd.f32 %v2185_v36, %v1896_v49  ;;  %v2196_v10 = vmul.f32 0.00390625, %v2007_v62  ;;  %v2195_v43 = vmul.f32 0.00390625, %v1970_v2  ;;  %v8281_v61 = vld [vmem:[%s8768_s17 + $0x510] ss:$36 sps:$4 sm:$0xff]   ;;  %v8284_v62 = vld [vmem:[%s8768_s17 + $0x518] ss:$36 sps:$4 sm:$0xff]  }
 0x1f5   : > { %v2076_v54 = vrot.slane %v2075_v50, 4  ;;  %v2150_v55 = vrot.slane %v2149_v31, 4  ;;  %v2197_v12 = vmul.f32 0.00390625, %v2044_v3  ;;  %v2205_v19 = vpack.c.bf16 %v2194_v38, %v2194_v38  ;;  %v8287_v2 = vld [vmem:[%s8768_s17 + $0x558] ss:$36 sps:$4 sm:$0xff]  }
 0x1f6   : > { %v2113_v59 = vrot.slane %v2112_v51, 4  ;;  %v2187_v29 = vrot.slane %v2186_v27, 4  ;;  %v2207_v22 = vpack.c.bf16 %v2196_v10, %v2196_v10  ;;  %v2206_v30 = vpack.c.bf16 %v2195_v43, %v2195_v43  ;;  %v8290_v3 = vld [vmem:[%s8768_s17 + $0x560] ss:$36 sps:$4 sm:$0xff]   ;;  %v8299_v38 = vld [vmem:[%s8768_s17 + $0x5e8] ss:$36 sps:$4 sm:$0xff]  }
 0x1f7   : > { %v2077_v57 = vadd.f32 %v2076_v54, %v2075_v50  ;;  %v2151_v58 = vadd.f32 %v2150_v55, %v2149_v31  ;;  %v2208_v32 = vpack.c.bf16 %v2197_v12, %v2197_v12  ;;  %v2541_v44 = vunpack.c.l.b16 %v2205_v19  ;;  %v8269_v54 = vld [vmem:[%s8768_s17 + $0x480] ss:$36 sps:$4 sm:$0xff]   ;;  %v8272_v55 = vld [vmem:[%s8768_s17 + $0x488] ss:$36 sps:$4 sm:$0xff]   ;;  %v8302_v10 = vld [vmem:[%s8768_s17 + $0x5f0] ss:$36 sps:$4 sm:$0xff]  }
 0x1f8   : > { %v2114_v60 = vadd.f32 %v2113_v59, %v2112_v51  ;;  %v2188_v63 = vadd.f32 %v2187_v29, %v2186_v27  ;;  %v2543_v45 = vunpack.c.l.b16 %v2207_v22  ;;  %v2542_v5 = vunpack.c.l.b16 %v2206_v30  ;;  %v8280_v59 = vld [vmem:[%s8768_s17 + $0x4d4] ss:$36 sps:$4 sm:$0xff]   ;;  %v8317_v19 = vld [vmem:[%s8768_s17 + $0x6c0] ss:$36 sps:$4 sm:$0xff]   ;;  %v8320_v22 = vld [vmem:[%s8768_s17 + $0x6c8] ss:$36 sps:$4 sm:$0xff]  }
 0x1f9   : > { %v2078_v0 = vrot.slane %v2077_v57, 2  ;;  %v2152_v1 = vrot.slane %v2151_v58, 2  ;;  %v2544_v48 = vunpack.c.l.b16 %v2208_v32  ;;  %v8305_v43 = vld [vmem:[%s8768_s17 + $0x630] ss:$36 sps:$4 sm:$0xff]   ;;  %v8308_v12 = vld [vmem:[%s8768_s17 + $0x638] ss:$36 sps:$4 sm:$0xff]  }
 0x1fa   : > { %v2115_v4 = vrot.slane %v2114_v60, 2  ;;  %v2189_v6 = vrot.slane %v2188_v63, 2  ;;  %v8323_v30 = vld [vmem:[%s8768_s17 + $0x708] ss:$36 sps:$4 sm:$0xff]   ;;  %v8326_v32 = vld [vmem:[%s8768_s17 + $0x710] ss:$36 sps:$4 sm:$0xff]  }
 0x1fb   : > { %v2079_v7 = vadd.f32 %v2078_v0, %v2077_v57  ;;  %v2153_v8 = vadd.f32 %v2152_v1, %v2151_v58  ;;  %v8275_v57 = vld [vmem:[%s8768_s17 + $0x4c8] ss:$36 sps:$4 sm:$0xff]   ;;  %v8278_v58 = vld [vmem:[%s8768_s17 + $0x4d0] ss:$36 sps:$4 sm:$0xff]   ;;  %v8289_v0 = vld [vmem:[%s8768_s17 + $0x55c] ss:$36 sps:$4 sm:$0xff]  }
 0x1fc   : > { %v2116_v37 = vadd.f32 %v2115_v4, %v2114_v60  ;;  %v2190_v9 = vadd.f32 %v2189_v6, %v2188_v63  ;;  %v8283_v60 = vld [vmem:[%s8768_s17 + $0x514] ss:$36 sps:$4 sm:$0xff]   ;;  %v8286_v63 = vld [vmem:[%s8768_s17 + $0x51c] ss:$36 sps:$4 sm:$0xff]   ;;  %v8292_v1 = vld [vmem:[%s8768_s17 + $0x564] ss:$36 sps:$4 sm:$0xff]  }
 0x1fd   : > { %v2080_v42 = vrot.slane %v2079_v7, 1  ;;  %v2154_v11 = vrot.slane %v2153_v8, 1  ;;  %v8295_v4 = vld [vmem:[%s8768_s17 + $0x5a4] ss:$36 sps:$4 sm:$0xff]   ;;  %v8298_v6 = vld [vmem:[%s8768_s17 + $0x5ac] ss:$36 sps:$4 sm:$0xff]  }
 0x1fe   : > { %v2117_v13 = vrot.slane %v2116_v37, 1  ;;  %v2191_v14 = vrot.slane %v2190_v9, 1 }
 0x1ff   : > { %v2081_v15 = vadd.f32 %v2080_v42, %v2079_v7  ;;  %v2155_v16 = vadd.f32 %v2154_v11, %v2153_v8  ;;  %v8293_v7 = vld [vmem:[%s8768_s17 + $0x5a0] ss:$36 sps:$4 sm:$0xff]   ;;  %v8296_v8 = vld [vmem:[%s8768_s17 + $0x5a8] ss:$36 sps:$4 sm:$0xff]   ;;  %v8307_v42 = vld [vmem:[%s8768_s17 + $0x634] ss:$36 sps:$4 sm:$0xff]  }
 0x200   : > { %v2118_v17 = vadd.f32 %v2117_v13, %v2116_v37  ;;  %v2192_v18 = vadd.f32 %v2191_v14, %v2190_v9  ;;  %v8301_v37 = vld [vmem:[%s8768_s17 + $0x5ec] ss:$36 sps:$4 sm:$0xff]   ;;  %v8304_v9 = vld [vmem:[%s8768_s17 + $0x5f4] ss:$36 sps:$4 sm:$0xff]   ;;  %v8310_v11 = vld [vmem:[%s8768_s17 + $0x63c] ss:$36 sps:$4 sm:$0xff]  }
 0x201   : > { %v2198_v25 = vmul.f32 0.00390625, %v2081_v15  ;;  %v2200_v28 = vmul.f32 0.00390625, %v2155_v16  ;;  %v8313_v13 = vld [vmem:[%s8768_s17 + $0x67c] ss:$36 sps:$4 sm:$0xff]   ;;  %v8316_v14 = vld [vmem:[%s8768_s17 + $0x684] ss:$36 sps:$4 sm:$0xff]  }
 0x202   : > { %v2199_v33 = vmul.f32 0.00390625, %v2118_v17  ;;  %v2201_v34 = vmul.f32 0.00390625, %v2192_v18  ;;  %v8311_v15 = vld [vmem:[%s8768_s17 + $0x678] ss:$36 sps:$4 sm:$0xff]   ;;  %v8314_v16 = vld [vmem:[%s8768_s17 + $0x680] ss:$36 sps:$4 sm:$0xff]  }
 0x203   : > { %v2209_v36 = vpack.c.bf16 %v2198_v25, %v2198_v25  ;;  %v2211_v39 = vpack.c.bf16 %v2200_v28, %v2200_v28  ;;  %v8319_v17 = vld [vmem:[%s8768_s17 + $0x6c4] ss:$36 sps:$4 sm:$0xff]   ;;  %v8322_v18 = vld [vmem:[%s8768_s17 + $0x6cc] ss:$36 sps:$4 sm:$0xff]   ;;  %v8328_v28 = vld [vmem:[%s8768_s17 + $0x714] ss:$36 sps:$4 sm:$0xff]  }
 0x204   : > { %v2210_v40 = vpack.c.bf16 %v2199_v33, %v2199_v33  ;;  %v2212_v41 = vpack.c.bf16 %v2201_v34, %v2201_v34  ;;  %v8325_v25 = vld [vmem:[%s8768_s17 + $0x70c] ss:$36 sps:$4 sm:$0xff]   ;;  %v8331_v33 = vld [vmem:[%s8768_s17 + $0x754] ss:$36 sps:$4 sm:$0xff]   ;;  %v8334_v34 = vld [vmem:[%s8768_s17 + $0x75c] ss:$36 sps:$4 sm:$0xff]  }
 0x205   : > { %v2545_v46 = vunpack.c.l.b16 %v2209_v36  ;;  %v2547_v47 = vunpack.c.l.b16 %v2211_v39  ;;  %v8329_v36 = vld [vmem:[%s8768_s17 + $0x750] ss:$36 sps:$4 sm:$0xff]   ;;  %v8332_v39 = vld [vmem:[%s8768_s17 + $0x758] ss:$36 sps:$4 sm:$0xff]  }
 0x206   : > { %v2546_v49 = vunpack.c.l.b16 %v2210_v40  ;;  %v2548_v50 = vunpack.c.l.b16 %v2212_v41  ;;  %v8337_v40 = vld [vmem:[%s8768_s17 + $0x79c] ss:$36 sps:$4 sm:$0xff]   ;;  %v8340_v41 = vld [vmem:[%s8768_s17 + $0x7a4] ss:$36 sps:$4 sm:$0xff]  }
 0x207   : > { %v2550_v31 = vsel %vm2549_vm3, %v2545_v46, %v2541_v44  ;;  %v9587_v51 = vsel %vm2549_vm3, %v2547_v47, %v2543_v45  ;;  %v8335_v44 = vld [vmem:[%s8768_s17 + $0x798] ss:$36 sps:$4 sm:$0xff]   ;;  %v8338_v45 = vld [vmem:[%s8768_s17 + $0x7a0] ss:$36 sps:$4 sm:$0xff]   ;;  %v8346_v47 = vld [vmem:[%s8768_s17 + $0x7ec] ss:$36 sps:$4 sm:$0xff]  }
 0x208   : > { %v2551_v27 = vsel %vm2549_vm3, %v2546_v49, %v2542_v5  ;;  %v2553_v52 = vsel %vm2549_vm3, %v2548_v50, %v2544_v48  ;;  %v9593_v56 = vpack.c.b16 %v2550_v31, %v2550_v31  ;;  %v8343_v46 = vld [vmem:[%s8768_s17 + $0x7e4] ss:$36 sps:$4 sm:$0xff]   ;;  %v8349_v49 = vld [vmem:[%s8768_s17 + $0x82c] ss:$36 sps:$4 sm:$0xff]   ;;  %v8352_v50 = vld [vmem:[%s8768_s17 + $0x834] ss:$36 sps:$4 sm:$0xff]  }
 0x209   : > { %v9589_v53 = vpack.c.b16 %v2551_v27, %v2551_v27  ;;  %v9601_v29 = vpack.c.b16 %v2553_v52, %v2553_v52  ;;  %v8341_v5 = vld [vmem:[%s8768_s17 + $0x7e0] ss:$36 sps:$4 sm:$0xff]   ;;  %v8344_v48 = vld [vmem:[%s8768_s17 + $0x7e8] ss:$36 sps:$4 sm:$0xff]   ;;  %v8350_v27 = vld [vmem:[%s8768_s17 + $0x830] ss:$36 sps:$4 sm:$0xff]  }
 0x20a   : > { %v8347_v31 = vld [vmem:[%s8768_s17 + $0x828] ss:$36 sps:$4 sm:$0xff]   ;;  %v8355_v52 = vld [vmem:[%s8768_s17 + $0x874] ss:$36 sps:$4 sm:$0xff]  }
 0x20b   : > { %4066 = vmatprep.mubr.bf16.mxu0 %v9589_v53  ;;  %4148 = vmatprep.mubr.bf16.mxu1 %v9589_v53 }
 0x20c   : > { %4067 = vmatmul.mubr.bf16.vlgmr.msra.gmra.mrb[128].mxu0 %v9593_v56  ;;  %4149 = vmatmul.mubr.bf16.vlgmr.msra.gmra.mrb[128].mxu1 %v9593_v56 }
 0x20d   : > { %4076 = vmatpush1.bf16.msra.mxu0 %v8269_v54  ;;  %4158 = vmatpush1.bf16.msra.mxu1 %v8272_v55  ;;  %v8358_v54 = vld [vmem:[%s8768_s17 + $0x87c] ss:$36 sps:$4 sm:$0xff]   ;;  %v8353_v55 = vld [vmem:[%s8768_s17 + $0x870] ss:$36 sps:$4 sm:$0xff]  }
 0x20e   : > { %4107 = vmatprep.mubr.bf16.mxu0 %v9601_v29  ;;  %4189 = vmatprep.mubr.bf16.mxu1 %v9601_v29 }
 0x20f   : > { %4077 = vmatprep.subr.bf16.mxu0 %v8277_v35  ;;  %4159 = vmatprep.subr.bf16.mxu1 %v8280_v59  ;;  %v8356_v35 = vld [vmem:[%s8768_s17 + $0x878] ss:$36 sps:$4 sm:$0xff]  }
 0x210   : > { %v8361_v59 = vld [vmem:[%s8768_s17 + $0x8bc] ss:$36 sps:$4 sm:$0xff]  }
 0x211   : > { %4078 = vmatpush1.bf16.msra.mxu0 %v8275_v57  ;;  %4160 = vmatpush1.bf16.msra.mxu1 %v8278_v58  ;;  %v8364_v57 = vld [vmem:[%s8768_s17 + $0x8c4] ss:$36 sps:$4 sm:$0xff]   ;;  %v8359_v58 = vld [vmem:[%s8768_s17 + $0x8b8] ss:$36 sps:$4 sm:$0xff]  }
 0x212   : > { %4079 = vmatprep.subr.bf16.mxu0 %v8283_v60  ;;  %4161 = vmatprep.subr.bf16.mxu1 %v8286_v63  ;;  %v8362_v60 = vld [vmem:[%s8768_s17 + $0x8c0] ss:$36 sps:$4 sm:$0xff]   ;;  %v8367_v63 = vld [vmem:[%s8768_s17 + $0x14] ss:$36 sps:$4 sm:$0xff]  }
 0x215   : > { %4080 = vmatpush1.bf16.msra.mxu0 %v8281_v61  ;;  %4162 = vmatpush1.bf16.msra.mxu1 %v8284_v62  ;;  %v8370_v61 = vld [vmem:[%s8768_s17 + $0x1c] ss:$36 sps:$4 sm:$0xff]   ;;  %v8365_v62 = vld [vmem:[%s8768_s17 + $0x10] ss:$36 sps:$4 sm:$0xff]  }
 0x216   : > { %4081 = vmatprep.subr.bf16.mxu0 %v8289_v0  ;;  %4163 = vmatprep.subr.bf16.mxu1 %v8292_v1  ;;  %v9668_v0 = vpack.c.b16 %v9587_v51, %v9587_v51  ;;  %v8368_v1 = vld [vmem:[%s8768_s17 + $0x18] ss:$36 sps:$4 sm:$0xff]   ;;  %v8374_v51 = vld [vmem:[%s8768_s17 + $0x60] ss:$36 sps:$4 sm:$0xff]  }
 0x219   : > { %4082 = vmatpush1.bf16.msra.mxu0 %v8287_v2  ;;  %4164 = vmatpush1.bf16.msra.mxu1 %v8290_v3  ;;  %v8373_v2 = vld [vmem:[%s8768_s17 + $0x5c] ss:$36 sps:$4 sm:$0xff]   ;;  %v8376_v3 = vld [vmem:[%s8768_s17 + $0x64] ss:$36 sps:$4 sm:$0xff]  }
 0x21a   : > { %4083 = vmatprep.subr.bf16.mxu0 %v8295_v4  ;;  %4165 = vmatprep.subr.bf16.mxu1 %v8298_v6  ;;  %v8371_v4 = vld [vmem:[%s8768_s17 + $0x58] ss:$36 sps:$4 sm:$0xff]   ;;  %v8379_v6 = vld [vmem:[%s8768_s17 + $0xa4] ss:$36 sps:$4 sm:$0xff]  }
 0x21d   : > { %4084 = vmatpush1.bf16.msra.mxu0 %v8293_v7  ;;  %4166 = vmatpush1.bf16.msra.mxu1 %v8296_v8  ;;  %v8382_v7 = vld [vmem:[%s8768_s17 + $0xac] ss:$36 sps:$4 sm:$0xff]   ;;  %v8377_v8 = vld [vmem:[%s8768_s17 + $0xa0] ss:$36 sps:$4 sm:$0xff]  }
 0x21e   : > { %4085 = vmatprep.subr.bf16.mxu0 %v8301_v37  ;;  %4167 = vmatprep.subr.bf16.mxu1 %v8304_v9  ;;  %v8380_v37 = vld [vmem:[%s8768_s17 + $0xa8] ss:$36 sps:$4 sm:$0xff]  }
 0x21f   : > { %v8385_v9 = vld [vmem:[%s8768_s17 + $0xec] ss:$36 sps:$4 sm:$0xff]  }
 0x221   : > { %4086 = vmatpush1.bf16.msra.mxu0 %v8299_v38  ;;  %4168 = vmatpush1.bf16.msra.mxu1 %v8302_v10  ;;  %v8388_v38 = vld [vmem:[%s8768_s17 + $0xf4] ss:$36 sps:$4 sm:$0xff]   ;;  %v8383_v10 = vld [vmem:[%s8768_s17 + $0xe8] ss:$36 sps:$4 sm:$0xff]  }
 0x222   : > { %4087 = vmatprep.subr.bf16.mxu0 %v8307_v42  ;;  %4169 = vmatprep.subr.bf16.mxu1 %v8310_v11  ;;  %v8386_v42 = vld [vmem:[%s8768_s17 + $0xf0] ss:$36 sps:$4 sm:$0xff]  }
 0x223   : > { %v8391_v11 = vld [vmem:[%s8768_s17 + $0x134] ss:$36 sps:$4 sm:$0xff]  }
 0x225   : > { %4088 = vmatpush1.bf16.msra.mxu0 %v8305_v43  ;;  %4170 = vmatpush1.bf16.msra.mxu1 %v8308_v12  ;;  %v8394_v43 = vld [vmem:[%s8768_s17 + $0x13c] ss:$36 sps:$4 sm:$0xff]   ;;  %v8389_v12 = vld [vmem:[%s8768_s17 + $0x130] ss:$36 sps:$4 sm:$0xff]  }
 0x226   : > { %4089 = vmatprep.subr.bf16.mxu0 %v8313_v13  ;;  %4171 = vmatprep.subr.bf16.mxu1 %v8316_v14  ;;  %v8392_v13 = vld [vmem:[%s8768_s17 + $0x138] ss:$36 sps:$4 sm:$0xff]  }
 0x227   : > { %v8397_v14 = vld [vmem:[%s8768_s17 + $0x17c] ss:$36 sps:$4 sm:$0xff]  }
 0x229   : > { %4090 = vmatpush1.bf16.msra.mxu0 %v8311_v15  ;;  %4172 = vmatpush1.bf16.msra.mxu1 %v8314_v16  ;;  %v8400_v15 = vld [vmem:[%s8768_s17 + $0x184] ss:$36 sps:$4 sm:$0xff]   ;;  %v8395_v16 = vld [vmem:[%s8768_s17 + $0x178] ss:$36 sps:$4 sm:$0xff]  }
 0x22a   : > { %4091 = vmatprep.subr.bf16.mxu0 %v8319_v17  ;;  %4173 = vmatprep.subr.bf16.mxu1 %v8322_v18  ;;  %v8398_v17 = vld [vmem:[%s8768_s17 + $0x180] ss:$36 sps:$4 sm:$0xff]  }
 0x22b   : > { %v8403_v18 = vld [vmem:[%s8768_s17 + $0x1c4] ss:$36 sps:$4 sm:$0xff]  }
 0x22d   : > { %4092 = vmatpush1.bf16.msra.mxu0 %v8317_v19  ;;  %4174 = vmatpush1.bf16.msra.mxu1 %v8320_v22  ;;  %v8406_v19 = vld [vmem:[%s8768_s17 + $0x1cc] ss:$36 sps:$4 sm:$0xff]   ;;  %v8401_v22 = vld [vmem:[%s8768_s17 + $0x1c0] ss:$36 sps:$4 sm:$0xff]  }
 0x22e   : > { %4093 = vmatprep.subr.bf16.mxu0 %v8325_v25  ;;  %4175 = vmatprep.subr.bf16.mxu1 %v8328_v28  ;;  %v8404_v25 = vld [vmem:[%s8768_s17 + $0x1c8] ss:$36 sps:$4 sm:$0xff]  }
 0x22f   : > { %v8409_v28 = vld [vmem:[%s8768_s17 + $0x20c] ss:$36 sps:$4 sm:$0xff]  }
 0x231   : > { %4094 = vmatpush1.bf16.msra.mxu0 %v8323_v30  ;;  %4176 = vmatpush1.bf16.msra.mxu1 %v8326_v32  ;;  %v8412_v30 = vld [vmem:[%s8768_s17 + $0x214] ss:$36 sps:$4 sm:$0xff]   ;;  %v8407_v32 = vld [vmem:[%s8768_s17 + $0x208] ss:$36 sps:$4 sm:$0xff]  }
 0x232   : > { %4095 = vmatprep.subr.bf16.mxu0 %v8331_v33  ;;  %4177 = vmatprep.subr.bf16.mxu1 %v8334_v34  ;;  %v8410_v33 = vld [vmem:[%s8768_s17 + $0x210] ss:$36 sps:$4 sm:$0xff]  }
 0x233   : > { %v8415_v34 = vld [vmem:[%s8768_s17 + $0x254] ss:$36 sps:$4 sm:$0xff]  }
 0x235   : > { %4096 = vmatpush1.bf16.msra.mxu0 %v8329_v36  ;;  %4178 = vmatpush1.bf16.msra.mxu1 %v8332_v39  ;;  %v8418_v36 = vld [vmem:[%s8768_s17 + $0x25c] ss:$36 sps:$4 sm:$0xff]   ;;  %v8413_v39 = vld [vmem:[%s8768_s17 + $0x250] ss:$36 sps:$4 sm:$0xff]  }
 0x236   : > { %4097 = vmatprep.subr.bf16.mxu0 %v8337_v40  ;;  %4179 = vmatprep.subr.bf16.mxu1 %v8340_v41  ;;  %v8416_v40 = vld [vmem:[%s8768_s17 + $0x258] ss:$36 sps:$4 sm:$0xff]  }
 0x237   : > { %v8421_v41 = vld [vmem:[%s8768_s17 + $0x29c] ss:$36 sps:$4 sm:$0xff]  }
 0x239   : > { %4098 = vmatpush1.bf16.msra.mxu0 %v8335_v44  ;;  %4180 = vmatpush1.bf16.msra.mxu1 %v8338_v45  ;;  %v8424_v44 = vld [vmem:[%s8768_s17 + $0x2a4] ss:$36 sps:$4 sm:$0xff]   ;;  %v8419_v45 = vld [vmem:[%s8768_s17 + $0x298] ss:$36 sps:$4 sm:$0xff]  }
 0x23a   : > { %4099 = vmatprep.subr.bf16.mxu0 %v8343_v46  ;;  %4181 = vmatprep.subr.bf16.mxu1 %v8346_v47  ;;  %v8422_v46 = vld [vmem:[%s8768_s17 + $0x2a0] ss:$36 sps:$4 sm:$0xff]  }
 0x23b   : > { %v8427_v47 = vld [vmem:[%s8768_s17 + $0x2e4] ss:$36 sps:$4 sm:$0xff]  }
 0x23d   : > { %4100 = vmatpush1.bf16.msra.mxu0 %v8341_v5  ;;  %4182 = vmatpush1.bf16.msra.mxu1 %v8344_v48  ;;  %v8430_v5 = vld [vmem:[%s8768_s17 + $0x2ec] ss:$36 sps:$4 sm:$0xff]   ;;  %v8425_v48 = vld [vmem:[%s8768_s17 + $0x2e0] ss:$36 sps:$4 sm:$0xff]  }
 0x23e   : > { %4101 = vmatprep.subr.bf16.mxu0 %v8349_v49  ;;  %4183 = vmatprep.subr.bf16.mxu1 %v8352_v50  ;;  %v8428_v49 = vld [vmem:[%s8768_s17 + $0x2e8] ss:$36 sps:$4 sm:$0xff]  }
 0x23f   : > { %v8433_v50 = vld [vmem:[%s8768_s17 + $0x32c] ss:$36 sps:$4 sm:$0xff]  }
 0x241   : > { %4102 = vmatpush1.bf16.msra.mxu0 %v8347_v31  ;;  %4184 = vmatpush1.bf16.msra.mxu1 %v8350_v27  ;;  %v8436_v31 = vld [vmem:[%s8768_s17 + $0x334] ss:$36 sps:$4 sm:$0xff]   ;;  %v8431_v27 = vld [vmem:[%s8768_s17 + $0x328] ss:$36 sps:$4 sm:$0xff]  }
 0x242   : > { %4103 = vmatprep.subr.bf16.mxu0 %v8355_v52  ;;  %4185 = vmatprep.subr.bf16.mxu1 %v8358_v54  ;;  %v8434_v52 = vld [vmem:[%s8768_s17 + $0x330] ss:$36 sps:$4 sm:$0xff]  }
 0x243   : > { %v8439_v54 = vld [vmem:[%s8768_s17 + $0x374] ss:$36 sps:$4 sm:$0xff]  }
 0x245   : > { %4104 = vmatpush1.bf16.msra.mxu0 %v8353_v55  ;;  %4186 = vmatpush1.bf16.msra.mxu1 %v8356_v35  ;;  %v8442_v55 = vld [vmem:[%s8768_s17 + $0x37c] ss:$36 sps:$4 sm:$0xff]   ;;  %v8437_v35 = vld [vmem:[%s8768_s17 + $0x370] ss:$36 sps:$4 sm:$0xff]  }
 0x246   : > { %4105 = vmatprep.subr.bf16.mxu0 %v8361_v59  ;;  %4187 = vmatprep.subr.bf16.mxu1 %v8364_v57  ;;  %v8440_v59 = vld [vmem:[%s8768_s17 + $0x378] ss:$36 sps:$4 sm:$0xff]  }
 0x247   : > { %v8445_v57 = vld [vmem:[%s8768_s17 + $0x3bc] ss:$36 sps:$4 sm:$0xff]  }
 0x249   : > { %4106 = vmatpush1.bf16.msra.mxu0 %v8359_v58  ;;  %4188 = vmatpush1.bf16.msra.mxu1 %v8362_v60  ;;  %v8448_v58 = vld [vmem:[%s8768_s17 + $0x3c4] ss:$36 sps:$4 sm:$0xff]   ;;  %v8443_v60 = vld [vmem:[%s8768_s17 + $0x3b8] ss:$36 sps:$4 sm:$0xff]  }
 0x24a   : > { %4198 = vmatprep.subr.bf16.mxu0 %v8367_v63  ;;  %4280 = vmatprep.subr.bf16.mxu1 %v8370_v61  ;;  %v8446_v63 = vld [vmem:[%s8768_s17 + $0x3c0] ss:$36 sps:$4 sm:$0xff]  }
 0x24b   : > { %v8451_v61 = vld [vmem:[%s8768_s17 + $0x404] ss:$36 sps:$4 sm:$0xff]  }
 0x24c   : > { %4108 = vmatmul.mubr.bf16.vlgmr.msra.gmra.mrb[128].mxu0 %v9668_v0  ;;  %4190 = vmatmul.mubr.bf16.vlgmr.msra.gmra.mrb[128].mxu1 %v9668_v0 }
 0x24d   : > { %4199 = vmatpush1.bf16.msra.mxu0 %v8365_v62  ;;  %4230 = vmatprep.mubr.bf16.mxu0 %v9589_v53  ;;  %v8454_v62 = vld [vmem:[%s8768_s17 + $0x40c] ss:$36 sps:$4 sm:$0xff]  }
 0x24e   : > { %4281 = vmatpush1.bf16.msra.mxu1 %v8368_v1  ;;  %4312 = vmatprep.mubr.bf16.mxu1 %v9589_v53  ;;  %v8449_v1 = vld [vmem:[%s8768_s17 + $0x400] ss:$36 sps:$4 sm:$0xff]  }
 0x24f   : > { %4200 = vmatprep.subr.bf16.mxu0 %v8373_v2  ;;  %4282 = vmatprep.subr.bf16.mxu1 %v8376_v3  ;;  %v8452_v2 = vld [vmem:[%s8768_s17 + $0x408] ss:$36 sps:$4 sm:$0xff]  }
 0x250   : > { %v8457_v3 = vld [vmem:[%s8768_s17 + $0x44c] ss:$36 sps:$4 sm:$0xff]  }
 0x251   : > { %4201 = vmatpush1.bf16.msra.mxu0 %v8371_v4  ;;  %v8460_v4 = vld [vmem:[%s8768_s17 + $0x454] ss:$36 sps:$4 sm:$0xff]  }
 0x252   : > { %4283 = vmatpush1.bf16.msra.mxu1 %v8374_v51  ;;  %4202 = vmatprep.subr.bf16.mxu0 %v8379_v6  ;;  %v8455_v51 = vld [vmem:[%s8768_s17 + $0x448] ss:$36 sps:$4 sm:$0xff]   ;;  %v8458_v6 = vld [vmem:[%s8768_s17 + $0x450] ss:$36 sps:$4 sm:$0xff]  }
 0x253   : > { %4284 = vmatprep.subr.bf16.mxu1 %v8382_v7  ;;  %v8463_v7 = vld [vmem:[%s8768_s17 + $0x494] ss:$36 sps:$4 sm:$0xff]  }
 0x255   : > { %4203 = vmatpush1.bf16.msra.mxu0 %v8377_v8  ;;  %v8466_v8 = vld [vmem:[%s8768_s17 + $0x49c] ss:$36 sps:$4 sm:$0xff]  }
 0x256   : > { %4285 = vmatpush1.bf16.msra.mxu1 %v8380_v37  ;;  %4204 = vmatprep.subr.bf16.mxu0 %v8385_v9  ;;  %v8461_v37 = vld [vmem:[%s8768_s17 + $0x490] ss:$36 sps:$4 sm:$0xff]   ;;  %v8464_v9 = vld [vmem:[%s8768_s17 + $0x498] ss:$36 sps:$4 sm:$0xff]  }
 0x257   : > { %4286 = vmatprep.subr.bf16.mxu1 %v8388_v38  ;;  %v8469_v38 = vld [vmem:[%s8768_s17 + $0x4dc] ss:$36 sps:$4 sm:$0xff]  }
 0x259   : > { %4205 = vmatpush1.bf16.msra.mxu0 %v8383_v10  ;;  %v8472_v10 = vld [vmem:[%s8768_s17 + $0x4e4] ss:$36 sps:$4 sm:$0xff]  }
 0x25a   : > { %4287 = vmatpush1.bf16.msra.mxu1 %v8386_v42  ;;  %4206 = vmatprep.subr.bf16.mxu0 %v8391_v11  ;;  %v8467_v42 = vld [vmem:[%s8768_s17 + $0x4d8] ss:$36 sps:$4 sm:$0xff]   ;;  %v8470_v11 = vld [vmem:[%s8768_s17 + $0x4e0] ss:$36 sps:$4 sm:$0xff]  }
 0x25b   : > { %4288 = vmatprep.subr.bf16.mxu1 %v8394_v43  ;;  %v8475_v43 = vld [vmem:[%s8768_s17 + $0x524] ss:$36 sps:$4 sm:$0xff]  }
 0x25d   : > { %4207 = vmatpush1.bf16.msra.mxu0 %v8389_v12  ;;  %v8478_v12 = vld [vmem:[%s8768_s17 + $0x52c] ss:$36 sps:$4 sm:$0xff]  }
 0x25e   : > { %4289 = vmatpush1.bf16.msra.mxu1 %v8392_v13  ;;  %4208 = vmatprep.subr.bf16.mxu0 %v8397_v14  ;;  %v8473_v13 = vld [vmem:[%s8768_s17 + $0x520] ss:$36 sps:$4 sm:$0xff]   ;;  %v8476_v14 = vld [vmem:[%s8768_s17 + $0x528] ss:$36 sps:$4 sm:$0xff]  }
 0x25f   : > { %4290 = vmatprep.subr.bf16.mxu1 %v8400_v15  ;;  %v8481_v15 = vld [vmem:[%s8768_s17 + $0x56c] ss:$36 sps:$4 sm:$0xff]  }
 0x261   : > { %4209 = vmatpush1.bf16.msra.mxu0 %v8395_v16  ;;  %v8484_v16 = vld [vmem:[%s8768_s17 + $0x574] ss:$36 sps:$4 sm:$0xff]  }
 0x262   : > { %4291 = vmatpush1.bf16.msra.mxu1 %v8398_v17  ;;  %4210 = vmatprep.subr.bf16.mxu0 %v8403_v18  ;;  %v8479_v17 = vld [vmem:[%s8768_s17 + $0x568] ss:$36 sps:$4 sm:$0xff]   ;;  %v8482_v18 = vld [vmem:[%s8768_s17 + $0x570] ss:$36 sps:$4 sm:$0xff]  }
 0x263   : > { %4292 = vmatprep.subr.bf16.mxu1 %v8406_v19  ;;  %v8487_v19 = vld [vmem:[%s8768_s17 + $0x5b4] ss:$36 sps:$4 sm:$0xff]  }
 0x265   : > { %4211 = vmatpush1.bf16.msra.mxu0 %v8401_v22  ;;  %v8490_v22 = vld [vmem:[%s8768_s17 + $0x5bc] ss:$36 sps:$4 sm:$0xff]  }
 0x266   : > { %4293 = vmatpush1.bf16.msra.mxu1 %v8404_v25  ;;  %4212 = vmatprep.subr.bf16.mxu0 %v8409_v28  ;;  %v8485_v25 = vld [vmem:[%s8768_s17 + $0x5b0] ss:$36 sps:$4 sm:$0xff]   ;;  %v8488_v28 = vld [vmem:[%s8768_s17 + $0x5b8] ss:$36 sps:$4 sm:$0xff]  }
 0x267   : > { %4294 = vmatprep.subr.bf16.mxu1 %v8412_v30  ;;  %v8493_v30 = vld [vmem:[%s8768_s17 + $0x5fc] ss:$36 sps:$4 sm:$0xff]  }
 0x269   : > { %4213 = vmatpush1.bf16.msra.mxu0 %v8407_v32  ;;  %v8496_v32 = vld [vmem:[%s8768_s17 + $0x604] ss:$36 sps:$4 sm:$0xff]  }
 0x26a   : > { %4295 = vmatpush1.bf16.msra.mxu1 %v8410_v33  ;;  %4214 = vmatprep.subr.bf16.mxu0 %v8415_v34  ;;  %v8491_v33 = vld [vmem:[%s8768_s17 + $0x5f8] ss:$36 sps:$4 sm:$0xff]   ;;  %v8494_v34 = vld [vmem:[%s8768_s17 + $0x600] ss:$36 sps:$4 sm:$0xff]  }
 0x26b   : > { %4296 = vmatprep.subr.bf16.mxu1 %v8418_v36  ;;  %v8499_v36 = vld [vmem:[%s8768_s17 + $0x644] ss:$36 sps:$4 sm:$0xff]  }
 0x26d   : > { %4215 = vmatpush1.bf16.msra.mxu0 %v8413_v39  ;;  %v8502_v39 = vld [vmem:[%s8768_s17 + $0x64c] ss:$36 sps:$4 sm:$0xff]  }
 0x26e   : > { %4297 = vmatpush1.bf16.msra.mxu1 %v8416_v40  ;;  %4216 = vmatprep.subr.bf16.mxu0 %v8421_v41  ;;  %v8497_v40 = vld [vmem:[%s8768_s17 + $0x640] ss:$36 sps:$4 sm:$0xff]   ;;  %v8500_v41 = vld [vmem:[%s8768_s17 + $0x648] ss:$36 sps:$4 sm:$0xff]  }
 0x26f   : > { %4298 = vmatprep.subr.bf16.mxu1 %v8424_v44  ;;  %v8505_v44 = vld [vmem:[%s8768_s17 + $0x68c] ss:$36 sps:$4 sm:$0xff]  }
 0x271   : > { %4217 = vmatpush1.bf16.msra.mxu0 %v8419_v45  ;;  %v8508_v45 = vld [vmem:[%s8768_s17 + $0x694] ss:$36 sps:$4 sm:$0xff]  }
 0x272   : > { %4299 = vmatpush1.bf16.msra.mxu1 %v8422_v46  ;;  %4218 = vmatprep.subr.bf16.mxu0 %v8427_v47  ;;  %v8503_v46 = vld [vmem:[%s8768_s17 + $0x688] ss:$36 sps:$4 sm:$0xff]   ;;  %v8506_v47 = vld [vmem:[%s8768_s17 + $0x690] ss:$36 sps:$4 sm:$0xff]  }
 0x273   : > { %4300 = vmatprep.subr.bf16.mxu1 %v8430_v5  ;;  %v8511_v5 = vld [vmem:[%s8768_s17 + $0x6d4] ss:$36 sps:$4 sm:$0xff]  }
 0x275   : > { %4219 = vmatpush1.bf16.msra.mxu0 %v8425_v48  ;;  %v8514_v48 = vld [vmem:[%s8768_s17 + $0x6dc] ss:$36 sps:$4 sm:$0xff]  }
 0x276   : > { %4301 = vmatpush1.bf16.msra.mxu1 %v8428_v49  ;;  %4220 = vmatprep.subr.bf16.mxu0 %v8433_v50  ;;  %v8509_v49 = vld [vmem:[%s8768_s17 + $0x6d0] ss:$36 sps:$4 sm:$0xff]   ;;  %v8512_v50 = vld [vmem:[%s8768_s17 + $0x6d8] ss:$36 sps:$4 sm:$0xff]  }
 0x277   : > { %4302 = vmatprep.subr.bf16.mxu1 %v8436_v31  ;;  %v8517_v31 = vld [vmem:[%s8768_s17 + $0x71c] ss:$36 sps:$4 sm:$0xff]  }
 0x279   : > { %4221 = vmatpush1.bf16.msra.mxu0 %v8431_v27  ;;  %v8520_v27 = vld [vmem:[%s8768_s17 + $0x724] ss:$36 sps:$4 sm:$0xff]  }
 0x27a   : > { %4303 = vmatpush1.bf16.msra.mxu1 %v8434_v52  ;;  %4222 = vmatprep.subr.bf16.mxu0 %v8439_v54  ;;  %v8515_v52 = vld [vmem:[%s8768_s17 + $0x718] ss:$36 sps:$4 sm:$0xff]   ;;  %v8518_v54 = vld [vmem:[%s8768_s17 + $0x720] ss:$36 sps:$4 sm:$0xff]  }
 0x27b   : > { %4304 = vmatprep.subr.bf16.mxu1 %v8442_v55  ;;  %v8523_v55 = vld [vmem:[%s8768_s17 + $0x764] ss:$36 sps:$4 sm:$0xff]  }
 0x27d   : > { %4223 = vmatpush1.bf16.msra.mxu0 %v8437_v35  ;;  %v8526_v35 = vld [vmem:[%s8768_s17 + $0x76c] ss:$36 sps:$4 sm:$0xff]  }
 0x27e   : > { %4305 = vmatpush1.bf16.msra.mxu1 %v8440_v59  ;;  %4224 = vmatprep.subr.bf16.mxu0 %v8445_v57  ;;  %v8521_v59 = vld [vmem:[%s8768_s17 + $0x760] ss:$36 sps:$4 sm:$0xff]   ;;  %v8524_v57 = vld [vmem:[%s8768_s17 + $0x768] ss:$36 sps:$4 sm:$0xff]  }
 0x27f   : > { %4306 = vmatprep.subr.bf16.mxu1 %v8448_v58  ;;  %v8529_v58 = vld [vmem:[%s8768_s17 + $0x7ac] ss:$36 sps:$4 sm:$0xff]  }
 0x281   : > { %4225 = vmatpush1.bf16.msra.mxu0 %v8443_v60  ;;  %v8532_v60 = vld [vmem:[%s8768_s17 + $0x7b4] ss:$36 sps:$4 sm:$0xff]  }
 0x282   : > { %4307 = vmatpush1.bf16.msra.mxu1 %v8446_v63  ;;  %4226 = vmatprep.subr.bf16.mxu0 %v8451_v61  ;;  %v8527_v63 = vld [vmem:[%s8768_s17 + $0x7a8] ss:$36 sps:$4 sm:$0xff]   ;;  %v8530_v61 = vld [vmem:[%s8768_s17 + $0x7b0] ss:$36 sps:$4 sm:$0xff]  }
 0x283   : > { %4308 = vmatprep.subr.bf16.mxu1 %v8454_v62  ;;  %v8535_v62 = vld [vmem:[%s8768_s17 + $0x7f4] ss:$36 sps:$4 sm:$0xff]  }
 0x285   : > { %4227 = vmatpush1.bf16.msra.mxu0 %v8449_v1  ;;  %v8538_v1 = vld [vmem:[%s8768_s17 + $0x7fc] ss:$36 sps:$4 sm:$0xff]  }
 0x286   : > { %4309 = vmatpush1.bf16.msra.mxu1 %v8452_v2  ;;  %4228 = vmatprep.subr.bf16.mxu0 %v8457_v3  ;;  %v8533_v2 = vld [vmem:[%s8768_s17 + $0x7f0] ss:$36 sps:$4 sm:$0xff]   ;;  %v8536_v3 = vld [vmem:[%s8768_s17 + $0x7f8] ss:$36 sps:$4 sm:$0xff]  }
 0x287   : > { %4310 = vmatprep.subr.bf16.mxu1 %v8460_v4  ;;  %v8541_v4 = vld [vmem:[%s8768_s17 + $0x83c] ss:$36 sps:$4 sm:$0xff]  }
 0x289   : > { %4229 = vmatpush1.bf16.msra.mxu0 %v8455_v51  ;;  %v8544_v51 = vld [vmem:[%s8768_s17 + $0x844] ss:$36 sps:$4 sm:$0xff]  }
 0x28a   : > { %4311 = vmatpush1.bf16.msra.mxu1 %v8458_v6  ;;  %4239 = vmatprep.subr.bf16.mxu0 %v8463_v7  ;;  %v8539_v6 = vld [vmem:[%s8768_s17 + $0x838] ss:$36 sps:$4 sm:$0xff]   ;;  %v8542_v7 = vld [vmem:[%s8768_s17 + $0x840] ss:$36 sps:$4 sm:$0xff]  }
 0x28b   : > { %4321 = vmatprep.subr.bf16.mxu1 %v8466_v8  ;;  %v8547_v8 = vld [vmem:[%s8768_s17 + $0x884] ss:$36 sps:$4 sm:$0xff]  }
 0x28c   : > { %4231 = vmatmul.mubr.bf16.vlgmr.msra.gmra.mrb[132].mxu0 %v9593_v56 }
 0x28d   : > { %4313 = vmatmul.mubr.bf16.vlgmr.msra.gmra.mrb[132].mxu1 %v9593_v56  ;;  %4240 = vmatpush1.bf16.msra.mxu0 %v8461_v37  ;;  %v8550_v37 = vld [vmem:[%s8768_s17 + $0x88c] ss:$36 sps:$4 sm:$0xff]  }
 0x28e   : > { %4271 = vmatprep.mubr.bf16.mxu0 %v9601_v29  ;;  %4322 = vmatpush1.bf16.msra.mxu1 %v8464_v9  ;;  %v8545_v9 = vld [vmem:[%s8768_s17 + $0x880] ss:$36 sps:$4 sm:$0xff]  }
 0x28f   : > { %4353 = vmatprep.mubr.bf16.mxu1 %v9601_v29  ;;  %4241 = vmatprep.subr.bf16.mxu0 %v8469_v38  ;;  %v8548_v38 = vld [vmem:[%s8768_s17 + $0x888] ss:$36 sps:$4 sm:$0xff]  }
 0x290   : > { %4323 = vmatprep.subr.bf16.mxu1 %v8472_v10  ;;  %v8553_v10 = vld [vmem:[%s8768_s17 + $0x8cc] ss:$36 sps:$4 sm:$0xff]  }
 0x291   : > { %4242 = vmatpush1.bf16.msra.mxu0 %v8467_v42  ;;  %v8556_v42 = vld [vmem:[%s8768_s17 + $0x8d4] ss:$36 sps:$4 sm:$0xff]  }
 0x292   : > { %4324 = vmatpush1.bf16.msra.mxu1 %v8470_v11  ;;  %4243 = vmatprep.subr.bf16.mxu0 %v8475_v43  ;;  %v8551_v11 = vld [vmem:[%s8768_s17 + $0x8c8] ss:$36 sps:$4 sm:$0xff]   ;;  %v8554_v43 = vld [vmem:[%s8768_s17 + $0x8d0] ss:$36 sps:$4 sm:$0xff]  }
 0x293   : > { %4325 = vmatprep.subr.bf16.mxu1 %v8478_v12  ;;  %v8557_v12 = vld [vmem:[%s8768_s17 + $0x260] ss:$36 sps:$4 sm:$0xff]  }
 0x295   : > { %4244 = vmatpush1.bf16.msra.mxu0 %v8473_v13  ;;  %v8558_v13 = vld [vmem:[%s8768_s17 + $0x6e0] ss:$36 sps:$4 sm:$0xff]  }
 0x296   : > { %4326 = vmatpush1.bf16.msra.mxu1 %v8476_v14  ;;  %4245 = vmatprep.subr.bf16.mxu0 %v8481_v15  ;;  %v8559_v14 = vld [vmem:[%s8768_s17 + $0x20] ss:$36 sps:$4 sm:$0xff]  }
 0x297   : > { %4327 = vmatprep.subr.bf16.mxu1 %v8484_v16  ;;  %v8560_v15 = vld [vmem:[%s8768_s17 + $0x4a0] ss:$36 sps:$4 sm:$0xff]   ;;  %v8561_v16 = vld [vmem:[%s8768_s17 + $0x2a8] ss:$36 sps:$4 sm:$0xff]  }
 0x299   : > { %4246 = vmatpush1.bf16.msra.mxu0 %v8479_v17  ;;  %v8562_v17 = vld [vmem:[%s8768_s17 + $0x728] ss:$36 sps:$4 sm:$0xff]  }
 0x29a   : > { %4328 = vmatpush1.bf16.msra.mxu1 %v8482_v18  ;;  %4247 = vmatprep.subr.bf16.mxu0 %v8487_v19  ;;  %v8563_v18 = vld [vmem:[%s8768_s17 + $0x68] ss:$36 sps:$4 sm:$0xff]  }
 0x29b   : > { %4329 = vmatprep.subr.bf16.mxu1 %v8490_v22  ;;  %v8564_v19 = vld [vmem:[%s8768_s17 + $0x4e8] ss:$36 sps:$4 sm:$0xff]   ;;  %v8565_v22 = vld [vmem:[%s8768_s17 + $0x2f0] ss:$36 sps:$4 sm:$0xff]  }
 0x29d   : > { %4248 = vmatpush1.bf16.msra.mxu0 %v8485_v25  ;;  %v8566_v25 = vld [vmem:[%s8768_s17 + $0x770] ss:$36 sps:$4 sm:$0xff]  }
 0x29e   : > { %4330 = vmatpush1.bf16.msra.mxu1 %v8488_v28  ;;  %4249 = vmatprep.subr.bf16.mxu0 %v8493_v30  ;;  %v8567_v28 = vld [vmem:[%s8768_s17 + $0xb0] ss:$36 sps:$4 sm:$0xff]  }
 0x29f   : > { %4331 = vmatprep.subr.bf16.mxu1 %v8496_v32  ;;  %v8568_v30 = vld [vmem:[%s8768_s17 + $0x530] ss:$36 sps:$4 sm:$0xff]   ;;  %v8570_v32 = vld [vmem:[%s8768_s17 + $0x7b8] ss:$36 sps:$4 sm:$0xff]  }
 0x2a1   : > { %4250 = vmatpush1.bf16.msra.mxu0 %v8491_v33  ;;  %v8572_v33 = vld [vmem:[%s8768_s17 + $0x578] ss:$36 sps:$4 sm:$0xff]  }
 0x2a2   : > { %4332 = vmatpush1.bf16.msra.mxu1 %v8494_v34  ;;  %4251 = vmatprep.subr.bf16.mxu0 %v8499_v36  ;;  %v8573_v34 = vld [vmem:[%s8768_s17 + $0x380] ss:$36 sps:$4 sm:$0xff]  }
 0x2a3   : > { %4333 = vmatprep.subr.bf16.mxu1 %v8502_v39  ;;  %v8574_v36 = vld [vmem:[%s8768_s17 + $0x800] ss:$36 sps:$4 sm:$0xff]  }
 0x2a4   : > { %v8575_v39 = vld [vmem:[%s8768_s17 + $0x140] ss:$36 sps:$4 sm:$0xff]  }
 0x2a5   : > { %4252 = vmatpush1.bf16.msra.mxu0 %v8497_v40  ;;  %v8576_v40 = vld [vmem:[%s8768_s17 + $0x5c0] ss:$36 sps:$4 sm:$0xff]  }
 0x2a6   : > { %4334 = vmatpush1.bf16.msra.mxu1 %v8500_v41  ;;  %4253 = vmatprep.subr.bf16.mxu0 %v8505_v44  ;;  %v8577_v41 = vld [vmem:[%s8768_s17 + $0x3c8] ss:$36 sps:$4 sm:$0xff]  }
 0x2a7   : > { %4335 = vmatprep.subr.bf16.mxu1 %v8508_v45  ;;  %v8578_v44 = vld [vmem:[%s8768_s17 + $0x848] ss:$36 sps:$4 sm:$0xff]  }
 0x2a8   : > { %v8579_v45 = vld [vmem:[%s8768_s17 + $0x188] ss:$36 sps:$4 sm:$0xff]  }
 0x2a9   : > { %4254 = vmatpush1.bf16.msra.mxu0 %v8503_v46  ;;  %v8580_v46 = vld [vmem:[%s8768_s17 + $0x608] ss:$36 sps:$4 sm:$0xff]  }
 0x2aa   : > { %4336 = vmatpush1.bf16.msra.mxu1 %v8506_v47  ;;  %4255 = vmatprep.subr.bf16.mxu0 %v8511_v5  ;;  %v8581_v47 = vld [vmem:[%s8768_s17 + $0x410] ss:$36 sps:$4 sm:$0xff]  }
 0x2ab   : > { %4337 = vmatprep.subr.bf16.mxu1 %v8514_v48  ;;  %v8582_v5 = vld [vmem:[%s8768_s17 + $0x890] ss:$36 sps:$4 sm:$0xff]  }
 0x2ac   : > { %v8583_v48 = vld [vmem:[%s8768_s17 + $0x1d0] ss:$36 sps:$4 sm:$0xff]  }
 0x2ad   : > { %4256 = vmatpush1.bf16.msra.mxu0 %v8509_v49  ;;  %v8584_v49 = vld [vmem:[%s8768_s17 + $0x650] ss:$36 sps:$4 sm:$0xff]  }
 0x2ae   : > { %4338 = vmatpush1.bf16.msra.mxu1 %v8512_v50  ;;  %4257 = vmatprep.subr.bf16.mxu0 %v8517_v31  ;;  %v8585_v50 = vld [vmem:[%s8768_s17 + $0x458] ss:$36 sps:$4 sm:$0xff]  }
 0x2af   : > { %4339 = vmatprep.subr.bf16.mxu1 %v8520_v27  ;;  %v8586_v31 = vld [vmem:[%s8768_s17 + $0x8d8] ss:$36 sps:$4 sm:$0xff]  }
 0x2b0   : > { %v8587_v27 = vld [vmem:[%s8768_s17 + $0x218] ss:$36 sps:$4 sm:$0xff]  }
 0x2b1   : > { %4258 = vmatpush1.bf16.msra.mxu0 %v8515_v52  ;;  %v8588_v52 = vld [vmem:[%s8768_s17 + $0x698] ss:$36 sps:$4 sm:$0xff]  }
 0x2b2   : > { %4340 = vmatpush1.bf16.msra.mxu1 %v8518_v54  ;;  %4259 = vmatprep.subr.bf16.mxu0 %v8523_v55  ;;  %v8668_v54 = vmov 1983009808  }
 0x2b3   : > { %4341 = vmatprep.subr.bf16.mxu1 %v8526_v35  ;;  %v4454_v55 = vunpack.c.l.s4 %v8668_v54 }
 0x2b5   : > { %4260 = vmatpush1.bf16.msra.mxu0 %v8521_v59  ;;  %v4455_v35 = vunpack.c.0.s8 %v4454_v55 }
 0x2b6   : > { %4342 = vmatpush1.bf16.msra.mxu1 %v8524_v57  ;;  %4261 = vmatprep.subr.bf16.mxu0 %v8529_v58 }
 0x2b7   : > { %4343 = vmatprep.subr.bf16.mxu1 %v8532_v60  ;;  %v9842_v58 = vsub.s32 %v4455_v35, %v9157_v20 }
 0x2b9   : > { %4262 = vmatpush1.bf16.msra.mxu0 %v8527_v63 }
 0x2ba   : > { %4344 = vmatpush1.bf16.msra.mxu1 %v8530_v61  ;;  %4263 = vmatprep.subr.bf16.mxu0 %v8535_v62 }
 0x2bb   : > { %4345 = vmatprep.subr.bf16.mxu1 %v8538_v1 }
 0x2bd   : > { %4264 = vmatpush1.bf16.msra.mxu0 %v8533_v2 }
 0x2be   : > { %4346 = vmatpush1.bf16.msra.mxu1 %v8536_v3  ;;  %4265 = vmatprep.subr.bf16.mxu0 %v8541_v4 }
 0x2bf   : > { %4347 = vmatprep.subr.bf16.mxu1 %v8544_v51  ;;  %v2202_v51 = vld [vmem:[#allocation2] sm:$0xff] }
 0x2c1   : > { %4266 = vmatpush1.bf16.msra.mxu0 %v8539_v6 }
 0x2c2   : > { %4348 = vmatpush1.bf16.msra.mxu1 %v8542_v7  ;;  %4267 = vmatprep.subr.bf16.mxu0 %v8547_v8 }
 0x2c3   : > { %4349 = vmatprep.subr.bf16.mxu1 %v8550_v37 }
 0x2c5   : > { %4268 = vmatpush1.bf16.msra.mxu0 %v8545_v9 }
 0x2c6   : > { %4350 = vmatpush1.bf16.msra.mxu1 %v8548_v38  ;;  %4269 = vmatprep.subr.bf16.mxu0 %v8553_v10 }
 0x2c7   : > { %4351 = vmatprep.subr.bf16.mxu1 %v8556_v42 }
 0x2c9   : > { %4270 = vmatpush1.bf16.msra.mxu0 %v8551_v11 }
 0x2ca   : > { %4352 = vmatpush1.bf16.msra.mxu1 %v8554_v43  ;;  %7333 = vmatprep.subr.bf16.mxu0 %v8557_v12 }
 0x2cb   : > { %7355 = vmatprep.subr.bf16.mxu1 %v8558_v13 }
 0x2cc   : > { %4272 = vmatmul.mubr.bf16.vlgmr.msra.gmra.mrb[132].mxu0 %v9668_v0 }
 0x2cd   : > { %4354 = vmatmul.mubr.bf16.vlgmr.msra.gmra.mrb[132].mxu1 %v9668_v0  ;;  %7334 = vmatpush3.bf16.msra.mxu0 %v8559_v14 }
 0x2ce   : > { %4394 = vmatprep.mubr.bf16.mxu0 %v9589_v53  ;;  %7356 = vmatpush3.bf16.msra.mxu1 %v8560_v15  ;;  %v8569_v53 = vld [vmem:[%s8768_s17 + $0x338] ss:$36 sps:$4 sm:$0xff]  }
 0x2cf   : > { %4434 = vmatprep.mubr.bf16.mxu1 %v9601_v29  ;;  %7335 = vmatprep.subr.bf16.mxu0 %v8561_v16  ;;  %v8571_v29 = vld [vmem:[%s8768_s17 + $0xf8] ss:$36 sps:$4 sm:$0xff]   ;;  %v2203_v16 = vld [vmem:[#allocation2 + $0x8] sm:$0xff] }
 0x2d0   : > { %7357 = vmatprep.subr.bf16.mxu1 %v8562_v17 }
 0x2d1   : > { %7336 = vmatpush3.bf16.msra.mxu0 %v8563_v18 }
 0x2d2   : > { %7358 = vmatpush3.bf16.msra.mxu1 %v8564_v19  ;;  %7337 = vmatprep.subr.bf16.mxu0 %v8565_v22 }
 0x2d3   : > { %7359 = vmatprep.subr.bf16.mxu1 %v8566_v25 }
 0x2d5   : > { %7338 = vmatpush3.bf16.msra.mxu0 %v8567_v28 }
 0x2d6   : > { %7360 = vmatpush3.bf16.msra.mxu1 %v8568_v30  ;;  %7339 = vmatprep.subr.bf16.mxu0 %v8569_v53 }
 0x2d7   : > { %7361 = vmatprep.subr.bf16.mxu1 %v8570_v32 }
 0x2d9   : > { %7340 = vmatpush3.bf16.msra.mxu0 %v8571_v29 }
 0x2da   : > { %7362 = vmatpush3.bf16.msra.mxu1 %v8572_v33  ;;  %7341 = vmatprep.subr.bf16.mxu0 %v8573_v34 }
 0x2db   : > { %7363 = vmatprep.subr.bf16.mxu1 %v8574_v36 }
 0x2dd   : > { %7342 = vmatpush3.bf16.msra.mxu0 %v8575_v39  ;;  %v2204_v39 = vld [vmem:[#allocation2 + $0x10] sm:$0x3] }
 0x2de   : > { %7364 = vmatpush3.bf16.msra.mxu1 %v8576_v40  ;;  %7343 = vmatprep.subr.bf16.mxu0 %v8577_v41 }
 0x2df   : > { %7365 = vmatprep.subr.bf16.mxu1 %v8578_v44 }
 0x2e1   : > { %7344 = vmatpush3.bf16.msra.mxu0 %v8579_v45 }
 0x2e2   : > { %7366 = vmatpush3.bf16.msra.mxu1 %v8580_v46  ;;  %7345 = vmatprep.subr.bf16.mxu0 %v8581_v47 }
 0x2e3   : > { %7367 = vmatprep.subr.bf16.mxu1 %v8582_v5 }
 0x2e5   : > { %7346 = vmatpush3.bf16.msra.mxu0 %v8583_v48 }
 0x2e6   : > { %7368 = vmatpush3.bf16.msra.mxu1 %v8584_v49  ;;  %7347 = vmatprep.subr.bf16.mxu0 %v8585_v50 }
 0x2e7   : > { %7369 = vmatprep.subr.bf16.mxu1 %v8586_v31 }
 0x2e9   : > { %7348 = vmatpush3.bf16.msra.mxu0 %v8587_v27 }
 0x2ea   : > { %7370 = vmatpush3.bf16.msra.mxu1 %v8588_v52 }
 0x2ec   : > { %4395 = vmatmul.mubr.bf16.vlgmr.msra.gmra.mrb[136].mxu0 %v9593_v56 }
 0x2ed   : > { %4435 = vmatmul.mubr.bf16.vlgmr.msra.gmra.mrb[136].mxu1 %v9668_v0 }
 0x31f   : > { %v4109_v59 = vpop.f32.mrb[128].mxu0  ;;  %v4191_v57 = vpop.f32.mrb[128].mxu1 }
 0x320   : > { %v4111_v60 = vpop.f32.mrb[129].mxu0  ;;  %v4193_v63 = vpop.f32.mrb[129].mxu1 }
 0x321   : > { %v4451_v61 = vcombine.low %v4109_v59, %v4111_v60  ;;  %v4452_v62 = vcombine.low %v4191_v57, %v4193_v63  ;;  %v4113_v1 = vpop.f32.mrb[130].mxu0  ;;  %v4195_v2 = vpop.f32.mrb[130].mxu1 }
 0x322   : > { %v4114_v3 = vpop.f32.mrb[131].mxu0  ;;  %v4196_v4 = vpop.f32.mrb[131].mxu1 }
 0x323   : > { %v4459_v56 = vrot.slane %v4451_v61, %v9842_v58  ;;  %v4466_v0 = vrot.slane %v4452_v62, %v9842_v58 }
 0x325   : > { %v4467_v6 = vcombine.low %v4459_v56, %v4466_v0 }
 0x327   : > { %v4495_v7 = vadd.f32 %v4467_v6, %v2202_v51 }
 0x329   : > { %4498 = vst [vmem:[#allocation2] sm:$0xff] %v4495_v7 }
 0x39f   : > { %v4273_v8 = vpop.f32.mrb[132].mxu0 }
 0x3a0   : > { %v4355_v37 = vpop.f32.mrb[132].mxu1  ;;  %v4275_v9 = vpop.f32.mrb[133].mxu0 }
 0x3a1   : > { %v4468_v38 = vcombine.low %v4273_v8, %v4275_v9  ;;  %v4357_v10 = vpop.f32.mrb[133].mxu1  ;;  %v4277_v42 = vpop.f32.mrb[134].mxu0 }
 0x3a2   : > { %v4469_v11 = vcombine.low %v4355_v37, %v4357_v10  ;;  %v4359_v43 = vpop.f32.mrb[134].mxu1  ;;  %v4278_v12 = vpop.f32.mrb[135].mxu0 }
 0x3a3   : > { %v4476_v13 = vrot.slane %v4468_v38, %v9842_v58  ;;  %v4360_v14 = vpop.f32.mrb[135].mxu1 }
 0x3a4   : > { %v4483_v15 = vrot.slane %v4469_v11, %v9842_v58 }
 0x3a6   : > { %v4484_v17 = vcombine.low %v4476_v13, %v4483_v15 }
 0x3a8   : > { %v4496_v18 = vadd.f32 %v4484_v17, %v2203_v16 }
 0x3aa   : > { %4499 = vst [vmem:[#allocation2 + $0x8] sm:$0xff] %v4496_v18 }
 0x3bf   : > { %v7349_v19 = vpop.f32.mrb[136].mxu0 }
 0x3c0   : > { %v7371_v22 = vpop.f32.mrb[136].mxu1  ;;  %v7350_v25 = vpop.f32.mrb[137].mxu0 }
 0x3c1   : > { %v7351_v28 = vadd.f32 %v7350_v25, %v7349_v19  ;;  %v7372_v30 = vpop.f32.mrb[137].mxu1  ;;  %v7352_v53 = vpop.f32.mrb[138].mxu0 }
 0x3c2   : > { %v7373_v32 = vadd.f32 %v7372_v30, %v7371_v22  ;;  %v7374_v29 = vpop.f32.mrb[138].mxu1  ;;  %v7353_v33 = vpop.f32.mrb[139].mxu0 }
 0x3c3   : > { %v7375_v34 = vpop.f32.mrb[139].mxu1 }
 0x3c4   : > { %v4437_v36 = vadd.f32 %v7373_v32, %v7351_v28  ;;  %4505 = sbr.rel (%p7311_p6) target bundleno = 1752 (0x6d8), region = 68 }
 0x3c6   : > { %v4491_v40 = vrot.slane %v4437_v36, %v9842_v58 }
 0x3c8   : > { %v4497_v41 = vadd.f32 %v4491_v40, %v2204_v39 }
 0x3ca   : > { %4501 = vst.msk [vmem:[#allocation2 + $0x10] sm:$0x3] %vm4500_vm4, %v4497_v41 }
 0x3cb   : > { %v4509_v44 = vld [vmem:[%s11285_s4] sm:$0xff]  ;;  %v4531_v45 = vsub.s32 4, %v9157_v20  ;;  %v4535_v46 = vsub.s32 5, %v9157_v20  ;;  %v7312_v50 = vld [vmem:[%s11285_s4 + $0x8] ss:$0 sm:$0xff]  ;;  %v4539_v54 = vsub.s32 6, %v9157_v20 }
 0x3cc   : > { %v4516_v47 = vrot.slane %v4509_v44, %v9171_v24  ;;  %v4520_v5 = vrot.slane %v4509_v44, %v9179_v26  ;;  %v4524_v48 = vrot.slane %v4509_v44, %v9162_v21  ;;  %v4528_v49 = vrot.slane %v4509_v44, %v531_v23  ;;  %v4611_v31 = vld [vmem:[%s11286_s5] sm:$0xff]  ;;  %v4612_v59 = vld [vmem:[%s11286_s5 + $0x8] sm:$0xff]  ;;  %v4821_v56 = vld [vmem:[%s11289_s8 + $0x18] sm:$0xff]  ;;  %s8672_s30 = smov 16   ;;  %s8673_s20 = smov 80  }
 0x3cd   : > { %v4532_v27 = vrot.slane %v4509_v44, %v4531_v45  ;;  %v4536_v52 = vrot.slane %v4509_v44, %v4535_v46  ;;  %v4543_v55 = vsub.s32 7, %v9157_v20  ;;  %v4589_v60 = vrot.slane %v7312_v50, %v9842_v58  ;;  %v4819_v63 = vld [vmem:[%s11289_s8 + $0x8] sm:$0xff]  ;;  %v4822_v61 = vld [vmem:[%s11289_s8 + $0x20] sm:$0xff]  ;;  %v4825_v7 = vld [vmem:[%s11289_s8 + $0x38] sm:$0xff]  ;;  %s8674_s15 = smov 112   ;;  %s8675_s23 = smov 96  }
 0x3ce   : > { %v4549_v23 = vcombine.low %v4516_v47, %v4520_v5  ;;  %v4550_v57 = vcombine.low %v4524_v48, %v4528_v49  ;;  %v4540_v62 = vrot.slane %v4509_v44, %v4539_v54  ;;  %v11296_v2 = vmov 0.0|0.0   ;;  %v4818_v4 = vld [vmem:[%s11289_s8] sm:$0xff]  ;;  %v4828_v8 = vld [vmem:[%s11289_s8 + $0x50] sm:$0xff]  ;;  %v4827_v14 = vld [vmem:[%s11289_s8 + $0x48] sm:$0xff]  ;;  %s8677_s16 = smov 48  }
 0x3cf   : > { %v4544_v1 = vrot.slane %v4509_v44, %v4543_v55  ;;  %v4566_v20 = vcombine.low %v4532_v27, %v4536_v52  ;;  %7647 = vmatprep.subr.bf16.mxu1 %v11296_v2  ;;  %v7648_v3 = vpack.c.bf16 %v4612_v59, %v4611_v31  ;;  %v4506_v37 = vld [vmem:[#allocation2] sm:$0xff]  ;;  %v9895_v10 = vpack.c.bf16 %v4822_v61, %v4819_v63  ;;  %v4824_v13 = vld [vmem:[%s11289_s8 + $0x30] sm:$0xff]  ;;  %v4831_v17 = vld [vmem:[%s11289_s8 + $0x68] sm:$0xff] }
 0x3d0   : > { %v4557_v0 = vrot.slane %v4549_v23, %v9842_v58  ;;  %v4564_v51 = vrot.slane %v4550_v57, %v9842_v58  ;;  %v4602_v42 = vld [vmem:[%s11288_s7] sm:$0xff]  ;;  %vm8670_vm5 = vmmov 0   ;;  %v11294_v43 = vmov 0.0   ;;  %v4507_v22 = vld [vmem:[#allocation2 + $0x8] sm:$0xff]  ;;  %v4833_v32 = vld [vmem:[%s11289_s8 + $0x78] sm:$0xff] }
 0x3d1   : > { %v4508_v35 = vld [vmem:[#allocation2 + $0x10] sm:$0x3]  ;;  %v4567_v9 = vcombine.low %v4540_v62, %v4544_v1  ;;  %v4574_v38 = vrot.slane %v4566_v20, %v9842_v58  ;;  %7649 = vmatpush3.bf16.msra.mxu1 %v7648_v3  ;;  %7560 = vmatprep.mubr.msk.f32.mxu1 %vm8670_vm5, %v11294_v43  ;;  %vm4620_vm6 = vcmask 130048   ;;  %v9902_v12 = vpack.c.bf16 %v4821_v56, %v4818_v4  ;;  %v4834_v18 = vld [vmem:[%s11289_s8 + $0x80] sm:$0xff]  ;;  %v4837_v33 = vld [vmem:[%s11289_s8 + $0x98] sm:$0xff] }
 0x3d2   : > { %v4595_v6 = vadd.f32 %v4589_v60, %v4508_v35  ;;  %v4565_v11 = vcombine.low %v4557_v0, %v4564_v51  ;;  %7651 = vmatprep.subr.bf16.mxu1 %v9895_v10  ;;  %v9912_v16 = vpack.c.bf16 %v4828_v8, %v4825_v7  ;;  %v9922_v28 = vpack.c.bf16 %v4827_v14, %v4824_v13  ;;  %v4830_v53 = vld [vmem:[%s11289_s8 + $0x60] sm:$0xff]  ;;  %v4840_v34 = vld [vmem:[%s11289_s8 + $0xb0] sm:$0xff]  ;;  %v4871_v40 = vld [vmem:[%s11289_s8 + $0x1a8] sm:$0xff] }
 0x3d3   : > { %v4581_v15 = vrot.slane %v4567_v9, %v9842_v58  ;;  %v9925_v30 = vpack.c.bf16 %v4834_v18, %v4831_v17  ;;  %v9942_v36 = vpack.c.bf16 %v4833_v32, %v4830_v53  ;;  %v4868_v39 = vld [vmem:[%s11289_s8 + $0x190] sm:$0xff]  ;;  %v4603_v41 = vld [vmem:[%s11288_s7 + $0x8] sm:$0xff]  ;;  %v9954_v44 = vpack.c.bf16 %v4840_v34, %v4837_v33  ;;  %v4846_v49 = vld [vmem:[%s11289_s8 + $0xe0] sm:$0xff] }
 0x3d4   : > { %8608 = vtanh.f32 %v4595_v6  ;;  %v4593_v19 = vadd.f32 %v4565_v11, %v4506_v37  ;;  %7561 = vmatmul.mubr.msk.f32.vlgmr.msra.gmra.mrb[0].mxu1 %vm4620_vm6, %v4602_v42  ;;  %v4836_v45 = vld [vmem:[%s11289_s8 + $0x90] sm:$0xff]  ;;  %v4839_v46 = vld [vmem:[%s11289_s8 + $0xa8] sm:$0xff]  ;;  %v9962_v47 = vpack.c.bf16 %v4871_v40, %v4868_v39  ;;  %v4874_v52 = vld [vmem:[%s11289_s8 + $0x1c0] sm:$0xff]  ;;  %vm4796_vm7 = vcmask 1041536  }
 0x3d5   : > { %v4582_v25 = vcombine.low %v4574_v38, %v4581_v15  ;;  %7653 = vmatpush1.bf16.msra.mxu1 %v9902_v12  ;;  %7563 = vmatprep.mubr.msk.f32.mxu1 %vm8670_vm5, %v11294_v43  ;;  %v4820_v5 = vld [vmem:[%s11289_s8 + $0x10] sm:$0xff]  ;;  %v4843_v48 = vld [vmem:[%s11289_s8 + $0xc8] sm:$0xff]  ;;  %v4877_v54 = vld [vmem:[%s11289_s8 + $0x1d8] sm:$0xff]  ;;  %v9999_v35 = vpack.c.bf16 %v4839_v46, %v4836_v45  ;;  %vm4797_vm8 = vcmask 1043458   ;;  %vm4799_vm10 = vcmask 1045508  }
 0x3d6   : > { %8610 = vtanh.f32 %v4593_v19  ;;  %7655 = vmatprep.subr.bf16.mxu1 %v9912_v16  ;;  %v4823_v50 = vld [vmem:[%s11289_s8 + $0x28] sm:$0xff]  ;;  %7727 = vmatprep.subr.bf16.mxu0 %v9962_v47  ;;  %v4604_v55 = vld [vmem:[%s11288_s7 + $0x10] sm:$0xff]  ;;  %v4842_v59 = vld [vmem:[%s11289_s8 + $0xc0] sm:$0xff]  ;;  %v10004_v23 = vpack.c.bf16 %v4877_v54, %v4874_v52  ;;  %v10010_v60 = vpack.c.bf16 %v4846_v49, %v4843_v48  ;;  %vm4801_vm12 = vcmask 1047558  }
 0x3d7   : > { %v4594_v29 = vadd.f32 %v4582_v25, %v4507_v22  ;;  %v9982_v27 = vpack.c.bf16 %v4823_v50, %v4820_v5  ;;  %v4826_v57 = vld [vmem:[%s11289_s8 + $0x40] sm:$0xff]  ;;  %v4845_v63 = vld [vmem:[%s11289_s8 + $0xd8] sm:$0xff]  ;;  %v4852_v1 = vld [vmem:[%s11289_s8 + $0x110] sm:$0xff]  ;;  %vm4810_vm14 = vcmask 123904   ;;  %vm4789_vm15 = vcmask 1041408  }
 0x3d8   : > { %7564 = vmatmul.mubr.msk.f32.gmra.mrb[2].mxu1 %vm4620_vm6, %v4603_v41  ;;  %v4849_v61 = vld [vmem:[%s11289_s8 + $0xf8] sm:$0xff]  ;;  %v4880_v3 = vld [vmem:[%s11289_s8 + $0x1f0] sm:$0xff]  ;;  %v4883_v4 = vld [vmem:[%s11289_s8 + $0x208] sm:$0xff]  ;;  %v10054_v7 = vpack.c.bf16 %v4845_v63, %v4842_v59  ;;  %vm4968_vm0 = vcmask 392192   ;;  %vm4775_vm1 = vcmask 125952   ;;  %vm5454_vm2 = vcmask 916480  }
 0x3d9   : > { %8612 = vtanh.f32 %v4594_v29  ;;  %7657 = vmatpush1.bf16.msra.mxu1 %v9922_v28  ;;  %7566 = vmatprep.mubr.msk.f32.mxu1 %vm8670_vm5, %v11294_v43  ;;  %v4829_v62 = vld [vmem:[%s11289_s8 + $0x58] sm:$0xff]  ;;  %v10039_v0 = vpack.c.bf16 %v4883_v4, %v4880_v3  ;;  %v4832_v6 = vld [vmem:[%s11289_s8 + $0x70] sm:$0xff]  ;;  %v4835_v37 = vld [vmem:[%s11289_s8 + $0x88] sm:$0xff]  ;;  %v10063_v9 = vpack.c.bf16 %v4852_v1, %v4849_v61  ;;  %vm4805_vm3 = vcmask 648192  }
 0x3da   : > { %7659 = vmatprep.subr.bf16.mxu1 %v9925_v30  ;;  %7729 = vmatpush3.bf16.msra.mxu0 %v9982_v27  ;;  %v10027_v20 = vpack.c.bf16 %v4829_v62, %v4826_v57  ;;  %v4605_v51 = vld [vmem:[%s11288_s7 + $0x18] sm:$0xff]  ;;  %v4848_v8 = vld [vmem:[%s11289_s8 + $0xf0] sm:$0xff]  ;;  %v4851_v38 = vld [vmem:[%s11289_s8 + $0x108] sm:$0xff]  ;;  %v10069_v42 = vpack.c.bf16 %v4835_v37, %v4832_v6 }
 0x3db   : > { %7731 = vmatprep.subr.bf16.mxu0 %v10004_v23  ;;  %v4886_v11 = vld [vmem:[%s11289_s8 + $0x220] sm:$0xff]  ;;  %v4889_v13 = vld [vmem:[%s11289_s8 + $0x238] sm:$0xff]  ;;  %v4855_v15 = vld [vmem:[%s11289_s8 + $0x128] sm:$0xff]  ;;  %v10109_v53 = vpack.c.bf16 %v4851_v38, %v4848_v8 }
 0x3dc   : > { %7567 = vmatmul.mubr.msk.f32.gmra.mrb[4].mxu1 %vm4620_vm6, %v4604_v55  ;;  %v4858_v17 = vld [vmem:[%s11289_s8 + $0x140] sm:$0xff]  ;;  %v10087_v18 = vpack.c.bf16 %v4889_v13, %v4886_v11  ;;  %v4841_v25 = vld [vmem:[%s11289_s8 + $0xb8] sm:$0xff]  ;;  %v4892_v32 = vld [vmem:[%s11289_s8 + $0x250] sm:$0xff] }
 0x3dd   : > { %7661 = vmatpush1.bf16.msra.mxu1 %v9942_v36  ;;  %7569 = vmatprep.mubr.msk.f32.mxu1 %vm8670_vm5, %v11294_v43  ;;  %v4838_v19 = vld [vmem:[%s11289_s8 + $0xa0] sm:$0xff]  ;;  %v10115_v29 = vpack.c.bf16 %v4858_v17, %v4855_v15  ;;  %v4857_v34 = vld [vmem:[%s11289_s8 + $0x138] sm:$0xff]  ;;  %v4895_v40 = vld [vmem:[%s11289_s8 + $0x268] sm:$0xff] }
 0x3de   : > { %v9979_v31 = vpop.eup %8608  ;;  %7663 = vmatprep.subr.bf16.mxu1 %v9954_v44  ;;  %7733 = vmatpush3.bf16.msra.mxu0 %v10027_v20  ;;  %v4606_v22 = vld [vmem:[%s11288_s7 + $0x20] sm:$0xff]  ;;  %v10124_v39 = vpack.c.bf16 %v4841_v25, %v4838_v19  ;;  %v4861_v41 = vld [vmem:[%s11289_s8 + $0x158] sm:$0xff]  ;;  %v4864_v45 = vld [vmem:[%s11289_s8 + $0x170] sm:$0xff]  ;;  %v10137_v46 = vpack.c.bf16 %v4895_v40, %v4892_v32 }
 0x3df   : > { %4601 = vst.msk [vmem:[%s11292_s11 + $0x10] sm:$0x3] %vm4500_vm4, %v9979_v31  ;;  %7735 = vmatprep.subr.bf16.mxu0 %v10039_v0  ;;  %v4854_v33 = vld [vmem:[%s11289_s8 + $0x120] sm:$0xff]  ;;  %v4607_v5 = vld [vmem:[%s11288_s7 + $0x28] sm:$0xff]  ;;  %v4844_v48 = vld [vmem:[%s11289_s8 + $0xd0] sm:$0xff]  ;;  %v10160_v55 = vpack.c.bf16 %v4864_v45, %v4861_v41  ;;  %vm4815_vm4 = vcmask 779904  }
 0x3e0   : > { %v10035_v56 = vpop.eup %8610  ;;  %7570 = vmatmul.mubr.msk.f32.gmra.mrb[6].mxu1 %vm4620_vm6, %v4605_v51  ;;  %v4847_v49 = vld [vmem:[%s11289_s8 + $0xe8] sm:$0xff]  ;;  %v10151_v50 = vpack.c.bf16 %v4857_v34, %v4854_v33  ;;  %v4898_v52 = vld [vmem:[%s11289_s8 + $0x280] sm:$0xff]  ;;  %v4901_v54 = vld [vmem:[%s11289_s8 + $0x298] sm:$0xff] }
 0x3e1   : > { %4780 = vrot.lane.b32.xlu0 %v10035_v56, %s8672_s30  ;;  %4599 = vst [vmem:[%s11292_s11] sm:$0xff] %v10035_v56  ;;  %7665 = vmatpush1.bf16.msra.mxu1 %v9999_v35  ;;  %v4860_v59 = vld [vmem:[%s11289_s8 + $0x150] sm:$0xff]  ;;  %v4863_v57 = vld [vmem:[%s11289_s8 + $0x168] sm:$0xff]  ;;  %v10172_v61 = vpack.c.bf16 %v4847_v49, %v4844_v48  ;;  %v10179_v1 = vpack.c.bf16 %v4901_v54, %v4898_v52  ;;  %vm10400_vm9 = vmor %vm4797_vm8, %vm4796_vm7  ;;  %vm5958_vm7 = vcmask 785408  }
 0x3e2   : > { %7667 = vmatprep.subr.bf16.mxu1 %v10010_v60  ;;  %7572 = vmatprep.mubr.msk.f32.mxu1 %vm8670_vm5, %v11294_v43  ;;  %v4867_v63 = vld [vmem:[%s11289_s8 + $0x188] sm:$0xff]  ;;  %v4870_v62 = vld [vmem:[%s11289_s8 + $0x1a0] sm:$0xff]  ;;  %v4853_v4 = vld [vmem:[%s11289_s8 + $0x118] sm:$0xff]  ;;  %v10199_v37 = vpack.c.bf16 %v4863_v57, %v4860_v59 }
 0x3e3   : > { %v10077_v14 = vpop.eup %8612  ;;  %7737 = vmatpush3.bf16.msra.mxu0 %v10069_v42  ;;  %v4850_v3 = vld [vmem:[%s11289_s8 + $0x100] sm:$0xff]  ;;  %v4608_v51 = vld [vmem:[%s11288_s7 + $0x30] sm:$0xff]  ;;  %v4907_v8 = vld [vmem:[%s11289_s8 + $0x2c8] sm:$0xff]  ;;  %v10202_v38 = vpack.c.bf16 %v4870_v62, %v4867_v63 }
 0x3e4   : > { %11322 = vst [vmem:[#allocation7_spill] sm:$0xff] %v10077_v14  ;;  %4782 = vrot.lane.b32.xlu1 %v10077_v14, %s8672_s30  ;;  %4600 = vst [vmem:[%s11292_s11 + $0x8] sm:$0xff] %v10077_v14  ;;  %7739 = vmatprep.subr.bf16.mxu0 %v10087_v18  ;;  %v4904_v6 = vld [vmem:[%s11289_s8 + $0x2b0] sm:$0xff]  ;;  %v4866_v11 = vld [vmem:[%s11289_s8 + $0x180] sm:$0xff]  ;;  %v10214_v17 = vpack.c.bf16 %v4853_v4, %v4850_v3 }
 0x3e5   : > { %4807 = vrot.lane.b32.xlu0 %v9979_v31, %s8673_s20  ;;  %7669 = vmatpush1.bf16.msra.mxu1 %v10054_v7  ;;  %v4869_v13 = vld [vmem:[%s11289_s8 + $0x198] sm:$0xff]  ;;  %v4876_v19 = vld [vmem:[%s11289_s8 + $0x1d0] sm:$0xff]  ;;  %v4859_v32 = vld [vmem:[%s11289_s8 + $0x148] sm:$0xff] }
 0x3e6   : > { %7671 = vmatprep.subr.bf16.mxu1 %v10063_v9  ;;  %7573 = vmatmul.mubr.msk.f32.gmra.mrb[8].mxu1 %vm4620_vm6, %v4606_v22  ;;  %v4873_v15 = vld [vmem:[%s11289_s8 + $0x1b8] sm:$0xff]  ;;  %v10221_v22 = vpack.c.bf16 %v4907_v8, %v4904_v6  ;;  %v4856_v25 = vld [vmem:[%s11289_s8 + $0x130] sm:$0xff]  ;;  %v4910_v34 = vld [vmem:[%s11289_s8 + $0x2e0] sm:$0xff]  ;;  %v10241_v41 = vpack.c.bf16 %v4869_v13, %v4866_v11 }
 0x3e7   : > { %7575 = vmatprep.mubr.msk.f32.mxu1 %vm8670_vm5, %v11294_v43  ;;  %7741 = vmatpush3.bf16.msra.mxu0 %v10124_v39  ;;  %v4609_v33 = vld [vmem:[%s11288_s7 + $0x38] sm:$0xff]  ;;  %v10244_v45 = vpack.c.bf16 %v4876_v19, %v4873_v15  ;;  %v4875_v48 = vld [vmem:[%s11289_s8 + $0x1c8] sm:$0xff]  ;;  %v10256_v52 = vpack.c.bf16 %v4859_v32, %v4856_v25  ;;  %v4882_v54 = vld [vmem:[%s11289_s8 + $0x200] sm:$0xff] }
 0x3e8   : > { %7743 = vmatprep.subr.bf16.mxu0 %v10137_v46  ;;  %v4913_v40 = vld [vmem:[%s11289_s8 + $0x2f8] sm:$0xff]  ;;  %v4879_v49 = vld [vmem:[%s11289_s8 + $0x1e8] sm:$0xff]  ;;  %v4862_v57 = vld [vmem:[%s11289_s8 + $0x160] sm:$0xff] }
 0x3e9   : > { %7673 = vmatpush1.bf16.msra.mxu1 %v10109_v53  ;;  %v10263_v59 = vpack.c.bf16 %v4913_v40, %v4910_v34  ;;  %v4865_v63 = vld [vmem:[%s11289_s8 + $0x178] sm:$0xff]  ;;  %v4610_v62 = vld [vmem:[%s11288_s7 + $0x40] sm:$0xf]  ;;  %v10280_v4 = vpack.c.bf16 %v4882_v54, %v4879_v49  ;;  %v4888_v13 = vld [vmem:[%s11289_s8 + $0x230] sm:$0xff] }
 0x3ea   : > { %7675 = vmatprep.subr.bf16.mxu1 %v10115_v29  ;;  %7576 = vmatmul.mubr.msk.f32.gmra.mrb[10].mxu1 %vm4620_vm6, %v4607_v5  ;;  %v4872_v5 = vld [vmem:[%s11289_s8 + $0x1b0] sm:$0xff]  ;;  %v4881_v6 = vld [vmem:[%s11289_s8 + $0x1f8] sm:$0xff]  ;;  %v10289_v8 = vpack.c.bf16 %v4865_v63, %v4862_v57  ;;  %v4887_v32 = vld [vmem:[%s11289_s8 + $0x228] sm:$0xff] }
 0x3eb   : > { %7578 = vmatprep.mubr.msk.f32.mxu1 %vm8670_vm5, %v11294_v43  ;;  %7745 = vmatpush3.bf16.msra.mxu0 %v10172_v61  ;;  %v10277_v3 = vpack.c.bf16 %v4875_v48, %v4872_v5  ;;  %v4885_v11 = vld [vmem:[%s11289_s8 + $0x218] sm:$0xff]  ;;  %v4884_v25 = vld [vmem:[%s11289_s8 + $0x210] sm:$0xff]  ;;  %v4894_v34 = vld [vmem:[%s11289_s8 + $0x260] sm:$0xff] }
 0x3ec   : > { %7747 = vmatprep.subr.bf16.mxu0 %v10179_v1  ;;  %v10303_v19 = vpack.c.bf16 %v4888_v13, %v4885_v11  ;;  %v10320_v40 = vpack.c.bf16 %v4887_v32, %v4884_v25  ;;  %v4890_v48 = vld [vmem:[%s11289_s8 + $0x240] sm:$0xff]  ;;  %v4893_v49 = vld [vmem:[%s11289_s8 + $0x258] sm:$0xff]  ;;  %v4900_v57 = vld [vmem:[%s11289_s8 + $0x290] sm:$0xff] }
 0x3ed   : > { %7677 = vmatpush1.bf16.msra.mxu1 %v10151_v50  ;;  %v4897_v54 = vld [vmem:[%s11289_s8 + $0x278] sm:$0xff]  ;;  %v10338_v63 = vpack.c.bf16 %v4893_v49, %v4890_v48  ;;  %v4903_v11 = vld [vmem:[%s11289_s8 + $0x2a8] sm:$0xff]  ;;  %v4906_v13 = vld [vmem:[%s11289_s8 + $0x2c0] sm:$0xff] }
 0x3ee   : > { %7679 = vmatprep.subr.bf16.mxu1 %v10160_v55  ;;  %7579 = vmatmul.mubr.msk.f32.gmra.mrb[12].mxu1 %vm4620_vm6, %v4608_v51  ;;  %v4878_v51 = vld [vmem:[%s11289_s8 + $0x1e0] sm:$0xff]  ;;  %v10359_v32 = vpack.c.bf16 %v4906_v13, %v4903_v11  ;;  %v4909_v48 = vld [vmem:[%s11289_s8 + $0x2d8] sm:$0xff]  ;;  %v4912_v49 = vld [vmem:[%s11289_s8 + $0x2f0] sm:$0xff] }
 0x3ef   : > { %7581 = vmatprep.mubr.msk.f32.mxu1 %vm8670_vm5, %v11294_v43  ;;  %7749 = vmatpush3.bf16.msra.mxu0 %v10214_v17  ;;  %v10300_v15 = vpack.c.bf16 %v4881_v6, %v4878_v51  ;;  %11324 = vst [vmem:[#allocation9_spill] sm:$0xff] %v10338_v63  ;;  %v4896_v51 = vld [vmem:[%s11289_s8 + $0x270] sm:$0xff]  ;;  %v4899_v6 = vld [vmem:[%s11289_s8 + $0x288] sm:$0xff]  ;;  %v4918_v13 = vld [vmem:[%s11289_s8 + $0x320] sm:$0xff] }
 0x3f0   : > { %7751 = vmatprep.subr.bf16.mxu0 %v10221_v22  ;;  %v10356_v25 = vpack.c.bf16 %v4899_v6, %v4896_v51  ;;  %11327 = vst [vmem:[#allocation12_spill] sm:$0xff] %v10359_v32  ;;  %v4908_v51 = vld [vmem:[%s11289_s8 + $0x2d0] sm:$0xff]  ;;  %v4911_v6 = vld [vmem:[%s11289_s8 + $0x2e8] sm:$0xff]  ;;  %vm4800_vm11 = vmor %vm4799_vm10, %vm10400_vm9 }
 0x3f1   : > { %7681 = vmatpush1.bf16.msra.mxu1 %v10199_v37  ;;  %v4915_v11 = vld [vmem:[%s11289_s8 + $0x308] sm:$0xff]  ;;  %vm4802_vm13 = vmor %vm4801_vm12, %vm4800_vm11  ;;  %vm5299_vm11 = vcmask 128004  }
 0x3f2   : > { %7683 = vmatprep.subr.bf16.mxu1 %v10202_v38  ;;  %7582 = vmatmul.mubr.msk.f32.gmra.mrb[14].mxu1 %vm4620_vm6, %v4609_v33  ;;  %v4891_v33 = vld [vmem:[%s11289_s8 + $0x248] sm:$0xff]  ;;  %11326 = vst [vmem:[#allocation11_spill] sm:$0xff] %v10356_v25  ;;  %vm5298_vm10 = vmor %vm4797_vm8, %vm4789_vm15 }
 0x3f3   : > { %7584 = vmatprep.mubr.msk.f32.mxu1 %vm8670_vm5, %v11294_v43  ;;  %7753 = vmatpush3.bf16.msra.mxu0 %v10256_v52  ;;  %v10323_v5 = vpack.c.bf16 %v4894_v34, %v4891_v33  ;;  %v4902_v33 = vld [vmem:[%s11289_s8 + $0x2a0] sm:$0xff]  ;;  %v4905_v34 = vld [vmem:[%s11289_s8 + $0x2b8] sm:$0xff]  ;;  %vm5300_vm12 = vmor %vm5299_vm11, %vm5298_vm10 }
 0x3f4   : > { %7755 = vmatprep.subr.bf16.mxu0 %v10263_v59 }
 0x3f5   : > { %7685 = vmatpush1.bf16.msra.mxu1 %v10241_v41  ;;  %11323 = vst [vmem:[#allocation8_spill] sm:$0xff] %v10323_v5 }
 0x3f6   : > { %7687 = vmatprep.subr.bf16.mxu1 %v10244_v45  ;;  %7585 = vmatmul.mubr.msk.f32.gmra.mrb[16].mxu1 %vm4620_vm6, %v4610_v62  ;;  %v10341_v62 = vpack.c.bf16 %v4900_v57, %v4897_v54  ;;  %v10374_v54 = vpack.c.bf16 %v4905_v34, %v4902_v33  ;;  %v10377_v57 = vpack.c.bf16 %v4912_v49, %v4909_v48  ;;  %v11332_v48 = vmov 0 }
 0x3f7   : > { %7757 = vmatpush3.bf16.msra.mxu0 %v10289_v8  ;;  %v10392_v33 = vpack.c.bf16 %v4911_v6, %v4908_v51  ;;  %v10395_v34 = vpack.c.bf16 %v4918_v13, %v4915_v11  ;;  %v11333_v48 = vsel %vm10400_vm9, 4294967295, %v11332_v48 }
 0x3f8   : > { %7758 = vmatprep.subr.bf16.mxu0 %v11296_v2  ;;  %11325 = vst [vmem:[#allocation10_spill] sm:$0xff] %v10341_v62  ;;  %11328 = vst [vmem:[#allocation13_spill] sm:$0xff] %v10374_v54 }
 0x3f9   : > { %7689 = vmatpush1.bf16.msra.mxu1 %v10277_v3  ;;  %11329 = vst [vmem:[#allocation14_spill] sm:$0xff] %v10377_v57  ;;  %11330 = vst [vmem:[#allocation15_spill] sm:$0xff] %v10392_v33 }
 0x3fa   : > { %7691 = vmatprep.subr.bf16.mxu1 %v10280_v4  ;;  %11331 = vst [vmem:[#allocation16_spill] sm:$0xff] %v10395_v34  ;;  %11334 = vst [vmem:[#allocation17_spill] sm:$0xff] %v11333_v48 }
 0x3fd   : > { %7693 = vmatpush1.bf16.msra.mxu1 %v10300_v15 }
 0x3fe   : > { %7695 = vmatprep.subr.bf16.mxu1 %v10303_v19 }
 0x401   : > { %7697 = vmatpush1.bf16.msra.mxu1 %v10320_v40 }
 0x402   : > { %7699 = vmatprep.subr.bf16.mxu1 %v10323_v5  ;;  %v4926_v5 = vld [vmem:[%s11289_s8 + $0x360] sm:$0xff] }
 0x405   : > { %7701 = vmatpush1.bf16.msra.mxu1 %v10338_v63 }
 0x406   : > { %7703 = vmatprep.subr.bf16.mxu1 %v10341_v62 }
 0x409   : > { %7705 = vmatpush1.bf16.msra.mxu1 %v10356_v25  ;;  %v4923_v25 = vld [vmem:[%s11289_s8 + $0x348] sm:$0xff] }
 0x40a   : > { %7707 = vmatprep.subr.bf16.mxu1 %v10359_v32 }
 0x40d   : > { %7709 = vmatpush1.bf16.msra.mxu1 %v10374_v54 }
 0x40e   : > { %7711 = vmatprep.subr.bf16.mxu1 %v10377_v57 }
 0x411   : > { %7713 = vmatpush1.bf16.msra.mxu1 %v10392_v33  ;;  %v4920_v33 = vld [vmem:[%s11289_s8 + $0x330] sm:$0xff] }
 0x412   : > { %7715 = vmatprep.subr.bf16.mxu1 %v10395_v34  ;;  %v10463_v63 = vpack.c.bf16 %v4923_v25, %v4920_v33  ;;  %v4929_v25 = vld [vmem:[%s11289_s8 + $0x378] sm:$0xff]  ;;  %v4928_v33 = vld [vmem:[%s11289_s8 + $0x370] sm:$0xff] }
 0x453   : > { %v4781_v49 = vpop.permute.xlu0 %4780 }
 0x454   : > { %v4786_v51 = vrot.slane %v4781_v49, 6 }
 0x456   : > { %v4788_v6 = vsel %vm4620_vm6, %v4786_v51, %v4781_v49  ;;  %v10407_v11 = vpop.permute.xlu1 %4782  ;;  %v4914_v49 = vld [vmem:[%s11289_s8 + $0x300] sm:$0xff] }
 0x457   : > { %11335 = vst [vmem:[#allocation18_spill] sm:$0xff] %v10407_v11  ;;  %4803 = vst.msk [vmem:[#allocation3] sm:$0xff] %vm4802_vm13, %v4788_v6  ;;  %v11301_v13 = vrot.slane %v10407_v11, 6  ;;  %v4808_v43 = vpop.permute.xlu0 %4807  ;;  %v4917_v6 = vld [vmem:[%s11289_s8 + $0x318] sm:$0xff]  ;;  %vm6466_vm13 = vcmask 654336  }
 0x458   : > { %4811 = vst.msk [vmem:[#allocation3] sm:$0x3] %vm4810_vm14, %v4808_v43  ;;  %v4916_v43 = vld [vmem:[%s11289_s8 + $0x310] sm:$0xff]  ;;  %v10434_v26 = vpack.c.bf16 %v4917_v6, %v4914_v49  ;;  %v4922_v49 = vld [vmem:[%s11289_s8 + $0x340] sm:$0xff]  ;;  %v4925_v6 = vld [vmem:[%s11289_s8 + $0x358] sm:$0xff] }
 0x459   : > { %v4790_v2 = vsel %vm4789_vm15, %v4786_v51, %v11301_v13  ;;  %v4919_v51 = vld [vmem:[%s11289_s8 + $0x328] sm:$0xff]  ;;  %v4924_v13 = vld [vmem:[%s11289_s8 + $0x350] sm:$0xff]  ;;  %vm6311_vm15 = vcmask 390148  }
 0x45a   : > { %v4791_v48 = vsel %vm4620_vm6, %v4790_v2, %v10407_v11  ;;  %v10436_v11 = vpack.c.bf16 %v4919_v51, %v4916_v43 }
 0x45b   : > { %4804 = vst [vmem:[#allocation3 + $0x8] sm:$0xff] %v4791_v48  ;;  %v4921_v48 = vld [vmem:[%s11289_s8 + $0x338] sm:$0xff] }
 0x45c   : > { %v10442_v32 = vpack.c.bf16 %v4924_v13, %v4921_v48  ;;  %v4930_v13 = vld [vmem:[%s11289_s8 + $0x380] sm:$0xff] }
 0x45e   : > { %11336 = vst [vmem:[#allocation19_spill] sm:$0xff] %v10442_v32 }
 0x45f   : > { %v4817_v14 = vld [vmem:[#allocation3] sm:$0x3f] }
 0x460   : > { %v4957_v2 = vrot.slane %v4817_v14, %v9842_v58 }
 0x462   : > { %v4965_v21 = vcombine.high %v4957_v2, %v4957_v2  ;;  %v5302_v24 = vld [vmem:[#allocation3 + $0x4] sm:$0x3f] }
 0x463   : > { %v5806_v34 = vld [vmem:[#allocation3 + $0x8] sm:$0x3f]  ;;  %v5432_v57 = vcombine.high %v5302_v24, %v5302_v24  ;;  %v5439_v54 = vrot.slane %v5302_v24, %v9842_v58  ;;  %v4927_v24 = vld [vmem:[%s11289_s8 + $0x368] sm:$0xff] }
 0x464   : > { %v5943_v43 = vrot.slane %v5806_v34, %v9842_v58  ;;  %5035 = vmatprep.mubr.f32.mxu1 %v4965_v21  ;;  %5177 = vmatprep.mubr.f32.mxu0 %v4965_v21  ;;  %v5936_v62 = vcombine.high %v5806_v34, %v5806_v34  ;;  %v10465_v21 = vpack.c.bf16 %v4925_v6, %v4922_v49  ;;  %v4931_v49 = vld [vmem:[%s11289_s8 + $0x388] sm:$0xff]  ;;  %v11337_v6 = vmov 0.0|0.0  }
 0x465   : > { %v5446_v51 = vrot.slane %v5432_v57, %v9842_v58  ;;  %5036 = vmatmul.mubr.f32.vlgmr.msra.gmra.mrb[18].mxu1 %v4957_v2  ;;  %5178 = vmatmul.mubr.f32.vlgmr.msra.gmra.mrb[0].mxu0 %v4957_v2  ;;  %v5447_v48 = vcombine.high %v5439_v54, %v5439_v54  ;;  %v10472_v34 = vpack.c.bf16 %v4930_v13, %v4927_v24 }
 0x466   : > { %7717 = vmatpush1.bf16.msra.mxu1 %v10434_v26  ;;  %7760 = vmatpush3.bf16.msra.mxu0 %v10436_v11  ;;  %v5951_v2 = vcombine.high %v5943_v43, %v5943_v43  ;;  %v5950_v24 = vrot.slane %v5936_v62, %v9842_v58  ;;  %v10491_v13 = vpack.c.bf16 %v4929_v25, %v4926_v5 }
 0x467   : > { %5452 = vrot.lane.b32.xlu0 %v5446_v51, %s8674_s15  ;;  %v8589_v57 = vpack.i.bf16 %v5439_v54, %v5447_v48  ;;  %7719 = vmatprep.subr.bf16.mxu1 %v10442_v32  ;;  %v11338_v54 = vmov 0.0   ;;  %v10493_v51 = vpack.c.bf16 %v4931_v49, %v4928_v33  ;;  %v4950_v48 = vcombine.high %v4817_v14, %v4817_v14 }
 0x468   : > { %7761 = vmatprep.subr.bf16.mxu0 %v11337_v6  ;;  %5106 = vmatprep.mubr.f32.mxu1 %v11338_v54  ;;  %v8594_v32 = vpack.i.bf16 %v5943_v43, %v5951_v2 }
 0x469   : > { %8590 = vrot.lane.b32.xlu1 %v8589_v57, %s8674_s15  ;;  %7599 = vmatprep.mubr.msk.f32.mxu0 %vm8670_vm5, %v11338_v54  ;;  %v4964_v5 = vrot.slane %v4950_v48, %v9842_v58 }
 0x46a   : > { %7721 = vmatpush1.bf16.msra.mxu1 %v10463_v63  ;;  %7763 = vmatpush3.bf16.msra.mxu0 %v10465_v21 }
 0x46b   : > { %5956 = vrot.lane.b32.xlu0 %v5950_v24, %s8675_s23  ;;  %7723 = vmatprep.subr.bf16.mxu1 %v10472_v34 }
 0x46c   : > { %7764 = vmatprep.subr.bf16.mxu0 %v11337_v6 }
 0x46d   : > { %8595 = vrot.lane.b32.xlu1 %v8594_v32, %s8675_s23 }
 0x46e   : > { %7725 = vmatpush1.bf16.msra.mxu1 %v10491_v13  ;;  %7766 = vmatpush3.bf16.msra.mxu0 %v10493_v51 }
 0x46f   : > { %4812 = vrot.lane.b32.xlu0 %v10035_v56, %s8673_s20  ;;  %7768 = vmatprep.subr.bf16.mxu0 %v9895_v10  ;;  %v11339_v10 = vld [vmem:[#allocation8_spill] sm:$0xff] }
 0x470   : > { %7844 = vmatprep.subr.bf16.mxu1 %v9962_v47 }
 0x471   : > { %4784 = vrot.lane.b32.xlu1 %v9979_v31, %s8672_s30  ;;  %7323 = vmatmul.mubr.msk.f32.vlgmr.msra.gmra.mrb[18].mxu1 %vm4968_vm0, %v4964_v5 }
 0x472   : > { %7600 = vmatmul.mubr.msk.f32.vlgmr.msra.gmra.mrb[2].mxu0 %vm4968_vm0, %v4964_v5  ;;  %7846 = vmatpush3.bf16.msra.mxu1 %v9982_v27 }
 0x473   : > { %7770 = vmatpush1.bf16.msra.mxu0 %v9902_v12  ;;  %7848 = vmatprep.subr.bf16.mxu1 %v10004_v23  ;;  %v11340_v12 = vld [vmem:[#allocation9_spill] sm:$0xff] }
 0x474   : > { %7772 = vmatprep.subr.bf16.mxu0 %v9912_v16  ;;  %v11341_v16 = vld [vmem:[#allocation10_spill] sm:$0xff] }
 0x476   : > { %7850 = vmatpush3.bf16.msra.mxu1 %v10027_v20 }
 0x477   : > { %7774 = vmatpush1.bf16.msra.mxu0 %v9922_v28  ;;  %7852 = vmatprep.subr.bf16.mxu1 %v10039_v0  ;;  %v11342_v28 = vld [vmem:[#allocation11_spill] sm:$0xff] }
 0x478   : > { %7776 = vmatprep.subr.bf16.mxu0 %v9925_v30  ;;  %v11343_v30 = vld [vmem:[#allocation12_spill] sm:$0xff] }
 0x47a   : > { %7854 = vmatpush3.bf16.msra.mxu1 %v10069_v42 }
 0x47b   : > { %7778 = vmatpush1.bf16.msra.mxu0 %v9942_v36  ;;  %7856 = vmatprep.subr.bf16.mxu1 %v10087_v18  ;;  %v11344_v36 = vld [vmem:[#allocation13_spill] sm:$0xff] }
 0x47c   : > { %7780 = vmatprep.subr.bf16.mxu0 %v9954_v44  ;;  %v11345_v44 = vld [vmem:[#allocation14_spill] sm:$0xff] }
 0x47e   : > { %7858 = vmatpush3.bf16.msra.mxu1 %v10124_v39 }
 0x47f   : > { %7782 = vmatpush1.bf16.msra.mxu0 %v9999_v35  ;;  %7860 = vmatprep.subr.bf16.mxu1 %v10137_v46  ;;  %v11346_v35 = vld [vmem:[#allocation15_spill] sm:$0xff] }
 0x480   : > { %7784 = vmatprep.subr.bf16.mxu0 %v10010_v60  ;;  %v11347_v60 = vld [vmem:[#allocation16_spill] sm:$0xff] }
 0x482   : > { %7862 = vmatpush3.bf16.msra.mxu1 %v10172_v61 }
 0x483   : > { %7786 = vmatpush1.bf16.msra.mxu0 %v10054_v7  ;;  %7864 = vmatprep.subr.bf16.mxu1 %v10179_v1  ;;  %v7313_v7 = vld [vmem:[%s11287_s6] ss:$0 sm:$0xff] }
 0x484   : > { %7788 = vmatprep.subr.bf16.mxu0 %v10063_v9 }
 0x486   : > { %7866 = vmatpush3.bf16.msra.mxu1 %v10214_v17 }
 0x487   : > { %7790 = vmatpush1.bf16.msra.mxu0 %v10109_v53  ;;  %7868 = vmatprep.subr.bf16.mxu1 %v10221_v22 }
 0x488   : > { %7792 = vmatprep.subr.bf16.mxu0 %v10115_v29 }
 0x48a   : > { %7870 = vmatpush3.bf16.msra.mxu1 %v10256_v52 }
 0x48b   : > { %7794 = vmatpush1.bf16.msra.mxu0 %v10151_v50  ;;  %7872 = vmatprep.subr.bf16.mxu1 %v10263_v59 }
 0x48c   : > { %7796 = vmatprep.subr.bf16.mxu0 %v10160_v55 }
 0x48e   : > { %7874 = vmatpush3.bf16.msra.mxu1 %v10289_v8 }
 0x48f   : > { %7798 = vmatpush1.bf16.msra.mxu0 %v10199_v37  ;;  %7875 = vmatprep.subr.bf16.mxu1 %v11337_v6 }
 0x490   : > { %7800 = vmatprep.subr.bf16.mxu0 %v10202_v38 }
 0x493   : > { %7802 = vmatpush1.bf16.msra.mxu0 %v10241_v41 }
 0x494   : > { %7804 = vmatprep.subr.bf16.mxu0 %v10244_v45 }
 0x497   : > { %7806 = vmatpush1.bf16.msra.mxu0 %v10277_v3 }
 0x498   : > { %7808 = vmatprep.subr.bf16.mxu0 %v10280_v4 }
 0x49b   : > { %7810 = vmatpush1.bf16.msra.mxu0 %v10300_v15 }
 0x49c   : > { %7812 = vmatprep.subr.bf16.mxu0 %v10303_v19 }
 0x49f   : > { %7814 = vmatpush1.bf16.msra.mxu0 %v10320_v40 }
 0x4a0   : > { %7816 = vmatprep.subr.bf16.mxu0 %v11339_v10 }
 0x4a3   : > { %7818 = vmatpush1.bf16.msra.mxu0 %v11340_v12 }
 0x4a4   : > { %7820 = vmatprep.subr.bf16.mxu0 %v11341_v16 }
 0x4a7   : > { %7822 = vmatpush1.bf16.msra.mxu0 %v11342_v28  ;;  %v4714_v9 = vpop.f32.mrb[0].mxu1 }
 0x4a8   : > { %7824 = vmatprep.subr.bf16.mxu0 %v11343_v30  ;;  %v4715_v14 = vadd.f32 %v7313_v7, %v4714_v9  ;;  %v7562_v53 = vpop.f32.mrb[1].mxu1 }
 0x4aa   : > { %8614 = vtanh.f32 %v4715_v14 }
 0x4ab   : > { %7826 = vmatpush1.bf16.msra.mxu0 %v11344_v36  ;;  %v4719_v29 = vpop.f32.mrb[2].mxu1 }
 0x4ac   : > { %7828 = vmatprep.subr.bf16.mxu0 %v11345_v44  ;;  %v4720_v50 = vadd.f32 %v7313_v7, %v4719_v29  ;;  %v7565_v55 = vpop.f32.mrb[3].mxu1 }
 0x4ae   : > { %8616 = vtanh.f32 %v4720_v50 }
 0x4af   : > { %7830 = vmatpush1.bf16.msra.mxu0 %v11346_v35  ;;  %v4724_v37 = vpop.f32.mrb[4].mxu1 }
 0x4b0   : > { %7832 = vmatprep.subr.bf16.mxu0 %v11347_v60  ;;  %v4725_v38 = vadd.f32 %v7313_v7, %v4724_v37  ;;  %v7568_v41 = vpop.f32.mrb[5].mxu1 }
 0x4b1   : > { %v11348_v41 = vld [vmem:[#allocation19_spill] sm:$0xff] }
 0x4b2   : > { %8618 = vtanh.f32 %v4725_v38 }
 0x4b3   : > { %v4729_v45 = vpop.f32.mrb[6].mxu1 }
 0x4b4   : > { %v4730_v3 = vadd.f32 %v7313_v7, %v4729_v45  ;;  %v7571_v4 = vpop.f32.mrb[7].mxu1  ;;  %v8615_v62 = vpop.eup %8614 }
 0x4b5   : > { %4767 = vst.msk [vmem:[%s11293_s12] sm:$0xff] %vm4620_vm6, %v8615_v62  ;;  %v5808_v4 = vld [vmem:[%s11289_s8 + $0x8] sm:$0xff] }
 0x4b6   : > { %8620 = vtanh.f32 %v4730_v3 }
 0x4b8   : > { %v8617_v2 = vpop.eup %8616 }
 0x4b9   : > { %v4734_v15 = vpop.f32.mrb[8].mxu1  ;;  %4768 = vst.msk [vmem:[%s11293_s12 + $0x8] sm:$0xff] %vm4620_vm6, %v8617_v2 }
 0x4ba   : > { %v4735_v19 = vadd.f32 %v7313_v7, %v4734_v15  ;;  %v7574_v40 = vpop.f32.mrb[9].mxu1  ;;  %v11349_v15 = vld [vmem:[#allocation18_spill] sm:$0xff] }
 0x4bc   : > { %8622 = vtanh.f32 %v4735_v19  ;;  %v8619_v24 = vpop.eup %8618  ;;  %v11350_v19 = vrot.slane %v11349_v15, 6  ;;  %v5834_v15 = vld [vmem:[%s11289_s8 + $0xd8] sm:$0xff] }
 0x4bd   : > { %v4739_v32 = vpop.f32.mrb[10].mxu1  ;;  %4769 = vst.msk [vmem:[%s11293_s12 + $0x10] sm:$0xff] %vm4620_vm6, %v8619_v24  ;;  %v5823_v24 = vld [vmem:[%s11289_s8 + $0x80] sm:$0xff] }
 0x4be   : > { %v4740_v43 = vadd.f32 %v7313_v7, %v4739_v32  ;;  %v7577_v57 = vpop.f32.mrb[11].mxu1  ;;  %v5807_v32 = vld [vmem:[%s11289_s8] sm:$0xff] }
 0x4c0   : > { %8624 = vtanh.f32 %v4740_v43  ;;  %v8621_v48 = vpop.eup %8620  ;;  %v5810_v43 = vld [vmem:[%s11289_s8 + $0x18] sm:$0xff] }
 0x4c1   : > { %v4744_v25 = vpop.f32.mrb[12].mxu1  ;;  %4770 = vst.msk [vmem:[%s11293_s12 + $0x18] sm:$0xff] %vm4620_vm6, %v8621_v48  ;;  %v10639_v2 = vpack.c.bf16 %v5810_v43, %v5807_v32  ;;  %v11353_v32 = vld [vmem:[#allocation4_spill] sm:$0xff] }
 0x4c2   : > { %v4745_v33 = vadd.f32 %v7313_v7, %v4744_v25  ;;  %v7580_v49 = vpop.f32.mrb[13].mxu1  ;;  %v5813_v25 = vld [vmem:[%s11289_s8 + $0x30] sm:$0xff] }
 0x4c4   : > { %8626 = vtanh.f32 %v4745_v33  ;;  %v5816_v33 = vld [vmem:[%s11289_s8 + $0x48] sm:$0xff] }
 0x4c5   : > { %v4749_v5 = vpop.f32.mrb[14].mxu1  ;;  %v10664_v48 = vpack.c.bf16 %v5816_v33, %v5813_v25  ;;  %v5837_v25 = vld [vmem:[%s11289_s8 + $0xf0] sm:$0xff]  ;;  %v5840_v33 = vld [vmem:[%s11289_s8 + $0x108] sm:$0xff] }
 0x4c6   : > { %v4750_v10 = vadd.f32 %v7313_v7, %v4749_v5  ;;  %v7583_v12 = vpop.f32.mrb[15].mxu1  ;;  %v8623_v16 = vpop.eup %8622 }
 0x4c7   : > { %4771 = vst.msk [vmem:[%s11293_s12 + $0x20] sm:$0xff] %vm4620_vm6, %v8623_v16  ;;  %v5819_v12 = vld [vmem:[%s11289_s8 + $0x60] sm:$0xff]  ;;  %v5822_v16 = vld [vmem:[%s11289_s8 + $0x78] sm:$0xff] }
 0x4c8   : > { %8628 = vtanh.f32 %v4750_v10 }
 0x4c9   : > { %v4754_v28 = vpop.f32.mrb[16].mxu1 }
 0x4ca   : > { %v8625_v30 = vpop.eup %8624  ;;  %v4755_v36 = vadd.f32 %v7313_v7, %v4754_v28  ;;  %v7586_v44 = vpop.f32.mrb[17].mxu1 }
 0x4cb   : > { %4772 = vst.msk [vmem:[%s11293_s12 + $0x28] sm:$0xff] %vm4620_vm6, %v8625_v30 }
 0x4cc   : > { %8630 = vtanh.f32 %v4755_v36  ;;  %v5829_v36 = vld [vmem:[%s11289_s8 + $0xb0] sm:$0xff] }
 0x4ce   : > { %v8627_v35 = vpop.eup %8626 }
 0x4cf   : > { %4773 = vst.msk [vmem:[%s11293_s12 + $0x30] sm:$0xff] %vm4620_vm6, %v8627_v35 }
 0x4d2   : > { %v8629_v60 = vpop.eup %8628 }
 0x4d3   : > { %4774 = vst.msk [vmem:[%s11293_s12 + $0x38] sm:$0xff] %vm4620_vm6, %v8629_v60  ;;  %v10686_v60 = vpack.c.bf16 %v5822_v16, %v5819_v12  ;;  %v5846_v12 = vld [vmem:[%s11289_s8 + $0x138] sm:$0xff] }
 0x4d4   : > { %v5850_v16 = vld [vmem:[%s11289_s8 + $0x158] sm:$0xff] }
 0x4d6   : > { %v8631_v7 = vpop.eup %8630 }
 0x4d7   : > { %4776 = vst.msk [vmem:[%s11293_s12 + $0x40] sm:$0xf] %vm4775_vm1, %v8631_v7  ;;  %vm6306_vm1 = vcmask 261120  }
 0x4d9   : > { %v5453_v9 = vpop.permute.xlu0 %5452 }
 0x4db   : > { %v8591_v14 = vpop.permute.xlu1 %8590 }
 0x4dc   : > { %v8593_v53 = vunpack.i.h.bf16 %v8591_v14  ;;  %v8592_v29 = vunpack.i.l.bf16 %v8591_v14  ;;  %v5825_v14 = vld [vmem:[%s11289_s8 + $0x90] sm:$0xff] }
 0x4dd   : > { %v10598_v37 = vpop.permute.xlu0 %5956 }
 0x4de   : > { %v5456_v50 = vsel %vm5454_vm2, %v8592_v29, %v5453_v9  ;;  %v5455_v55 = vsel %vm5454_vm2, %v8593_v53, %v8592_v29  ;;  %v5828_v53 = vld [vmem:[%s11289_s8 + $0xa8] sm:$0xff]  ;;  %v5835_v29 = vld [vmem:[%s11289_s8 + $0xe0] sm:$0xff] }
 0x4df   : > { %v10600_v38 = vpop.permute.xlu1 %8595  ;;  %5536 = vmatprep.mubr.f32.mxu0 %v5456_v50  ;;  %5678 = vmatprep.mubr.f32.mxu1 %v5456_v50  ;;  %v11351_v50 = vld [vmem:[#allocation6_spill] sm:$0xff] }
 0x4e0   : > { %5537 = vmatmul.mubr.f32.vlgmr.msra.gmra.mrb[4].mxu0 %v5455_v55  ;;  %5679 = vmatmul.mubr.f32.vlgmr.msra.gmra.mrb[20].mxu1 %v5455_v55  ;;  %v8597_v57 = vunpack.i.l.bf16 %v10600_v38 }
 0x4e1   : > { %7834 = vmatpush1.bf16.msra.mxu0 %v10434_v26  ;;  %7877 = vmatpush3.bf16.msra.mxu1 %v10436_v11  ;;  %v4813_v3 = vpop.permute.xlu0 %4812  ;;  %v5811_v26 = vld [vmem:[%s11289_s8 + $0x20] sm:$0xff] }
 0x4e2   : > { %7836 = vmatprep.subr.bf16.mxu0 %v11348_v41  ;;  %7878 = vmatprep.subr.bf16.mxu1 %v11337_v6  ;;  %v10622_v62 = vpack.c.bf16 %v5811_v26, %v5808_v4  ;;  %v11352_v41 = vld [vmem:[#allocation5_spill] sm:$0xff]  ;;  %v5831_v26 = vld [vmem:[%s11289_s8 + $0xc0] sm:$0xff] }
 0x4e3   : > { %v4785_v45 = vpop.permute.xlu1 %4784  ;;  %5607 = vmatprep.mubr.f32.mxu0 %v11338_v54  ;;  %7614 = vmatprep.mubr.msk.f32.mxu1 %vm8670_vm5, %v11338_v54 }
 0x4e4   : > { %v4792_v40 = vsel %vm4620_vm6, %v11350_v19, %v4785_v45  ;;  %v5838_v19 = vld [vmem:[%s11289_s8 + $0xf8] sm:$0xff] }
 0x4e5   : > { %4806 = vst.msk [vmem:[#allocation3 + $0x10] sm:$0x3] %vm4805_vm3, %v4792_v40  ;;  %7838 = vmatpush1.bf16.msra.mxu0 %v10463_v63  ;;  %7880 = vmatpush3.bf16.msra.mxu1 %v10465_v21  ;;  %v5814_v63 = vld [vmem:[%s11289_s8 + $0x38] sm:$0xff]  ;;  %vm6815_vm3 = vcmask 1041792  }
 0x4e6   : > { %4816 = vst.msk [vmem:[#allocation3 + $0x10] sm:$0x3] %vm4815_vm4, %v4813_v3  ;;  %7840 = vmatprep.subr.bf16.mxu0 %v10472_v34  ;;  %7881 = vmatprep.subr.bf16.mxu1 %v11337_v6  ;;  %v5817_v34 = vld [vmem:[%s11289_s8 + $0x50] sm:$0xff]  ;;  %v5921_v3 = vld [vmem:[%s11290_s9 + $0x4] sm:$0x7]  ;;  %vm6816_vm4 = vmor %vm4797_vm8, %vm6815_vm3 }
 0x4e7   : > { %v10649_v49 = vpack.c.bf16 %v5817_v34, %v5814_v63  ;;  %v5926_v40 = vrot.slane %v5921_v3, %v11352_v41  ;;  %v10740_v63 = vpack.c.bf16 %v5834_v15, %v5831_v26  ;;  %v8598_v26 = vunpack.i.h.bf16 %v10600_v38 }
 0x4e9   : > { %7842 = vmatpush1.bf16.msra.mxu0 %v10491_v13  ;;  %7883 = vmatpush3.bf16.msra.mxu1 %v10493_v51  ;;  %v5960_v13 = vsel %vm5958_vm7, %v8597_v57, %v10598_v37 }
 0x4ea   : > { %7885 = vmatprep.subr.bf16.mxu1 %v10622_v62  ;;  %7961 = vmatprep.subr.bf16.mxu0 %v9962_v47  ;;  %v5820_v47 = vld [vmem:[%s11289_s8 + $0x68] sm:$0xff] }
 0x4eb   : > { %v10676_v30 = vpack.c.bf16 %v5823_v24, %v5820_v47  ;;  %v5930_v47 = vrot.slane %v5921_v3, %v11351_v50  ;;  %v10766_v24 = vpack.c.bf16 %v5840_v33, %v5837_v25 }
 0x4ec   : > { %7325 = vmatmul.mubr.msk.f32.vlgmr.msra.gmra.mrb[4].mxu0 %vm4968_vm0, %v5453_v9  ;;  %7615 = vmatmul.mubr.msk.f32.vlgmr.msra.gmra.mrb[22].mxu1 %vm4968_vm0, %v5453_v9 }
 0x4ed   : > { %7887 = vmatpush1.bf16.msra.mxu1 %v10639_v2  ;;  %6040 = vmatprep.mubr.f32.mxu1 %v5960_v13  ;;  %v6314_v5 = vld [vmem:[#allocation3 + $0xc] sm:$0x3f] }
 0x4ee   : > { %7963 = vmatpush3.bf16.msra.mxu0 %v9982_v27  ;;  %6182 = vmatprep.mubr.f32.mxu0 %v5960_v13  ;;  %v6444_v10 = vcombine.high %v6314_v5, %v6314_v5  ;;  %v6451_v28 = vrot.slane %v6314_v5, %v9842_v58  ;;  %v5826_v27 = vld [vmem:[%s11289_s8 + $0x98] sm:$0xff]  ;;  %v5934_v13 = vrot.slane %v5921_v3, %v11353_v32 }
 0x4ef   : > { %7889 = vmatprep.subr.bf16.mxu1 %v10649_v49  ;;  %7965 = vmatprep.subr.bf16.mxu0 %v10004_v23  ;;  %v5417_v23 = vld [vmem:[%s11290_s9 + $0x2] sm:$0x7]  ;;  %v10693_v9 = vpack.c.bf16 %v5829_v36, %v5826_v27  ;;  %v5849_v36 = vld [vmem:[%s11289_s8 + $0x150] sm:$0xff] }
 0x4f0   : > { %v6458_v44 = vrot.slane %v6444_v10, %v9842_v58  ;;  %v6459_v35 = vcombine.high %v6451_v28, %v6451_v28  ;;  %v5426_v55 = vrot.slane %v5417_v23, %v11351_v50  ;;  %v5422_v45 = vrot.slane %v5417_v23, %v11352_v41  ;;  %v5843_v10 = vld [vmem:[%s11289_s8 + $0x120] sm:$0xff] }
 0x4f1   : > { %7891 = vmatpush1.bf16.msra.mxu1 %v10664_v48  ;;  %v5430_v43 = vrot.slane %v5417_v23, %v11353_v32  ;;  %v10793_v27 = vpack.c.bf16 %v5846_v12, %v5843_v10  ;;  %v5859_v23 = vld [vmem:[%s11289_s8 + $0x1a0] sm:$0xff] }
 0x4f2   : > { %7967 = vmatpush3.bf16.msra.mxu0 %v10027_v20  ;;  %6464 = vrot.lane.b32.xlu0 %v6458_v44, %s8673_s20  ;;  %v8599_v7 = vpack.i.bf16 %v6451_v28, %v6459_v35  ;;  %v5832_v20 = vld [vmem:[%s11289_s8 + $0xc8] sm:$0xff] }
 0x4f3   : > { %7893 = vmatprep.subr.bf16.mxu1 %v10676_v30  ;;  %7969 = vmatprep.subr.bf16.mxu0 %v10039_v0  ;;  %v10716_v0 = vpack.c.bf16 %v5828_v53, %v5825_v14  ;;  %v10720_v4 = vpack.c.bf16 %v5835_v29, %v5832_v20  ;;  %v5852_v44 = vld [vmem:[%s11289_s8 + $0x168] sm:$0xff]  ;;  %v11354_v14 = vld [vmem:[#allocation7_spill] sm:$0xff] }
 0x4f4   : > { %8600 = vrot.lane.b32.xlu1 %v8599_v7, %s8673_s20  ;;  %v6429_v35 = vld [vmem:[%s11290_s9 + $0x6] sm:$0x7]  ;;  %v5761_v53 = vrot.slane %v11354_v14, %v9842_v58  ;;  %v6258_v25 = vcombine.high %v11354_v14, %v11354_v14 }
 0x4f5   : > { %7895 = vmatpush1.bf16.msra.mxu1 %v10686_v60  ;;  %v6434_v7 = vrot.slane %v6429_v35, %v11352_v41  ;;  %v5855_v29 = vld [vmem:[%s11289_s8 + $0x180] sm:$0xff]  ;;  %v6442_v3 = vrot.slane %v6429_v35, %v11353_v32  ;;  %v6438_v15 = vrot.slane %v6429_v35, %v11351_v50 }
 0x4f6   : > { %7971 = vmatpush3.bf16.msra.mxu0 %v10069_v42  ;;  %7897 = vmatprep.subr.bf16.mxu1 %v10693_v9  ;;  %v5841_v42 = vld [vmem:[%s11289_s8 + $0x110] sm:$0xff]  ;;  %v6266_v33 = vcombine.high %v5761_v53, %v5761_v53  ;;  %v5879_v35 = vld [vmem:[%s11289_s8 + $0x240] sm:$0xff] }
 0x4f7   : > { %7973 = vmatprep.subr.bf16.mxu0 %v10087_v18  ;;  %5461 = vrot.lane.b32.xlu0 %v5426_v55, %s8674_s15  ;;  %v5253_v18 = vcombine.high %v10035_v56, %v10035_v56  ;;  %v10746_v34 = vpack.c.bf16 %v5841_v42, %v5838_v19  ;;  %v5844_v56 = vld [vmem:[%s11289_s8 + $0x128] sm:$0xff]  ;;  %v5858_v55 = vld [vmem:[%s11289_s8 + $0x198] sm:$0xff]  ;;  %v5861_v42 = vld [vmem:[%s11289_s8 + $0x1b0] sm:$0xff] }
 0x4f8   : > { %5459 = vrot.lane.b32.xlu1 %v5422_v45, %s8674_s15  ;;  %v5862_v45 = vld [vmem:[%s11289_s8 + $0x1b8] sm:$0xff] }
 0x4f9   : > { %7899 = vmatpush1.bf16.msra.mxu1 %v10716_v0 }
 0x4fa   : > { %7975 = vmatpush3.bf16.msra.mxu0 %v10124_v39  ;;  %7901 = vmatprep.subr.bf16.mxu1 %v10720_v4  ;;  %v5847_v39 = vld [vmem:[%s11289_s8 + $0x140] sm:$0xff] }
 0x4fb   : > { %7977 = vmatprep.subr.bf16.mxu0 %v10137_v46  ;;  %5963 = vrot.lane.b32.xlu0 %v5926_v40, %s8675_s23  ;;  %v10769_v46 = vrot.slane %v5253_v18, %v9842_v58  ;;  %v10773_v5 = vpack.c.bf16 %v5847_v39, %v5844_v56  ;;  %v5864_v40 = vld [vmem:[%s11289_s8 + $0x1c8] sm:$0xff]  ;;  %v10870_v18 = vsel %vm5958_vm7, %v8598_v26, %v8597_v57  ;;  %v5867_v57 = vld [vmem:[%s11289_s8 + $0x1e0] sm:$0xff]  ;;  %v5870_v39 = vld [vmem:[%s11289_s8 + $0x1f8] sm:$0xff] }
 0x4fc   : > { %5463 = vrot.lane.b32.xlu1 %v5430_v43, %s8674_s15  ;;  %v5868_v43 = vld [vmem:[%s11289_s8 + $0x1e8] sm:$0xff]  ;;  %v10877_v56 = vpack.c.bf16 %v5864_v40, %v5861_v42  ;;  %v10904_v10 = vpack.c.bf16 %v5870_v39, %v5867_v57  ;;  %v5901_v26 = vld [vmem:[%s11289_s8 + $0x2f0] sm:$0xff] }
 0x4fd   : > { %7903 = vmatpush1.bf16.msra.mxu1 %v10740_v63  ;;  %v5754_v28 = vcombine.high %v10769_v46, %v10769_v46  ;;  %v5900_v40 = vld [vmem:[%s11289_s8 + $0x2e8] sm:$0xff]  ;;  %v5913_v57 = vld [vmem:[%s11289_s8 + $0x350] sm:$0xff] }
 0x4fe   : > { %7979 = vmatpush3.bf16.msra.mxu0 %v10172_v61  ;;  %7905 = vmatprep.subr.bf16.mxu1 %v10746_v34  ;;  %v5853_v61 = vld [vmem:[%s11289_s8 + $0x170] sm:$0xff] }
 0x4ff   : > { %7981 = vmatprep.subr.bf16.mxu0 %v10179_v1  ;;  %5967 = vrot.lane.b32.xlu0 %v5934_v13, %s8675_s23  ;;  %v10797_v1 = vpack.c.bf16 %v5853_v61, %v5850_v16  ;;  %v5877_v13 = vld [vmem:[%s11289_s8 + $0x230] sm:$0xff]  ;;  %v5876_v61 = vld [vmem:[%s11289_s8 + $0x228] sm:$0xff] }
 0x500   : > { %5965 = vrot.lane.b32.xlu1 %v5930_v47, %s8675_s23  ;;  %v10900_v47 = vrot.slane %v6258_v25, %v9842_v58  ;;  %v5873_v16 = vld [vmem:[%s11289_s8 + $0x210] sm:$0xff] }
 0x501   : > { %7907 = vmatpush1.bf16.msra.mxu1 %v10766_v24 }
 0x502   : > { %7983 = vmatpush3.bf16.msra.mxu0 %v10214_v17  ;;  %7909 = vmatprep.subr.bf16.mxu1 %v10773_v5  ;;  %v5856_v17 = vld [vmem:[%s11289_s8 + $0x188] sm:$0xff] }
 0x503   : > { %7985 = vmatprep.subr.bf16.mxu0 %v10221_v22  ;;  %5764 = vrot.lane.b32.xlu0 %v5754_v28, %s8674_s15  ;;  %v10822_v22 = vpack.c.bf16 %v5852_v44, %v5849_v36  ;;  %v10826_v20 = vpack.c.bf16 %v5859_v23, %v5856_v17  ;;  %v5880_v28 = vld [vmem:[%s11289_s8 + $0x248] sm:$0xff]  ;;  %v10928_v36 = vpack.c.bf16 %v5876_v61, %v5873_v16  ;;  %v5882_v17 = vld [vmem:[%s11289_s8 + $0x258] sm:$0xff]  ;;  %v5919_v16 = vld [vmem:[%s11289_s8 + $0x380] sm:$0xff] }
 0x504   : > { %5762 = vrot.lane.b32.xlu1 %v10769_v46, %s8674_s15  ;;  %v5886_v23 = vld [vmem:[%s11289_s8 + $0x278] sm:$0xff] }
 0x505   : > { %7911 = vmatpush1.bf16.msra.mxu1 %v10793_v27 }
 0x506   : > { %7987 = vmatpush3.bf16.msra.mxu0 %v10256_v52  ;;  %7913 = vmatprep.subr.bf16.mxu1 %v10797_v1  ;;  %v5865_v52 = vld [vmem:[%s11289_s8 + $0x1d0] sm:$0xff] }
 0x507   : > { %7989 = vmatprep.subr.bf16.mxu0 %v10263_v59  ;;  %6471 = vrot.lane.b32.xlu0 %v6434_v7, %s8673_s20  ;;  %v10847_v59 = vpack.c.bf16 %v5858_v55, %v5855_v29  ;;  %v10851_v19 = vpack.c.bf16 %v5865_v52, %v5862_v45  ;;  %v10950_v7 = vpack.c.bf16 %v5882_v17, %v5879_v35  ;;  %v5888_v29 = vld [vmem:[%s11289_s8 + $0x288] sm:$0xff]  ;;  %v5895_v55 = vld [vmem:[%s11289_s8 + $0x2c0] sm:$0xff] }
 0x508   : > { %5766 = vrot.lane.b32.xlu1 %v5761_v53, %s8674_s15 }
 0x509   : > { %7915 = vmatpush1.bf16.msra.mxu1 %v10822_v22 }
 0x50a   : > { %7991 = vmatpush3.bf16.msra.mxu0 %v10289_v8  ;;  %7917 = vmatprep.subr.bf16.mxu1 %v10826_v20  ;;  %v5871_v8 = vld [vmem:[%s11289_s8 + $0x200] sm:$0xff] }
 0x50b   : > { %7992 = vmatprep.subr.bf16.mxu0 %v11337_v6  ;;  %6475 = vrot.lane.b32.xlu0 %v6442_v3, %s8673_s20  ;;  %v10881_v38 = vpack.c.bf16 %v5871_v8, %v5868_v43  ;;  %v5894_v3 = vld [vmem:[%s11289_s8 + $0x2b8] sm:$0xff]  ;;  %v5907_v43 = vld [vmem:[%s11289_s8 + $0x320] sm:$0xff] }
 0x50c   : > { %6473 = vrot.lane.b32.xlu1 %v6438_v15, %s8673_s20 }
 0x50d   : > { %6183 = vmatmul.mubr.f32.vlgmr.msra.gmra.mrb[6].mxu0 %v10870_v18  ;;  %7919 = vmatpush1.bf16.msra.mxu1 %v10847_v59 }
 0x50e   : > { %7994 = vmatpush3.bf16.msra.mxu0 %v10436_v11  ;;  %7921 = vmatprep.subr.bf16.mxu1 %v10851_v19  ;;  %v5874_v11 = vld [vmem:[%s11289_s8 + $0x218] sm:$0xff] }
 0x50f   : > { %7995 = vmatprep.subr.bf16.mxu0 %v11337_v6  ;;  %7629 = vmatprep.mubr.msk.f32.mxu0 %vm8670_vm5, %v11338_v54  ;;  %v10908_v12 = vpack.c.bf16 %v5877_v13, %v5874_v11  ;;  %v5912_v13 = vld [vmem:[%s11289_s8 + $0x348] sm:$0xff] }
 0x510   : > { %6267 = vrot.lane.b32.xlu1 %v5761_v53, %s8675_s23  ;;  %6269 = vrot.lane.b32.xlu0 %v6266_v33, %s8675_s23  ;;  %v5885_v53 = vld [vmem:[%s11289_s8 + $0x270] sm:$0xff]  ;;  %v5906_v33 = vld [vmem:[%s11289_s8 + $0x318] sm:$0xff] }
 0x511   : > { %7923 = vmatpush1.bf16.msra.mxu1 %v10877_v56  ;;  %v10970_v45 = vpack.c.bf16 %v5888_v29, %v5885_v53  ;;  %v6323_v29 = vld [vmem:[%s11289_s8 + $0x40] sm:$0xff] }
 0x512   : > { %7997 = vmatpush3.bf16.msra.mxu0 %v10465_v21  ;;  %7925 = vmatprep.subr.bf16.mxu1 %v10881_v38  ;;  %v5883_v21 = vld [vmem:[%s11289_s8 + $0x260] sm:$0xff] }
 0x513   : > { %7998 = vmatprep.subr.bf16.mxu0 %v11337_v6  ;;  %v10932_v44 = vpack.c.bf16 %v5883_v21, %v5880_v28  ;;  %v5915_v28 = vld [vmem:[%s11289_s8 + $0x360] sm:$0xff]  ;;  %v6368_v21 = vld [vmem:[%s11289_s8 + $0x1a8] sm:$0xff] }
 0x514   : > { %6271 = vrot.lane.b32.xlu1 %v10900_v47, %s8675_s23  ;;  %6774 = vrot.lane.b32.xlu0 %v10900_v47, %s8673_s20 }
 0x515   : > { %7927 = vmatpush1.bf16.msra.mxu1 %v10904_v10 }
 0x516   : > { %8000 = vmatpush3.bf16.msra.mxu0 %v10493_v51  ;;  %7929 = vmatprep.subr.bf16.mxu1 %v10908_v12  ;;  %v5889_v51 = vld [vmem:[%s11289_s8 + $0x290] sm:$0xff] }
 0x517   : > { %8002 = vmatprep.subr.bf16.mxu0 %v10622_v62  ;;  %v10953_v14 = vpack.c.bf16 %v5889_v51, %v5886_v23  ;;  %v5892_v62 = vld [vmem:[%s11289_s8 + $0x2a8] sm:$0xff]  ;;  %v6371_v23 = vld [vmem:[%s11289_s8 + $0x1c0] sm:$0xff]  ;;  %v6374_v51 = vld [vmem:[%s11289_s8 + $0x1d8] sm:$0xff] }
 0x518   : > { %v10973_v52 = vpack.c.bf16 %v5895_v55, %v5892_v62  ;;  %v8081_v53 = vpack.c.bf16 %v6374_v51, %v6371_v23  ;;  %v6377_v62 = vld [vmem:[%s11289_s8 + $0x1f0] sm:$0xff] }
 0x519   : > { %7630 = vmatmul.mubr.msk.f32.vlgmr.msra.gmra.mrb[8].mxu0 %vm4968_vm0, %v10598_v37  ;;  %7931 = vmatpush1.bf16.msra.mxu1 %v10928_v36 }
 0x51a   : > { %7933 = vmatprep.subr.bf16.mxu1 %v10932_v44  ;;  %8004 = vmatpush1.bf16.msra.mxu0 %v10639_v2  ;;  %v5891_v2 = vld [vmem:[%s11289_s8 + $0x2a0] sm:$0xff] }
 0x51b   : > { %8006 = vmatprep.subr.bf16.mxu0 %v10649_v49  ;;  %v5898_v49 = vld [vmem:[%s11289_s8 + $0x2d8] sm:$0xff]  ;;  %v10990_v15 = vpack.c.bf16 %v5894_v3, %v5891_v2 }
 0x51c   : > { %v10993_v42 = vpack.c.bf16 %v5901_v26, %v5898_v49  ;;  %v6329_v26 = vld [vmem:[%s11289_s8 + $0x70] sm:$0xff] }
 0x51d   : > { %7935 = vmatpush1.bf16.msra.mxu1 %v10950_v7 }
 0x51e   : > { %7937 = vmatprep.subr.bf16.mxu1 %v10953_v14  ;;  %8008 = vmatpush1.bf16.msra.mxu0 %v10664_v48  ;;  %v5897_v48 = vld [vmem:[%s11289_s8 + $0x2d0] sm:$0xff] }
 0x51f   : > { %8010 = vmatprep.subr.bf16.mxu0 %v10676_v30  ;;  %v5904_v30 = vld [vmem:[%s11289_s8 + $0x308] sm:$0xff]  ;;  %v11010_v8 = vpack.c.bf16 %v5900_v40, %v5897_v48  ;;  %v4932_v40 = vld [vmem:[%s11290_s9] sm:$0x7] }
 0x520   : > { %v11013_v25 = vpack.c.bf16 %v5907_v43, %v5904_v30  ;;  %v6332_v48 = vld [vmem:[%s11289_s8 + $0x88] sm:$0xff] }
 0x521   : > { %7939 = vmatpush1.bf16.msra.mxu1 %v10970_v45  ;;  %v8087_v30 = vpack.c.bf16 %v6332_v48, %v6329_v26  ;;  %v6359_v26 = vld [vmem:[%s11289_s8 + $0x160] sm:$0xff] }
 0x522   : > { %7941 = vmatprep.subr.bf16.mxu1 %v10973_v52  ;;  %8012 = vmatpush1.bf16.msra.mxu0 %v10686_v60  ;;  %v5903_v60 = vld [vmem:[%s11289_s8 + $0x300] sm:$0xff] }
 0x523   : > { %8014 = vmatprep.subr.bf16.mxu0 %v10693_v9  ;;  %v5910_v9 = vld [vmem:[%s11289_s8 + $0x338] sm:$0xff]  ;;  %v11030_v39 = vpack.c.bf16 %v5906_v33, %v5903_v60  ;;  %v6389_v33 = vld [vmem:[%s11289_s8 + $0x250] sm:$0xff] }
 0x524   : > { %v11033_v11 = vpack.c.bf16 %v5913_v57, %v5910_v9  ;;  %v6338_v60 = vld [vmem:[%s11289_s8 + $0xb8] sm:$0xff]  ;;  %v8657_v9 = vld.sshfl [vmem:[%s11292_s11] sm:$0xff pattern:$0x76325410]  ;;  %v4945_v57 = vrot.slane %v4932_v40, %v11353_v32 }
 0x525   : > { %7943 = vmatpush1.bf16.msra.mxu1 %v10990_v15 }
 0x526   : > { %7945 = vmatprep.subr.bf16.mxu1 %v10993_v42  ;;  %8016 = vmatpush1.bf16.msra.mxu0 %v10716_v0  ;;  %v5909_v0 = vld [vmem:[%s11289_s8 + $0x330] sm:$0xff] }
 0x527   : > { %8018 = vmatprep.subr.bf16.mxu0 %v10720_v4  ;;  %v5916_v4 = vld [vmem:[%s11289_s8 + $0x368] sm:$0xff]  ;;  %v11051_v61 = vpack.c.bf16 %v5912_v13, %v5909_v0  ;;  %v4937_v0 = vrot.slane %v4932_v40, %v11352_v41  ;;  %v6395_v41 = vld [vmem:[%s11289_s8 + $0x280] sm:$0xff] }
 0x529   : > { %7947 = vmatpush1.bf16.msra.mxu1 %v11010_v8 }
 0x52a   : > { %7949 = vmatprep.subr.bf16.mxu1 %v11013_v25  ;;  %8020 = vmatpush1.bf16.msra.mxu0 %v10740_v63  ;;  %v11055_v63 = vpack.c.bf16 %v5919_v16, %v5916_v4  ;;  %v6341_v16 = vld [vmem:[%s11289_s8 + $0xd0] sm:$0xff] }
 0x52b   : > { %8022 = vmatprep.subr.bf16.mxu0 %v10746_v34  ;;  %v5918_v34 = vld [vmem:[%s11289_s8 + $0x378] sm:$0xff] }
 0x52c   : > { %6041 = vmatmul.mubr.f32.vlgmr.msra.gmra.mrb[24].mxu1 %v10870_v18  ;;  %v6365_v18 = vld [vmem:[%s11289_s8 + $0x190] sm:$0xff]  ;;  %v11072_v35 = vpack.c.bf16 %v5918_v34, %v5915_v28  ;;  %v6344_v28 = vld [vmem:[%s11289_s8 + $0xe8] sm:$0xff]  ;;  %v5268_v34 = vcombine.high %v8657_v9, %v8657_v9 }
 0x52d   : > { %7951 = vmatpush1.bf16.msra.mxu1 %v11030_v39  ;;  %6111 = vmatprep.mubr.f32.mxu1 %v11338_v54  ;;  %v8077_v17 = vpack.c.bf16 %v6368_v21, %v6365_v18 }
 0x52e   : > { %7953 = vmatprep.subr.bf16.mxu1 %v11033_v11  ;;  %8024 = vmatpush1.bf16.msra.mxu0 %v10766_v24  ;;  %v6317_v24 = vld [vmem:[%s11289_s8 + $0x10] sm:$0xff] }
 0x52f   : > { %8026 = vmatprep.subr.bf16.mxu0 %v10773_v5  ;;  %v6320_v5 = vld [vmem:[%s11289_s8 + $0x28] sm:$0xff] }
 0x531   : > { %7955 = vmatpush1.bf16.msra.mxu1 %v11051_v61 }
 0x532   : > { %7957 = vmatprep.subr.bf16.mxu1 %v11055_v63  ;;  %8028 = vmatpush1.bf16.msra.mxu0 %v10793_v27  ;;  %v8079_v27 = vpack.c.bf16 %v6320_v5, %v6317_v24  ;;  %v8095_v24 = vpack.c.bf16 %v6344_v28, %v6341_v16 }
 0x533   : > { %8030 = vmatprep.subr.bf16.mxu0 %v10797_v1  ;;  %v6326_v1 = vld [vmem:[%s11289_s8 + $0x58] sm:$0xff] }
 0x534   : > { %v8083_v3 = vpack.c.bf16 %v6326_v1, %v6323_v29  ;;  %v6401_v1 = vld [vmem:[%s11289_s8 + $0x2b0] sm:$0xff] }
 0x535   : > { %7959 = vmatpush1.bf16.msra.mxu1 %v11072_v35 }
 0x536   : > { %8032 = vmatpush1.bf16.msra.mxu0 %v10822_v22  ;;  %8078 = vmatprep.subr.bf16.mxu1 %v8077_v17  ;;  %v6380_v22 = vld [vmem:[%s11289_s8 + $0x208] sm:$0xff] }
 0x537   : > { %8034 = vmatprep.subr.bf16.mxu0 %v10826_v20  ;;  %v8085_v20 = vpack.c.bf16 %v6380_v22, %v6377_v62 }
 0x538   : > { %7327 = vmatmul.mubr.msk.f32.vlgmr.msra.gmra.mrb[24].mxu1 %vm4968_vm0, %v10598_v37  ;;  %v7420_v55 = vpop.f32.mrb[0].mxu0  ;;  %v6383_v37 = vld [vmem:[%s11289_s8 + $0x220] sm:$0xff] }
 0x539   : > { %v7421_v2 = vpop.f32.mrb[1].mxu0  ;;  %8080 = vmatpush3.bf16.msra.mxu1 %v8079_v27  ;;  %v6347_v27 = vld [vmem:[%s11289_s8 + $0x100] sm:$0xff] }
 0x53a   : > { %v7422_v49 = vadd.f32 %v7421_v2, %v7420_v55  ;;  %8036 = vmatpush1.bf16.msra.mxu0 %v10847_v59  ;;  %8082 = vmatprep.subr.bf16.mxu1 %v8081_v53  ;;  %v6386_v59 = vld [vmem:[%s11289_s8 + $0x238] sm:$0xff] }
 0x53b   : > { %8038 = vmatprep.subr.bf16.mxu0 %v10851_v19  ;;  %v8089_v43 = vpack.c.bf16 %v6386_v59, %v6383_v37  ;;  %v6335_v19 = vld [vmem:[%s11289_s8 + $0xa0] sm:$0xff]  ;;  %v6350_v53 = vld [vmem:[%s11289_s8 + $0x118] sm:$0xff]  ;;  %v6766_v37 = vcombine.high %v10900_v47, %v10900_v47  ;;  %v6773_v47 = vrot.slane %v9979_v31, %v9842_v58  ;;  %v6413_v31 = vld [vmem:[%s11289_s8 + $0x310] sm:$0xff] }
 0x53c   : > { %v8091_v13 = vpack.c.bf16 %v6338_v60, %v6335_v19  ;;  %v8099_v55 = vpack.c.bf16 %v6350_v53, %v6347_v27 }
 0x53d   : > { %8084 = vmatpush3.bf16.msra.mxu1 %v8083_v3  ;;  %v6356_v3 = vld [vmem:[%s11289_s8 + $0x148] sm:$0xff]  ;;  %6776 = vrot.lane.b32.xlu1 %v6766_v37, %s8673_s20 }
 0x53e   : > { %8040 = vmatpush1.bf16.msra.mxu0 %v10877_v56  ;;  %8086 = vmatprep.subr.bf16.mxu1 %v8085_v20  ;;  %v6392_v56 = vld [vmem:[%s11289_s8 + $0x268] sm:$0xff] }
 0x53f   : > { %8042 = vmatprep.subr.bf16.mxu0 %v10881_v38  ;;  %v4941_v38 = vrot.slane %v4932_v40, %v11351_v50  ;;  %v8093_v4 = vpack.c.bf16 %v6392_v56, %v6389_v33  ;;  %v6398_v50 = vld [vmem:[%s11289_s8 + $0x298] sm:$0xff]  ;;  %6778 = vrot.lane.b32.xlu0 %v6773_v47, %s8673_s20 }
 0x541   : > { %8088 = vmatpush3.bf16.msra.mxu1 %v8087_v30 }
 0x542   : > { %8044 = vmatpush1.bf16.msra.mxu0 %v10904_v10  ;;  %8090 = vmatprep.subr.bf16.mxu1 %v8089_v43  ;;  %v5180_v10 = vadd.f32 %v7422_v49, %v4945_v57  ;;  %v6419_v57 = vld [vmem:[%s11289_s8 + $0x340] sm:$0xff] }
 0x543   : > { %8046 = vmatprep.subr.bf16.mxu0 %v10908_v12  ;;  %v8097_v12 = vpack.c.bf16 %v6398_v50, %v6395_v41 }
 0x544   : > { %v5108_v32 = vpop.f32.mrb[18].mxu1 }
 0x545   : > { %v8134_v18 = vadd.f32 %v5108_v32, %v4937_v0  ;;  %v5249_v21 = vpop.f32.mrb[2].mxu0  ;;  %v5110_v17 = vpop.f32.mrb[19].mxu1  ;;  %8092 = vmatpush3.bf16.msra.mxu1 %v8091_v13  ;;  %v6422_v0 = vld [vmem:[%s11289_s8 + $0x358] sm:$0xff] }
 0x546   : > { %v5250_v5 = vadd.f32 %v5249_v21, %v5180_v10  ;;  %v8135_v23 = vadd.f32 %v5110_v17, %v4941_v38  ;;  %v7601_v51 = vpop.f32.mrb[3].mxu0  ;;  %8048 = vmatpush1.bf16.msra.mxu0 %v10928_v36  ;;  %8094 = vmatprep.subr.bf16.mxu1 %v8093_v4  ;;  %v6404_v36 = vld [vmem:[%s11289_s8 + $0x2c8] sm:$0xff]  ;;  %v8113_v13 = vpack.c.bf16 %v6422_v0, %v6419_v57  ;;  %v6425_v38 = vld [vmem:[%s11289_s8 + $0x370] sm:$0xff] }
 0x547   : > { %v5272_v29 = vadd.f32 %v8657_v9, %v8134_v18  ;;  %8050 = vmatprep.subr.bf16.mxu0 %v10932_v44  ;;  %v8101_v2 = vpack.c.bf16 %v6404_v36, %v6401_v1  ;;  %v6353_v44 = vld [vmem:[%s11289_s8 + $0x130] sm:$0xff]  ;;  %v6428_v4 = vld [vmem:[%s11289_s8 + $0x388] sm:$0xff] }
 0x548   : > { %v5274_v62 = vadd.f32 %v10769_v46, %v5250_v5  ;;  %v5273_v22 = vadd.f32 %v8135_v23, %v5268_v34  ;;  %v6407_v46 = vld [vmem:[%s11289_s8 + $0x2e0] sm:$0xff]  ;;  %v8103_v49 = vpack.c.bf16 %v6356_v3, %v6353_v44 }
 0x549   : > { %8632 = vtanh.f32 %v5272_v29  ;;  %8096 = vmatpush3.bf16.msra.mxu1 %v8095_v24 }
 0x54a   : > { %8634 = vtanh.f32 %v5274_v62  ;;  %8052 = vmatpush1.bf16.msra.mxu0 %v10950_v7  ;;  %8098 = vmatprep.subr.bf16.mxu1 %v8097_v12  ;;  %v6410_v7 = vld [vmem:[%s11289_s8 + $0x2f8] sm:$0xff] }
 0x54b   : > { %8636 = vtanh.f32 %v5273_v22  ;;  %8054 = vmatprep.subr.bf16.mxu0 %v10953_v14  ;;  %v8105_v20 = vpack.c.bf16 %v6410_v7, %v6407_v46  ;;  %v6362_v14 = vld [vmem:[%s11289_s8 + $0x178] sm:$0xff] }
 0x54c   : > { %v8107_v48 = vpack.c.bf16 %v6362_v14, %v6359_v26 }
 0x54d   : > { %8100 = vmatpush3.bf16.msra.mxu1 %v8099_v55 }
 0x54e   : > { %8056 = vmatpush1.bf16.msra.mxu0 %v10970_v45  ;;  %8102 = vmatprep.subr.bf16.mxu1 %v8101_v2 }
 0x54f   : > { %8058 = vmatprep.subr.bf16.mxu0 %v10973_v52 }
 0x551   : > { %8104 = vmatpush3.bf16.msra.mxu1 %v8103_v49 }
 0x552   : > { %8060 = vmatpush1.bf16.msra.mxu0 %v10990_v15  ;;  %8106 = vmatprep.subr.bf16.mxu1 %v8105_v20 }
 0x553   : > { %v8633_v45 = vpop.eup %8632  ;;  %8062 = vmatprep.subr.bf16.mxu0 %v10993_v42 }
 0x554   : > { %v8635_v59 = vpop.eup %8634 }
 0x555   : > { %v8637_v40 = vpop.eup %8636  ;;  %8108 = vmatpush3.bf16.msra.mxu1 %v8107_v48  ;;  %v5295_v15 = vrot.slane %v8635_v59, %v9842_v58 }
 0x556   : > { %8064 = vmatpush1.bf16.msra.mxu0 %v11010_v8  ;;  %8109 = vmatprep.subr.bf16.mxu1 %v11337_v6  ;;  %v5281_v52 = vcombine.low %v8633_v45, %v8637_v40  ;;  %v6416_v8 = vld [vmem:[%s11289_s8 + $0x328] sm:$0xff] }
 0x557   : > { %8066 = vmatprep.subr.bf16.mxu0 %v11013_v25  ;;  %v8110_v33 = vpack.c.bf16 %v6416_v8, %v6413_v31 }
 0x558   : > { %v5288_v42 = vrot.slane %v5281_v52, %v9842_v58 }
 0x55a   : > { %v5296_v30 = vcombine.low %v5288_v42, %v5295_v15 }
 0x55c   : > { %5301 = vst.msk [vmem:[%s11291_s10] sm:$0x3f] %vm5300_vm12, %v5296_v30 }
 0x564   : > { %v6465_v60 = vpop.permute.xlu0 %6464 }
 0x566   : > { %v8601_v25 = vpop.permute.xlu1 %8600 }
 0x567   : > { %v8603_v43 = vunpack.i.h.bf16 %v8601_v25  ;;  %v8602_v19 = vunpack.i.l.bf16 %v8601_v25 }
 0x569   : > { %v6468_v56 = vsel %vm6466_vm13, %v8602_v19, %v6465_v60  ;;  %v6467_v9 = vsel %vm6466_vm13, %v8603_v43, %v8602_v19  ;;  %v5462_v16 = vpop.permute.xlu0 %5461 }
 0x56a   : > { %6548 = vmatprep.mubr.f32.mxu0 %v6468_v56  ;;  %6690 = vmatprep.mubr.f32.mxu1 %v6468_v56 }
 0x56b   : > { %6549 = vmatmul.mubr.f32.vlgmr.msra.gmra.mrb[10].mxu0 %v6467_v9  ;;  %6691 = vmatmul.mubr.f32.vlgmr.msra.gmra.mrb[26].mxu1 %v6467_v9 }
 0x56c   : > { %8068 = vmatpush1.bf16.msra.mxu0 %v11030_v39  ;;  %8111 = vmatpush3.bf16.msra.mxu1 %v8110_v33  ;;  %v5460_v39 = vpop.permute.xlu1 %5459 }
 0x56d   : > { %8070 = vmatprep.subr.bf16.mxu0 %v11033_v11  ;;  %8112 = vmatprep.subr.bf16.mxu1 %v11337_v6  ;;  %v8116_v11 = vpack.c.bf16 %v6428_v4, %v6425_v38  ;;  %v5964_v41 = vpop.permute.xlu0 %5963 }
 0x56e   : > { %6619 = vmatprep.mubr.f32.mxu0 %v11338_v54  ;;  %7644 = vmatprep.mubr.msk.f32.mxu1 %vm8670_vm5, %v11338_v54  ;;  %vm5803_vm5 = vcmask 259076  }
 0x56f   : > { %vm5804_vm14 = vmor %vm5803_vm5, %vm10400_vm9 }
 0x570   : > { %8072 = vmatpush1.bf16.msra.mxu0 %v11051_v61  ;;  %8114 = vmatpush3.bf16.msra.mxu1 %v8113_v13  ;;  %v5464_v28 = vpop.permute.xlu1 %5463 }
 0x571   : > { %8074 = vmatprep.subr.bf16.mxu0 %v11055_v63  ;;  %8115 = vmatprep.subr.bf16.mxu1 %v11337_v6  ;;  %v5968_v34 = vpop.permute.xlu0 %5967  ;;  %v5465_v6 = vsel %vm5454_vm2, %v5460_v39, %v5462_v16  ;;  %v5466_v17 = vsel %vm5454_vm2, %v5462_v16, %v5464_v28 }
 0x574   : > { %8076 = vmatpush1.bf16.msra.mxu0 %v11072_v35  ;;  %8117 = vmatpush3.bf16.msra.mxu1 %v8116_v11  ;;  %v5966_v54 = vpop.permute.xlu1 %5965 }
 0x575   : > { %v5969_v50 = vsel %vm5958_vm7, %v5964_v41, %v5966_v54  ;;  %v5765_v18 = vpop.permute.xlu0 %5764  ;;  %v5970_v31 = vsel %vm5958_vm7, %v5966_v54, %v5968_v34 }
 0x577   : > { %7329 = vmatmul.mubr.msk.f32.vlgmr.msra.gmra.mrb[10].mxu0 %vm4968_vm0, %v6465_v60  ;;  %7645 = vmatmul.mubr.msk.f32.vlgmr.msra.gmra.mrb[28].mxu1 %vm4968_vm0, %v6465_v60 }
 0x578   : > { %v5763_v63 = vpop.permute.xlu1 %5762 }
 0x579   : > { %v5768_v23 = vsel %vm5454_vm2, %v5763_v63, %v5765_v18  ;;  %v6472_v47 = vpop.permute.xlu0 %6471 }
 0x57c   : > { %v5767_v35 = vpop.permute.xlu1 %5766 }
 0x57d   : > { %v5769_v29 = vsel %vm5454_vm2, %v5765_v18, %v5767_v35  ;;  %v6476_v15 = vpop.permute.xlu0 %6475 }
 0x580   : > { %v6474_v40 = vpop.permute.xlu1 %6473 }
 0x582   : > { %v6270_v30 = vpop.permute.xlu0 %6269 }
 0x584   : > { %v6268_v52 = vpop.permute.xlu1 %6267 }
 0x585   : > { %v6273_v43 = vsel %vm5958_vm7, %v6268_v52, %v6270_v30 }
 0x588   : > { %v6272_v42 = vpop.permute.xlu1 %6271 }
 0x589   : > { %v6274_v33 = vsel %vm5958_vm7, %v6270_v30, %v6272_v42  ;;  %vm6817_vm7 = vcmask 521220  }
 0x58a   : > { %vm6818_vm10 = vmor %vm6817_vm7, %vm6816_vm4 }
 0x5b3   : > { %v7462_v61 = vpop.f32.mrb[20].mxu1 }
 0x5b4   : > { %v7463_v32 = vpop.f32.mrb[21].mxu1 }
 0x5b5   : > { %v7464_v10 = vadd.f32 %v7463_v32, %v7462_v61  ;;  %v6775_v61 = vpop.permute.xlu0 %6774 }
 0x5b7   : > { %v5681_v21 = vadd.f32 %v7464_v10, %v5464_v28 }
 0x5bf   : > { %v5609_v24 = vpop.f32.mrb[4].mxu0  ;;  %v5750_v5 = vpop.f32.mrb[22].mxu1 }
 0x5c0   : > { %v8136_v51 = vadd.f32 %v5609_v24, %v5465_v6  ;;  %v5751_v12 = vadd.f32 %v5750_v5, %v5681_v21  ;;  %v5611_v27 = vpop.f32.mrb[5].mxu0  ;;  %v7616_v53 = vpop.f32.mrb[23].mxu1  ;;  %v6477_v6 = vsel %vm6466_vm13, %v6472_v47, %v6474_v40 }
 0x5c1   : > { %v8137_v1 = vadd.f32 %v5611_v27, %v5466_v17  ;;  %v6478_v17 = vsel %vm6466_vm13, %v6474_v40, %v6476_v15 }
 0x5c2   : > { %v5773_v36 = vadd.f32 %v8136_v51, %v5768_v23  ;;  %v5775_v62 = vadd.f32 %v5767_v35, %v5751_v12 }
 0x5c3   : > { %v5774_v22 = vadd.f32 %v8137_v1, %v5769_v29 }
 0x5c4   : > { %8638 = vtanh.f32 %v5773_v36 }
 0x5c5   : > { %8640 = vtanh.f32 %v5774_v22 }
 0x5c6   : > { %8642 = vtanh.f32 %v5775_v62 }
 0x5ce   : > { %v8639_v55 = vpop.eup %8638 }
 0x5cf   : > { %v8641_v2 = vpop.eup %8640 }
 0x5d0   : > { %v8643_v44 = vpop.eup %8642  ;;  %v5782_v3 = vcombine.low %v8639_v55, %v8641_v2 }
 0x5d1   : > { %v5796_v46 = vrot.slane %v8643_v44, %v9842_v58 }
 0x5d2   : > { %v5789_v7 = vrot.slane %v5782_v3, %v9842_v58 }
 0x5d4   : > { %v5797_v49 = vcombine.low %v5789_v7, %v5796_v46 }
 0x5d6   : > { %5798 = vrot.lane.b32.xlu1 %v5797_v49, %s8672_s30  ;;  %s8676_s30 = smov 32  }
 0x5e0   : > { %v7504_v20 = vpop.f32.mrb[6].mxu0 }
 0x5e1   : > { %v7505_v26 = vpop.f32.mrb[7].mxu0 }
 0x5e2   : > { %v7506_v14 = vadd.f32 %v7505_v26, %v7504_v20 }
 0x5e4   : > { %v6185_v48 = vadd.f32 %v7506_v14, %v5968_v34  ;;  %v6779_v34 = vpop.permute.xlu0 %6778 }
 0x5ec   : > { %v6254_v37 = vpop.f32.mrb[8].mxu0 }
 0x5ed   : > { %v6255_v45 = vadd.f32 %v6254_v37, %v6185_v48  ;;  %v7631_v59 = vpop.f32.mrb[9].mxu0 }
 0x5ef   : > { %v6280_v8 = vadd.f32 %v6272_v42, %v6255_v45 }
 0x5f1   : > { %8644 = vtanh.f32 %v6280_v8 }
 0x5fb   : > { %v8645_v0 = vpop.eup %8644 }
 0x5fc   : > { %v6301_v39 = vrot.slane %v8645_v0, %v9842_v58 }
 0x60b   : > { %v6113_v25 = vpop.f32.mrb[24].mxu1 }
 0x60c   : > { %v8138_v19 = vadd.f32 %v6113_v25, %v5969_v50  ;;  %v6115_v60 = vpop.f32.mrb[25].mxu1  ;;  %v6777_v50 = vpop.permute.xlu1 %6776 }
 0x60d   : > { %v8139_v56 = vadd.f32 %v6115_v60, %v5970_v31  ;;  %v6781_v27 = vsel %vm6466_vm13, %v6777_v50, %v6779_v34  ;;  %v6780_v53 = vsel %vm6466_vm13, %v6775_v61, %v6777_v50 }
 0x60e   : > { %v6278_v9 = vadd.f32 %v8138_v19, %v6273_v43 }
 0x60f   : > { %v6279_v57 = vadd.f32 %v8139_v56, %v6274_v33 }
 0x610   : > { %8646 = vtanh.f32 %v6278_v9 }
 0x611   : > { %8648 = vtanh.f32 %v6279_v57 }
 0x61a   : > { %v8647_v13 = vpop.eup %8646 }
 0x61b   : > { %v8649_v38 = vpop.eup %8648 }
 0x61c   : > { %v6287_v4 = vcombine.low %v8647_v13, %v8649_v38 }
 0x61e   : > { %v6294_v11 = vrot.slane %v6287_v4, %v9842_v58 }
 0x620   : > { %v6302_v16 = vcombine.low %v6294_v11, %v6301_v39 }
 0x622   : > { %6303 = vrot.lane.b32.xlu0 %v6302_v16, %s8676_s30 }
 0x63e   : > { %v7546_v28 = vpop.f32.mrb[26].mxu1 }
 0x63f   : > { %v7547_v41 = vpop.f32.mrb[27].mxu1 }
 0x640   : > { %v7548_v54 = vadd.f32 %v7547_v41, %v7546_v28 }
 0x642   : > { %v6693_v32 = vadd.f32 %v7548_v54, %v6476_v15 }
 0x648   : > { %v5799_v10 = vpop.permute.xlu1 %5798 }
 0x649   : > { %v5800_v18 = vrot.slane %v5799_v10, 6 }
 0x64a   : > { %v6621_v35 = vpop.f32.mrb[10].mxu0  ;;  %v6762_v21 = vpop.f32.mrb[28].mxu1 }
 0x64b   : > { %v5801_v24 = vsel %vm4620_vm6, %v5800_v18, %v5799_v10  ;;  %v8140_v5 = vadd.f32 %v6621_v35, %v6477_v6  ;;  %v6763_v23 = vadd.f32 %v6762_v21, %v6693_v32  ;;  %v6623_v51 = vpop.f32.mrb[11].mxu0  ;;  %v7646_v12 = vpop.f32.mrb[29].mxu1  ;;  %vm6309_vm6 = vcmask 1041664  }
 0x64c   : > { %5805 = vst.msk [vmem:[%s11291_s10 + $0x4] sm:$0x3f] %vm5804_vm14, %v5801_v24  ;;  %v8141_v29 = vadd.f32 %v6623_v51, %v6478_v17  ;;  %vm6310_vm9 = vmor %vm4797_vm8, %vm6309_vm6 }
 0x64d   : > { %v6785_v1 = vadd.f32 %v8140_v5, %v6780_v53  ;;  %v6787_v36 = vadd.f32 %v6779_v34, %v6763_v23  ;;  %vm6312_vm2 = vmor %vm6311_vm15, %vm6310_vm9 }
 0x64e   : > { %v6786_v62 = vadd.f32 %v8141_v29, %v6781_v27 }
 0x64f   : > { %8650 = vtanh.f32 %v6785_v1 }
 0x650   : > { %8652 = vtanh.f32 %v6786_v62 }
 0x651   : > { %8654 = vtanh.f32 %v6787_v36 }
 0x659   : > { %v8651_v22 = vpop.eup %8650 }
 0x65a   : > { %v8653_v55 = vpop.eup %8652 }
 0x65b   : > { %v8655_v2 = vpop.eup %8654  ;;  %v6794_v44 = vcombine.low %v8651_v22, %v8653_v55 }
 0x65c   : > { %v6808_v3 = vrot.slane %v8655_v2, %v9842_v58 }
 0x65d   : > { %v6801_v46 = vrot.slane %v6794_v44, %v9842_v58 }
 0x65f   : > { %v6809_v7 = vcombine.low %v6801_v46, %v6808_v3 }
 0x661   : > { %6810 = vrot.lane.b32.xlu1 %v6809_v7, %s8677_s16 }
 0x694   : > { %v6304_v49 = vpop.permute.xlu0 %6303 }
 0x695   : > { %v6305_v20 = vrot.slane %v6304_v49, 6 }
 0x697   : > { %v6307_v26 = vsel %vm6306_vm1, %v6305_v20, %v6304_v49 }
 0x698   : > { %6313 = vst.msk [vmem:[%s11291_s10 + $0x8] sm:$0x3f] %vm6312_vm2, %v6307_v26 }
 0x6d3   : > { %v6811_v58 = vpop.permute.xlu1 %6810 }
 0x6d4   : > { %v6812_v14 = vrot.slane %v6811_v58, 6 }
 0x6d6   : > { %v6813_v48 = vsel %vm4968_vm0, %v6812_v14, %v6811_v58 }
 0x6d7   : > { %6819 = vst.msk [vmem:[%s11291_s10 + $0xc] sm:$0x3f] %vm6818_vm10, %v6813_v48 }
 0x6d8 PF: > { %s23_s21 = sadd.s32 1, %s8664_s21  }
 0x6d9   : > { %p20_p7 = scmp.ge.s32.totalorder %s23_s21, 6  }
 0x6db   :  { %22 = sbr.rel (!%p20_p7) target bundleno = 1 (0x1), region = 116 }

</bundles_post_ra>
